<compile_context>
chip_gen: v7x
topology: tpu7x:2x2x1
jax: 0.10.0
libtpu: 0.0.40
codegen_flags: <defaults>
</compile_context>

<pallas_src>
import functools

import jax
import jax.numpy as jnp
from jax.experimental import pallas as pl
from jax.experimental.pallas import tpu as pltpu


def _round_up(x, m):
    return ((x + m - 1) // m) * m


# ---------------------------------------------------------------------------
# Fused Pallas kernel: all conv branches + ReLU + k-max pooling + MLP head
# ---------------------------------------------------------------------------
def _textcnn_fused_kernel(x_ref, wconv_ref, bconv_ref, w1_ref, b1_ref, w2_ref,
                          b2_ref, o_ref, *, kernel_sizes, dilations, k,
                          L_pad, L_orig, BB, C):
    """One batch block of BB samples.

    x_ref:     (BB*L_pad, E)        bf16  embedded tokens, batch-flattened
    wconv_ref: (E, sum(K_i)*C)      bf16  all conv taps stacked on the lane axis
    bconv_ref: (n_branch, C)        f32   conv biases
    w1_ref:    (n_branch*C*k, H)    bf16  final_state weight (rows pre-permuted)
    b1_ref:    (1, H)               f32
    w2_ref:    (H, n_out)           bf16  fc weight
    b2_ref:    (1, n_out)           f32
    o_ref:     (BB, n_out)          f32   clamp(fc(relu(final_state(feat))), 0, 1)
    """
    N = BB * L_pad
    neg_inf = jnp.float32(float("-inf"))

    x = x_ref[...]                                                    # (N, E) bf16
    # One wide MXU matmul covering every tap of every conv branch.
    y_all = jnp.dot(x, wconv_ref[...],
                    preferred_element_type=jnp.float32)               # (N, sumK*C) f32

    biases = bconv_ref[...]                                           # (n_branch, C)
    # position-along-sequence index, broadcast over the batch block
    t2 = jax.lax.broadcasted_iota(jnp.int32, (L_pad, C), 0).astype(jnp.float32)
    t_idx = jnp.broadcast_to(t2[None, :, :], (BB, L_pad, C))          # (BB, L, C)

    feat_cols = []
    col = 0
    for bi, (K, D) in enumerate(zip(kernel_sizes, dilations)):
        L_out = L_orig - D * (K - 1)                                  # valid conv positions

        # --- dilated conv = sum of row-shifted per-tap matmul outputs --------
        acc = jnp.zeros((N, C), jnp.float32)
        for j in range(K):
            yj = y_all[:, col:col + C]                                # (N, C) tap output
            col += C
            sh = j * D
            if sh > 0:
                # shift rows up by sh; shifted-in rows only land at positions
                # t >= L_out which are masked out below.
                yj = jnp.concatenate(
                    [yj[sh:, :], jnp.zeros((sh, C), jnp.float32)], axis=0)
            acc = acc + yj
        acc = jnp.maximum(acc + biases[bi:bi + 1, :], 0.0)            # bias + ReLU
        v = acc.reshape(BB, L_pad, C)                                 # (BB, L, C)
        vm = jnp.where(t_idx < float(L_out), v, neg_inf)              # mask invalid t

        # --- k-max pooling, O(k*L): repeatedly mask the leftmost maximum -----
        work = vm
        for _ in range(k):
            cur = jnp.max(work, axis=1, keepdims=True)                # (BB, 1, C)
            pos = jnp.min(jnp.where(work == cur, t_idx, float(L_pad)),
                          axis=1, keepdims=True)                      # leftmost argmax
            work = jnp.where(t_idx == pos, neg_inf, work)
        rem = jnp.logical_and(work == neg_inf, vm > neg_inf)          # k selected slots

        # --- emit selected values in original sequence order -----------------
        for _ in range(k):
            pos = jnp.min(jnp.where(rem, t_idx, float(L_pad)),
                          axis=1, keepdims=True)
            hit = t_idx == pos
            feat_cols.append(jnp.sum(jnp.where(hit, v, 0.0), axis=1))  # (BB, C)
            rem = jnp.logical_and(rem, jnp.logical_not(hit))

    # Feature in kernel order (branch, slot, channel); w1 rows are pre-permuted
    # in pack_params so this matches torch's (branch, channel, slot) cat/view order.
    f = jnp.concatenate(feat_cols, axis=1)                            # (BB, F) f32
    # dropout: identity in eval mode
    h = jnp.dot(f.astype(jnp.bfloat16), w1_ref[...],
                preferred_element_type=jnp.float32) + b1_ref[...]
    h = jnp.maximum(h, 0.0)                                           # ReLU
    out = jnp.dot(h.astype(jnp.bfloat16), w2_ref[...],
                  preferred_element_type=jnp.float32) + b2_ref[...]
    o_ref[...] = jnp.clip(out, 0.0, 1.0)                              # torch.clamp(x, 0, 1)


# ---------------------------------------------------------------------------
# Wrapper
# ---------------------------------------------------------------------------
def textcnn_forward(tokens, params, *, kernel_sizes, dilations, max_pooling_k):
    """TextCNN forward (eval mode). tokens: (B, L) int -> (B, n_output) f32."""
    embed = params["embed"]
    B, L = tokens.shape
    E = embed.shape[1]
    C = params["bconv"].shape[1]
    n_branch = len(kernel_sizes)
    k = max_pooling_k
    F, H = params["w1"].shape
    n_out = params["w2"].shape[1]
    TC = params["wconv"].shape[1]
    for K, D in zip(kernel_sizes, dilations):
        assert L - D * (K - 1) >= k, "k-max pooling needs >= k valid conv positions"

    # Two batch blocks on a 'parallel' grid axis (keeps both v7x TensorCores busy);
    # block row counts are multiples of 8 to satisfy the sublane tiling rule.
    num_blocks = 2 if B > 1 else 1
    BB = _round_up(pl.cdiv(B, num_blocks), 8)
    B_pad = num_blocks * BB
    L_pad = _round_up(L, 8)

    # TODO(synk): embedding lookup is a data-dependent HBM gather; kept in XLA.
    emb = embed[tokens].astype(jnp.bfloat16)                          # (B, L, E)
    emb = jnp.pad(emb, ((0, B_pad - B), (0, L_pad - L), (0, 0)))
    x_flat = emb.reshape(B_pad * L_pad, E)

    kern = functools.partial(
        _textcnn_fused_kernel,
        kernel_sizes=tuple(kernel_sizes), dilations=tuple(dilations),
        k=k, L_pad=L_pad, L_orig=L, BB=BB, C=C)

    out = pl.pallas_call(
        kern,
        out_shape=jax.ShapeDtypeStruct((B_pad, n_out), jnp.float32),
        grid=(num_blocks,),
        in_specs=[
            pl.BlockSpec((BB * L_pad, E), lambda b: (b, 0)),   # activations (per block)
            pl.BlockSpec((E, TC), lambda b: (0, 0)),           # stacked conv weights
            pl.BlockSpec((n_branch, C), lambda b: (0, 0)),     # conv biases
            pl.BlockSpec((F, H), lambda b: (0, 0)),            # final_state weight
            pl.BlockSpec((1, H), lambda b: (0, 0)),            # final_state bias
            pl.BlockSpec((H, n_out), lambda b: (0, 0)),        # fc weight
            pl.BlockSpec((1, n_out), lambda b: (0, 0)),        # fc bias
        ],
        out_specs=pl.BlockSpec((BB, n_out), lambda b: (b, 0)),
        compiler_params=pltpu.CompilerParams(dimension_semantics=("parallel",)),
    )(x_flat, params["wconv"], params["bconv"], params["w1"], params["b1"],
      params["w2"], params["b2"])
    return out[:B]


# ---------------------------------------------------------------------------
# Parameters: torch-native layouts -> fused-kernel layouts
# ---------------------------------------------------------------------------
def init_torch_params(key, *, max_features, embed_size, out_channel, kernel_sizes,
                      max_pooling_k, n_final_state, n_output):
    """Parameters in the PyTorch module's native layouts."""
    n_branch = len(kernel_sizes)
    ks = jax.random.split(key, 3 + 2 * n_branch)
    embed = jax.random.normal(ks[0], (max_features, embed_size), jnp.float32) * 0.1
    convs = []
    for i, K in enumerate(kernel_sizes):
        w = jax.random.normal(ks[1 + 2 * i], (out_channel, 1, K, embed_size),
                              jnp.float32) * 0.1                      # (C, 1, K, E)
        b = jax.random.normal(ks[2 + 2 * i], (out_channel,), jnp.float32) * 0.1
        convs.append((w, b))
    F = n_branch * out_channel * max_pooling_k
    w1 = jax.random.normal(ks[-2], (n_final_state, F), jnp.float32) * 0.1   # (out, in)
    b1 = jnp.full((n_final_state,), 0.01, jnp.float32)
    w2 = jax.random.normal(ks[-1], (n_output, n_final_state), jnp.float32) * 0.1
    b2 = jnp.full((n_output,), 0.01, jnp.float32)
    return {"embed": embed, "convs": convs, "w1": w1, "b1": b1, "w2": w2, "b2": b2}


def pack_params(tp, *, kernel_sizes, max_pooling_k):
    """PyTorch layouts -> fused-kernel layouts (bf16 MXU operands, f32 biases)."""
    k = max_pooling_k
    C = tp["convs"][0][0].shape[0]
    n_branch = len(kernel_sizes)
    wcols, brows = [], []
    for w, b in tp["convs"]:                       # w: (C, 1, K, E), b: (C,)
        K = w.shape[2]
        w_kec = jnp.transpose(w[:, 0], (1, 2, 0))  # (K, E, C)
        wcols.append(jnp.concatenate([w_kec[j] for j in range(K)], axis=1))  # (E, K*C)
        brows.append(b[None, :])
    wconv = jnp.concatenate(wcols, axis=1).astype(jnp.bfloat16)               # (E, sumK*C)
    bconv = jnp.concatenate(brows, axis=0).astype(jnp.float32)                # (n_branch, C)
    # Kernel builds features as (branch, slot, channel); torch's cat/view order is
    # (branch, channel, slot) -> permute the final_state weight rows to match.
    perm = [bi * C * k + c * k + s
            for bi in range(n_branch) for s in range(k) for c in range(C)]
    w1 = tp["w1"].T[jnp.asarray(perm), :].astype(jnp.bfloat16)                # (F, H)
    w2 = tp["w2"].T.astype(jnp.bfloat16)                                      # (H, n_out)
    return {"embed": tp["embed"], "wconv": wconv, "bconv": bconv,
            "w1": w1, "b1": tp["b1"][None, :].astype(jnp.float32),
            "w2": w2, "b2": tp["b2"][None, :].astype(jnp.float32)}


# ---------------------------------------------------------------------------
# Pure-jnp reference (same bf16 quantization of the MXU operands)
# ---------------------------------------------------------------------------
def reference_forward(tokens, tp, *, kernel_sizes, dilations, max_pooling_k):
    def q(a):
        return a.astype(jnp.bfloat16).astype(jnp.float32)

    B, L = tokens.shape
    k = max_pooling_k
    emb = q(tp["embed"][tokens])                                      # (B, L, E)
    feats = []
    for (K, D), (w, b) in zip(zip(kernel_sizes, dilations), tp["convs"]):
        C = w.shape[0]
        L_out = L - D * (K - 1)
        wq = q(w)
        out = jnp.zeros((B, C, L_out), jnp.float32)
        for j in range(K):
            out = out + jnp.einsum("ble,ce->bcl",
                                   emb[:, j * D:j * D + L_out, :], wq[:, 0, j, :])
        out = jnp.maximum(out + b[None, :, None], 0.0)                # (B, C, L_out)
        # kmax_pooling: topk (ties -> lower index), sort indices, gather
        idx = jnp.sort(jnp.argsort(-out, axis=-1, stable=True)[..., :k], axis=-1)
        feats.append(jnp.take_along_axis(out, idx, axis=-1).reshape(B, -1))
    f = jnp.concatenate(feats, axis=1)
    h = jnp.maximum(q(f) @ q(tp["w1"]).T + tp["b1"], 0.0)
    y = q(h) @ q(tp["w2"]).T + tp["b2"]
    return jnp.clip(y, 0.0, 1.0)


# ---------------------------------------------------------------------------
if __name__ == "__main__":
    # small, module-consistent shapes
    B, L = 2, 16                  # batch, maxlen
    max_features = 50             # vocab size
    embed_size = 32
    out_channel = 8
    kernel_sizes = (2, 3)
    dilations = (1, 2)
    max_pooling_k = 2
    n_final_state = 16
    n_output = 1

    key = jax.random.PRNGKey(0)
    k_tok, k_par = jax.random.split(key)
    tokens = jax.random.randint(k_tok, (B, L), 0, max_features, dtype=jnp.int32)

    tp = init_torch_params(k_par, max_features=max_features, embed_size=embed_size,
                           out_channel=out_channel, kernel_sizes=kernel_sizes,
                           max_pooling_k=max_pooling_k, n_final_state=n_final_state,
                           n_output=n_output)
    kp = pack_params(tp, kernel_sizes=kernel_sizes, max_pooling_k=max_pooling_k)

    y = jax.block_until_ready(
        textcnn_forward(tokens, kp, kernel_sizes=kernel_sizes,
                        dilations=dilations, max_pooling_k=max_pooling_k))
    y_ref = jax.block_until_ready(
        reference_forward(tokens, tp, kernel_sizes=kernel_sizes,
                          dilations=dilations, max_pooling_k=max_pooling_k))

    assert y.shape == (B, n_output)
    assert bool(jnp.all((y >= 0.0) & (y <= 1.0)))
    assert bool(jnp.allclose(y, y_ref, atol=1e-2, rtol=1e-2)), (y, y_ref)
    print("KERNEL_OK")
</pallas_src>

<mosaic_0001>
module attributes {stable_mosaic.version = 11 : i64} {
  func.func @_textcnn_fused_kernel(%arg0: i32, %arg1: memref<128x32xbf16, #tpu.memory_space<vmem>>, %arg2: memref<32x40xbf16, #tpu.memory_space<vmem>>, %arg3: memref<2x8xf32, #tpu.memory_space<vmem>>, %arg4: memref<32x16xbf16, #tpu.memory_space<vmem>>, %arg5: memref<1x16xf32, #tpu.memory_space<vmem>>, %arg6: memref<16x1xbf16, #tpu.memory_space<vmem>>, %arg7: memref<1x1xf32, #tpu.memory_space<vmem>>, %arg8: memref<8x1xf32, #tpu.memory_space<vmem>>) attributes {dimension_semantics = [#tpu.dimension_semantics<parallel>], iteration_bounds = array<i64: 2>, scalar_prefetch = 0 : i64, scratch_operands = 0 : i64, tpu.core_type = #tpu.core_type<tc>, window_params = [{transform_indices = @transform_0, window_bounds = array<i64: 128, 32>}, {pipeline_mode = #tpu.pipeline_mode<synchronous>, transform_indices = @transform_1, window_bounds = array<i64: 32, 40>}, {pipeline_mode = #tpu.pipeline_mode<synchronous>, transform_indices = @transform_2, window_bounds = array<i64: 2, 8>}, {pipeline_mode = #tpu.pipeline_mode<synchronous>, transform_indices = @transform_3, window_bounds = array<i64: 32, 16>}, {pipeline_mode = #tpu.pipeline_mode<synchronous>, transform_indices = @transform_4, window_bounds = array<i64: 1, 16>}, {pipeline_mode = #tpu.pipeline_mode<synchronous>, transform_indices = @transform_5, window_bounds = array<i64: 16, 1>}, {pipeline_mode = #tpu.pipeline_mode<synchronous>, transform_indices = @transform_6, window_bounds = array<i64: 1, 1>}, {transform_indices = @transform_7, window_bounds = array<i64: 8, 1>}]} {
    %c0 = arith.constant 0 : index
    %c0_0 = arith.constant 0 : index
    %0 = vector.load %arg1[%c0, %c0_0] : memref<128x32xbf16, #tpu.memory_space<vmem>>, vector<128x32xbf16>
    %c0_1 = arith.constant 0 : index
    %c0_2 = arith.constant 0 : index
    %1 = vector.load %arg2[%c0_1, %c0_2] : memref<32x40xbf16, #tpu.memory_space<vmem>>, vector<32x40xbf16>
    %cst = arith.constant dense<0.000000e+00> : vector<128x40xf32>
    %2 = tpu.matmul %0, %1, %cst {dimension_numbers = #tpu.dot_dimension_numbers<[1], [0], [0], [1], [0, 0, 1, 1], [], []>} : vector<128x32xbf16>, vector<32x40xbf16>, vector<128x40xf32> -> vector<128x40xf32>
    %c0_3 = arith.constant 0 : index
    %c0_4 = arith.constant 0 : index
    %3 = vector.load %arg3[%c0_3, %c0_4] : memref<2x8xf32, #tpu.memory_space<vmem>>, vector<2x8xf32>
    %4 = tpu.iota {dimensions = array<i32: 0>} : vector<16x8xi32>
    %5 = arith.sitofp %4 : vector<16x8xi32> to vector<16x8xf32>
    %6 = vector.shape_cast %5 : vector<16x8xf32> to vector<1x16x8xf32>
    %7 = vector.shape_cast %6 : vector<1x16x8xf32> to vector<1x16x8xf32>
    %8 = vector.broadcast %7 : vector<1x16x8xf32> to vector<8x16x8xf32>
    %cst_5 = arith.constant 0.000000e+00 : f32
    %9 = vector.broadcast %cst_5 : f32 to vector<128x8xf32>
    %10 = vector.extract_strided_slice %2 {offsets = [0, 0], sizes = [128, 8], strides = [1, 1]} : vector<128x40xf32> to vector<128x8xf32>
    %11 = arith.addf %9, %10 : vector<128x8xf32>
    %12 = vector.extract_strided_slice %2 {offsets = [0, 8], sizes = [128, 8], strides = [1, 1]} : vector<128x40xf32> to vector<128x8xf32>
    %13 = vector.extract_strided_slice %12 {offsets = [1, 0], sizes = [127, 8], strides = [1, 1]} : vector<128x8xf32> to vector<127x8xf32>
    %cst_6 = arith.constant 0.000000e+00 : f32
    %14 = vector.broadcast %cst_6 : f32 to vector<1x8xf32>
    %15 = tpu.concatenate %13, %14 in 0 : vector<127x8xf32>, vector<1x8xf32> -> vector<128x8xf32>
    %16 = arith.addf %11, %15 : vector<128x8xf32>
    %17 = vector.extract_strided_slice %3 {offsets = [0, 0], sizes = [1, 8], strides = [1, 1]} : vector<2x8xf32> to vector<1x8xf32>
    %18 = vector.broadcast %17 : vector<1x8xf32> to vector<128x8xf32>
    %19 = arith.addf %16, %18 : vector<128x8xf32>
    %cst_7 = arith.constant 0.000000e+00 : f32
    %20 = vector.broadcast %cst_7 : f32 to vector<128x8xf32>
    %21 = arith.maximumf %19, %20 : vector<128x8xf32>
    %22 = vector.shape_cast %21 : vector<128x8xf32> to vector<8x16x8xf32>
    %cst_8 = arith.constant 1.500000e+01 : f32
    %23 = vector.broadcast %cst_8 : f32 to vector<8x16x8xf32>
    %24 = arith.cmpf olt, %8, %23 : vector<8x16x8xf32>
    %cst_9 = arith.constant 0xFF800000 : f32
    %25 = vector.broadcast %cst_9 : f32 to vector<8x16x8xf32>
    %26 = arith.select %24, %22, %25 : vector<8x16x8xi1>, vector<8x16x8xf32>
    %cst_10 = arith.constant dense<0xFF800000> : vector<8x8xf32>
    %27 = vector.multi_reduction <maximumf>, %26, %cst_10 [1] : vector<8x16x8xf32> to vector<8x8xf32>
    %28 = vector.shape_cast %27 : vector<8x8xf32> to vector<8x1x8xf32>
    %29 = vector.broadcast %28 : vector<8x1x8xf32> to vector<8x16x8xf32>
    %30 = arith.cmpf oeq, %26, %29 : vector<8x16x8xf32>
    %cst_11 = arith.constant 1.600000e+01 : f32
    %31 = vector.broadcast %cst_11 : f32 to vector<8x16x8xf32>
    %32 = arith.select %30, %8, %31 : vector<8x16x8xi1>, vector<8x16x8xf32>
    %cst_12 = arith.constant dense<0x7F800000> : vector<8x8xf32>
    %33 = vector.multi_reduction <minimumf>, %32, %cst_12 [1] : vector<8x16x8xf32> to vector<8x8xf32>
    %34 = vector.shape_cast %33 : vector<8x8xf32> to vector<8x1x8xf32>
    %35 = vector.broadcast %34 : vector<8x1x8xf32> to vector<8x16x8xf32>
    %36 = arith.cmpf oeq, %8, %35 : vector<8x16x8xf32>
    %cst_13 = arith.constant 0xFF800000 : f32
    %37 = vector.broadcast %cst_13 : f32 to vector<8x16x8xf32>
    %38 = arith.select %36, %37, %26 : vector<8x16x8xi1>, vector<8x16x8xf32>
    %cst_14 = arith.constant dense<0xFF800000> : vector<8x8xf32>
    %39 = vector.multi_reduction <maximumf>, %38, %cst_14 [1] : vector<8x16x8xf32> to vector<8x8xf32>
    %40 = vector.shape_cast %39 : vector<8x8xf32> to vector<8x1x8xf32>
    %41 = vector.broadcast %40 : vector<8x1x8xf32> to vector<8x16x8xf32>
    %42 = arith.cmpf oeq, %38, %41 : vector<8x16x8xf32>
    %cst_15 = arith.constant 1.600000e+01 : f32
    %43 = vector.broadcast %cst_15 : f32 to vector<8x16x8xf32>
    %44 = arith.select %42, %8, %43 : vector<8x16x8xi1>, vector<8x16x8xf32>
    %cst_16 = arith.constant dense<0x7F800000> : vector<8x8xf32>
    %45 = vector.multi_reduction <minimumf>, %44, %cst_16 [1] : vector<8x16x8xf32> to vector<8x8xf32>
    %46 = vector.shape_cast %45 : vector<8x8xf32> to vector<8x1x8xf32>
    %47 = vector.broadcast %46 : vector<8x1x8xf32> to vector<8x16x8xf32>
    %48 = arith.cmpf oeq, %8, %47 : vector<8x16x8xf32>
    %cst_17 = arith.constant 0xFF800000 : f32
    %49 = vector.broadcast %cst_17 : f32 to vector<8x16x8xf32>
    %50 = arith.select %48, %49, %38 : vector<8x16x8xi1>, vector<8x16x8xf32>
    %cst_18 = arith.constant 0xFF800000 : f32
    %51 = vector.broadcast %cst_18 : f32 to vector<8x16x8xf32>
    %52 = arith.cmpf oeq, %50, %51 : vector<8x16x8xf32>
    %cst_19 = arith.constant 0xFF800000 : f32
    %53 = vector.broadcast %cst_19 : f32 to vector<8x16x8xf32>
    %54 = arith.cmpf ogt, %26, %53 : vector<8x16x8xf32>
    %55 = arith.andi %52, %54 : vector<8x16x8xi1>
    %cst_20 = arith.constant 1.600000e+01 : f32
    %56 = vector.broadcast %cst_20 : f32 to vector<8x16x8xf32>
    %57 = arith.select %55, %8, %56 : vector<8x16x8xi1>, vector<8x16x8xf32>
    %cst_21 = arith.constant dense<0x7F800000> : vector<8x8xf32>
    %58 = vector.multi_reduction <minimumf>, %57, %cst_21 [1] : vector<8x16x8xf32> to vector<8x8xf32>
    %59 = vector.shape_cast %58 : vector<8x8xf32> to vector<8x1x8xf32>
    %60 = vector.broadcast %59 : vector<8x1x8xf32> to vector<8x16x8xf32>
    %61 = arith.cmpf oeq, %8, %60 : vector<8x16x8xf32>
    %cst_22 = arith.constant 0.000000e+00 : f32
    %62 = vector.broadcast %cst_22 : f32 to vector<8x16x8xf32>
    %63 = arith.select %61, %22, %62 : vector<8x16x8xi1>, vector<8x16x8xf32>
    %cst_23 = arith.constant dense<0.000000e+00> : vector<8x8xf32>
    %64 = vector.multi_reduction <add>, %63, %cst_23 [1] : vector<8x16x8xf32> to vector<8x8xf32>
    %cst_24 = arith.constant dense<true> : vector<8x16x8xi1>
    %65 = arith.xori %61, %cst_24 : vector<8x16x8xi1>
    %66 = arith.andi %55, %65 : vector<8x16x8xi1>
    %cst_25 = arith.constant 1.600000e+01 : f32
    %67 = vector.broadcast %cst_25 : f32 to vector<8x16x8xf32>
    %68 = arith.select %66, %8, %67 : vector<8x16x8xi1>, vector<8x16x8xf32>
    %cst_26 = arith.constant dense<0x7F800000> : vector<8x8xf32>
    %69 = vector.multi_reduction <minimumf>, %68, %cst_26 [1] : vector<8x16x8xf32> to vector<8x8xf32>
    %70 = vector.shape_cast %69 : vector<8x8xf32> to vector<8x1x8xf32>
    %71 = vector.broadcast %70 : vector<8x1x8xf32> to vector<8x16x8xf32>
    %72 = arith.cmpf oeq, %8, %71 : vector<8x16x8xf32>
    %cst_27 = arith.constant 0.000000e+00 : f32
    %73 = vector.broadcast %cst_27 : f32 to vector<8x16x8xf32>
    %74 = arith.select %72, %22, %73 : vector<8x16x8xi1>, vector<8x16x8xf32>
    %cst_28 = arith.constant dense<0.000000e+00> : vector<8x8xf32>
    %75 = vector.multi_reduction <add>, %74, %cst_28 [1] : vector<8x16x8xf32> to vector<8x8xf32>
    %cst_29 = arith.constant 0.000000e+00 : f32
    %76 = vector.broadcast %cst_29 : f32 to vector<128x8xf32>
    %77 = vector.extract_strided_slice %2 {offsets = [0, 16], sizes = [128, 8], strides = [1, 1]} : vector<128x40xf32> to vector<128x8xf32>
    %78 = arith.addf %76, %77 : vector<128x8xf32>
    %79 = vector.extract_strided_slice %2 {offsets = [0, 24], sizes = [128, 8], strides = [1, 1]} : vector<128x40xf32> to vector<128x8xf32>
    %80 = vector.extract_strided_slice %79 {offsets = [2, 0], sizes = [126, 8], strides = [1, 1]} : vector<128x8xf32> to vector<126x8xf32>
    %cst_30 = arith.constant 0.000000e+00 : f32
    %81 = vector.broadcast %cst_30 : f32 to vector<2x8xf32>
    %82 = tpu.concatenate %80, %81 in 0 : vector<126x8xf32>, vector<2x8xf32> -> vector<128x8xf32>
    %83 = arith.addf %78, %82 : vector<128x8xf32>
    %84 = vector.extract_strided_slice %2 {offsets = [0, 32], sizes = [128, 8], strides = [1, 1]} : vector<128x40xf32> to vector<128x8xf32>
    %85 = vector.extract_strided_slice %84 {offsets = [4, 0], sizes = [124, 8], strides = [1, 1]} : vector<128x8xf32> to vector<124x8xf32>
    %cst_31 = arith.constant 0.000000e+00 : f32
    %86 = vector.broadcast %cst_31 : f32 to vector<4x8xf32>
    %87 = tpu.concatenate %85, %86 in 0 : vector<124x8xf32>, vector<4x8xf32> -> vector<128x8xf32>
    %88 = arith.addf %83, %87 : vector<128x8xf32>
    %89 = vector.extract_strided_slice %3 {offsets = [1, 0], sizes = [1, 8], strides = [1, 1]} : vector<2x8xf32> to vector<1x8xf32>
    %90 = vector.broadcast %89 : vector<1x8xf32> to vector<128x8xf32>
    %91 = arith.addf %88, %90 : vector<128x8xf32>
    %cst_32 = arith.constant 0.000000e+00 : f32
    %92 = vector.broadcast %cst_32 : f32 to vector<128x8xf32>
    %93 = arith.maximumf %91, %92 : vector<128x8xf32>
    %94 = vector.shape_cast %93 : vector<128x8xf32> to vector<8x16x8xf32>
    %cst_33 = arith.constant 1.200000e+01 : f32
    %95 = vector.broadcast %cst_33 : f32 to vector<8x16x8xf32>
    %96 = arith.cmpf olt, %8, %95 : vector<8x16x8xf32>
    %cst_34 = arith.constant 0xFF800000 : f32
    %97 = vector.broadcast %cst_34 : f32 to vector<8x16x8xf32>
    %98 = arith.select %96, %94, %97 : vector<8x16x8xi1>, vector<8x16x8xf32>
    %cst_35 = arith.constant dense<0xFF800000> : vector<8x8xf32>
    %99 = vector.multi_reduction <maximumf>, %98, %cst_35 [1] : vector<8x16x8xf32> to vector<8x8xf32>
    %100 = vector.shape_cast %99 : vector<8x8xf32> to vector<8x1x8xf32>
    %101 = vector.broadcast %100 : vector<8x1x8xf32> to vector<8x16x8xf32>
    %102 = arith.cmpf oeq, %98, %101 : vector<8x16x8xf32>
    %cst_36 = arith.constant 1.600000e+01 : f32
    %103 = vector.broadcast %cst_36 : f32 to vector<8x16x8xf32>
    %104 = arith.select %102, %8, %103 : vector<8x16x8xi1>, vector<8x16x8xf32>
    %cst_37 = arith.constant dense<0x7F800000> : vector<8x8xf32>
    %105 = vector.multi_reduction <minimumf>, %104, %cst_37 [1] : vector<8x16x8xf32> to vector<8x8xf32>
    %106 = vector.shape_cast %105 : vector<8x8xf32> to vector<8x1x8xf32>
    %107 = vector.broadcast %106 : vector<8x1x8xf32> to vector<8x16x8xf32>
    %108 = arith.cmpf oeq, %8, %107 : vector<8x16x8xf32>
    %cst_38 = arith.constant 0xFF800000 : f32
    %109 = vector.broadcast %cst_38 : f32 to vector<8x16x8xf32>
    %110 = arith.select %108, %109, %98 : vector<8x16x8xi1>, vector<8x16x8xf32>
    %cst_39 = arith.constant dense<0xFF800000> : vector<8x8xf32>
    %111 = vector.multi_reduction <maximumf>, %110, %cst_39 [1] : vector<8x16x8xf32> to vector<8x8xf32>
    %112 = vector.shape_cast %111 : vector<8x8xf32> to vector<8x1x8xf32>
    %113 = vector.broadcast %112 : vector<8x1x8xf32> to vector<8x16x8xf32>
    %114 = arith.cmpf oeq, %110, %113 : vector<8x16x8xf32>
    %cst_40 = arith.constant 1.600000e+01 : f32
    %115 = vector.broadcast %cst_40 : f32 to vector<8x16x8xf32>
    %116 = arith.select %114, %8, %115 : vector<8x16x8xi1>, vector<8x16x8xf32>
    %cst_41 = arith.constant dense<0x7F800000> : vector<8x8xf32>
    %117 = vector.multi_reduction <minimumf>, %116, %cst_41 [1] : vector<8x16x8xf32> to vector<8x8xf32>
    %118 = vector.shape_cast %117 : vector<8x8xf32> to vector<8x1x8xf32>
    %119 = vector.broadcast %118 : vector<8x1x8xf32> to vector<8x16x8xf32>
    %120 = arith.cmpf oeq, %8, %119 : vector<8x16x8xf32>
    %cst_42 = arith.constant 0xFF800000 : f32
    %121 = vector.broadcast %cst_42 : f32 to vector<8x16x8xf32>
    %122 = arith.select %120, %121, %110 : vector<8x16x8xi1>, vector<8x16x8xf32>
    %cst_43 = arith.constant 0xFF800000 : f32
    %123 = vector.broadcast %cst_43 : f32 to vector<8x16x8xf32>
    %124 = arith.cmpf oeq, %122, %123 : vector<8x16x8xf32>
    %cst_44 = arith.constant 0xFF800000 : f32
    %125 = vector.broadcast %cst_44 : f32 to vector<8x16x8xf32>
    %126 = arith.cmpf ogt, %98, %125 : vector<8x16x8xf32>
    %127 = arith.andi %124, %126 : vector<8x16x8xi1>
    %cst_45 = arith.constant 1.600000e+01 : f32
    %128 = vector.broadcast %cst_45 : f32 to vector<8x16x8xf32>
    %129 = arith.select %127, %8, %128 : vector<8x16x8xi1>, vector<8x16x8xf32>
    %cst_46 = arith.constant dense<0x7F800000> : vector<8x8xf32>
    %130 = vector.multi_reduction <minimumf>, %129, %cst_46 [1] : vector<8x16x8xf32> to vector<8x8xf32>
    %131 = vector.shape_cast %130 : vector<8x8xf32> to vector<8x1x8xf32>
    %132 = vector.broadcast %131 : vector<8x1x8xf32> to vector<8x16x8xf32>
    %133 = arith.cmpf oeq, %8, %132 : vector<8x16x8xf32>
    %cst_47 = arith.constant 0.000000e+00 : f32
    %134 = vector.broadcast %cst_47 : f32 to vector<8x16x8xf32>
    %135 = arith.select %133, %94, %134 : vector<8x16x8xi1>, vector<8x16x8xf32>
    %cst_48 = arith.constant dense<0.000000e+00> : vector<8x8xf32>
    %136 = vector.multi_reduction <add>, %135, %cst_48 [1] : vector<8x16x8xf32> to vector<8x8xf32>
    %cst_49 = arith.constant dense<true> : vector<8x16x8xi1>
    %137 = arith.xori %133, %cst_49 : vector<8x16x8xi1>
    %138 = arith.andi %127, %137 : vector<8x16x8xi1>
    %cst_50 = arith.constant 1.600000e+01 : f32
    %139 = vector.broadcast %cst_50 : f32 to vector<8x16x8xf32>
    %140 = arith.select %138, %8, %139 : vector<8x16x8xi1>, vector<8x16x8xf32>
    %cst_51 = arith.constant dense<0x7F800000> : vector<8x8xf32>
    %141 = vector.multi_reduction <minimumf>, %140, %cst_51 [1] : vector<8x16x8xf32> to vector<8x8xf32>
    %142 = vector.shape_cast %141 : vector<8x8xf32> to vector<8x1x8xf32>
    %143 = vector.broadcast %142 : vector<8x1x8xf32> to vector<8x16x8xf32>
    %144 = arith.cmpf oeq, %8, %143 : vector<8x16x8xf32>
    %cst_52 = arith.constant 0.000000e+00 : f32
    %145 = vector.broadcast %cst_52 : f32 to vector<8x16x8xf32>
    %146 = arith.select %144, %94, %145 : vector<8x16x8xi1>, vector<8x16x8xf32>
    %cst_53 = arith.constant dense<0.000000e+00> : vector<8x8xf32>
    %147 = vector.multi_reduction <add>, %146, %cst_53 [1] : vector<8x16x8xf32> to vector<8x8xf32>
    %148 = tpu.concatenate %64, %75, %136, %147 in 1 : vector<8x8xf32>, vector<8x8xf32>, vector<8x8xf32>, vector<8x8xf32> -> vector<8x32xf32>
    %149 = arith.truncf %148 : vector<8x32xf32> to vector<8x32xbf16>
    %c0_54 = arith.constant 0 : index
    %c0_55 = arith.constant 0 : index
    %150 = vector.load %arg4[%c0_54, %c0_55] : memref<32x16xbf16, #tpu.memory_space<vmem>>, vector<32x16xbf16>
    %cst_56 = arith.constant dense<0.000000e+00> : vector<8x16xf32>
    %151 = tpu.matmul %149, %150, %cst_56 {dimension_numbers = #tpu.dot_dimension_numbers<[1], [0], [0], [1], [0, 0, 1, 1], [], []>} : vector<8x32xbf16>, vector<32x16xbf16>, vector<8x16xf32> -> vector<8x16xf32>
    %c0_57 = arith.constant 0 : index
    %c0_58 = arith.constant 0 : index
    %152 = vector.load %arg5[%c0_57, %c0_58] : memref<1x16xf32, #tpu.memory_space<vmem>>, vector<1x16xf32>
    %153 = vector.broadcast %152 : vector<1x16xf32> to vector<8x16xf32>
    %154 = arith.addf %151, %153 : vector<8x16xf32>
    %cst_59 = arith.constant 0.000000e+00 : f32
    %155 = vector.broadcast %cst_59 : f32 to vector<8x16xf32>
    %156 = arith.maximumf %154, %155 : vector<8x16xf32>
    %157 = arith.truncf %156 : vector<8x16xf32> to vector<8x16xbf16>
    %c0_60 = arith.constant 0 : index
    %c0_61 = arith.constant 0 : index
    %158 = vector.load %arg6[%c0_60, %c0_61] : memref<16x1xbf16, #tpu.memory_space<vmem>>, vector<16x1xbf16>
    %cst_62 = arith.constant dense<0.000000e+00> : vector<8x1xf32>
    %159 = tpu.matmul %157, %158, %cst_62 {dimension_numbers = #tpu.dot_dimension_numbers<[1], [0], [0], [1], [0, 0, 1, 1], [], []>} : vector<8x16xbf16>, vector<16x1xbf16>, vector<8x1xf32> -> vector<8x1xf32>
    %c0_63 = arith.constant 0 : index
    %c0_64 = arith.constant 0 : index
    %160 = vector.load %arg7[%c0_63, %c0_64] : memref<1x1xf32, #tpu.memory_space<vmem>>, vector<1x1xf32>
    %161 = vector.broadcast %160 : vector<1x1xf32> to vector<8x1xf32>
    %162 = arith.addf %159, %161 : vector<8x1xf32>
    %cst_65 = arith.constant 0.000000e+00 : f32
    %cst_66 = arith.constant 1.000000e+00 : f32
    %163 = vector.broadcast %cst_65 : f32 to vector<8x1xf32>
    %164 = arith.maximumf %163, %162 : vector<8x1xf32>
    %165 = vector.broadcast %cst_66 : f32 to vector<8x1xf32>
    %166 = arith.minimumf %165, %164 : vector<8x1xf32>
    %c0_67 = arith.constant 0 : index
    %c0_68 = arith.constant 0 : index
    %167 = vector.load %arg8[%c0_67, %c0_68] : memref<8x1xf32, #tpu.memory_space<vmem>>, vector<8x1xf32>
    tpu.vector_store %arg8[%c0_67, %c0_68], %166 {strides = array<i32>} : memref<8x1xf32, #tpu.memory_space<vmem>>, vector<8x1xf32>,
    return
  }
  func.func @transform_0(%arg0: i32) -> (i32, i32) {
    %c0_i32 = arith.constant 0 : i32
    %c0_i32_0 = arith.constant 0 : i32
    return %arg0, %c0_i32 : i32, i32
  }
  func.func @transform_1(%arg0: i32) -> (i32, i32) {
    %c0_i32 = arith.constant 0 : i32
    %c0_i32_0 = arith.constant 0 : i32
    %c0_i32_1 = arith.constant 0 : i32
    return %c0_i32, %c0_i32_0 : i32, i32
  }
  func.func @transform_2(%arg0: i32) -> (i32, i32) {
    %c0_i32 = arith.constant 0 : i32
    %c0_i32_0 = arith.constant 0 : i32
    %c0_i32_1 = arith.constant 0 : i32
    return %c0_i32, %c0_i32_0 : i32, i32
  }
  func.func @transform_3(%arg0: i32) -> (i32, i32) {
    %c0_i32 = arith.constant 0 : i32
    %c0_i32_0 = arith.constant 0 : i32
    %c0_i32_1 = arith.constant 0 : i32
    return %c0_i32, %c0_i32_0 : i32, i32
  }
  func.func @transform_4(%arg0: i32) -> (i32, i32) {
    %c0_i32 = arith.constant 0 : i32
    %c0_i32_0 = arith.constant 0 : i32
    %c0_i32_1 = arith.constant 0 : i32
    return %c0_i32, %c0_i32_0 : i32, i32
  }
  func.func @transform_5(%arg0: i32) -> (i32, i32) {
    %c0_i32 = arith.constant 0 : i32
    %c0_i32_0 = arith.constant 0 : i32
    %c0_i32_1 = arith.constant 0 : i32
    return %c0_i32, %c0_i32_0 : i32, i32
  }
  func.func @transform_6(%arg0: i32) -> (i32, i32) {
    %c0_i32 = arith.constant 0 : i32
    %c0_i32_0 = arith.constant 0 : i32
    %c0_i32_1 = arith.constant 0 : i32
    return %c0_i32, %c0_i32_0 : i32, i32
  }
  func.func @transform_7(%arg0: i32) -> (i32, i32) {
    %c0_i32 = arith.constant 0 : i32
    %c0_i32_0 = arith.constant 0 : i32
    return %arg0, %c0_i32 : i32, i32
  }
}

</mosaic_0001>

<bundles_post_ra>
// kernel: tpu_custom_call.1
= control target key start
LH: loop header
LB: loop body
LE: loop exit
PB: predicated region body
PF: predicated region fallthrough
CT: control target
= control target key end

     0   :  { %s3123_s26 = smov 0   ;;  %s5473_s0 = inlined_call_operand.vmem [shape: bf16[256,32], index: 0, kind: input, shape index: {}]   ;;  %s5474_s1 = inlined_call_operand.vmem [shape: bf16[32,40], index: 1, kind: input, shape index: {}]   ;;  %s5475_s2 = inlined_call_operand.vmem [shape: f32[2,8], index: 2, kind: input, shape index: {}]   ;;  %s5476_s3 = inlined_call_operand.vmem [shape: bf16[32,16], index: 3, kind: input, shape index: {}]   ;;  %s5477_s4 = inlined_call_operand.vmem [shape: f32[1,16], index: 4, kind: input, shape index: {}]   ;;  %s5478_s5 = inlined_call_operand.vmem [shape: bf16[16,1], index: 5, kind: input, shape index: {}]   ;;  %s5479_s6 = inlined_call_operand.<no memory space> [shape: f32[1,1], index: 6, kind: input, shape index: {}]   ;;  %s5480_s7 = inlined_call_operand.vmem [shape: f32[16,1], index: 7, kind: output, shape index: {}]  }
   0x1   :  { %v12_v0 = vstv %s5479_s6 }
   0x2   :  { %13 = vst [vmem:[#allocation2] sm:$0x1] %v12_v0 }
   0x3 LB: > { %s3129_s27 = sadd.s32 4294967295, %s3071_s26   ;;  %p2953_p0 = scmp.ge.s32.totalorder %s3071_s26, 1  ;;  %s3071_s26 = sphi %s3123_s26, %s19_s26  }
   0x4   : > { %p240_p1 = scmp.lt.s32.totalorder %s3071_s26, 3 }
   0x6   : > { %p241_p2 = pnand %p2953_p0, %p240_p1 }
   0x8   : > { %244 = sbr.rel (%p241_p2) target bundleno = 1437 (0x59d), region = 48 }
   0xf   : > { %v3052_v1 = vld [vmem:[%s5474_s1] sm:$0xff]   ;;  %s2954_s6 = sshll.u32 %s3129_s27, 4  ;;  %v3053_v2 = vld [vmem:[%s5474_s1 + $0x8] sm:$0xff]   ;;  %vm5493_vm0 = vcmask 261120   ;;  %v477_v11 = vlaneseq  ;;  %s3073_s15 = smov 16   ;;  %vm1548_vm1 = vcmask 1045504  }
  0x10   : > { %p272_p3 = scmp.lt.s32.totalorder %s2954_s6, 31  ;;  %2999 = vmatprep.subr.bf16.mxu0 %v3052_v1  ;;  %3033 = vmatprep.subr.bf16.mxu1 %v3052_v1  ;;  %v476_v14 = vld [vmem:[%s5475_s2] sm:$0x3]  ;;  %vm514_vm2 = vcmask 1046528   ;;  %vm1647_vm3 = vcmask 1043456   ;;  %s3074_s16 = smov 120  }
  0x11   : > { %3000 = vmatpush3.bf16.msra.mxu0 %v3052_v1  ;;  %3035 = vmatpush3.bf16.msra.mxu1 %v3052_v1  ;;  %v3151_v12 = vshrl.u32 %v477_v11, 7  ;;  %s3075_s17 = smov 112   ;;  %vm5526_vm6 = vcmask 64512   ;;  %vm5498_vm11 = vcmask 195712   ;;  %s3078_s22 = smov 8  }
  0x12   : > { %s5898_s6 = smov (!%p272_p3, %s2954_s6), 31  ;;  %3001 = vmatprep.subr.bf16.mxu0 %v3053_v2  ;;  %3034 = vmatprep.subr.bf16.mxu1 %v3053_v2  ;;  %p277_p4 = scmp.lt.s32.totalorder %s3129_s27, 1 }
  0x13   : > { %s2955_s9 = sshll.u32 %s5898_s6, 2  ;;  %v1748_v13 = vsub.s32 1, %v3151_v12  ;;  %v615_v16 = vsub.s32 0, %v3151_v12 }
  0x14   : > { %s275_s12 = scalar_lea.vmem %s5473_s0, %s2955_s9  ;;  %s5900_s27 = smov (!%p277_p4, %s3129_s27), 1 }
  0x15   : > { %3002 = vmatpush3.bf16.msra.mxu0 %v3053_v2  ;;  %3036 = vmatpush3.bf16.msra.mxu1 %v3053_v2  ;;  %v3054_v3 = vld [vmem:[%s275_s12] sm:$0xff]   ;;  %v3055_v4 = vld [vmem:[%s275_s12 + $0x8] sm:$0xff]   ;;  %v3056_v5 = vld [vmem:[%s275_s12 + $0x30] sm:$0xff]   ;;  %v1749_v15 = vrot.slane %v476_v14, %v1748_v13  ;;  %v3158_v17 = vrot.slane %v476_v14, %v615_v16  ;;  %s2956_s29 = sshll.u32 %s5900_s27, 3 }
  0x16   : > { %3003 = vmatprep.mubr.msk.bf16.mxu0 %vm5493_vm0, %v3054_v3  ;;  %v3057_v6 = vld [vmem:[%s275_s12 + $0x38] sm:$0xff]   ;;  %3015 = vmatprep.mubr.msk.bf16.mxu1 %vm5493_vm0, %v3056_v5  ;;  %v3058_v7 = vld [vmem:[%s275_s12 + $0x10] sm:$0xff]   ;;  %v3060_v9 = vld [vmem:[%s275_s12 + $0x20] sm:$0xff]   ;;  %s280_s8 = scalar_lea.vmem %s5480_s7, %s2956_s29 }
  0x17   : > { %v3059_v8 = vld [vmem:[%s275_s12 + $0x18] sm:$0xff]   ;;  %v3061_v10 = vld [vmem:[%s275_s12 + $0x28] sm:$0xff]   ;;  %1751 = vrot.lane.b32.xlu0 %v1749_v15, %s3073_s15 }
  0x18   : > { %3004 = vmatmul.mubr.msk.bf16.vlgmr.msra.gmra.mrb[0].mxu0 %vm5493_vm0, %v3055_v4  ;;  %3016 = vmatmul.mubr.msk.bf16.vlgmr.msra.gmra.mrb[0].mxu1 %vm5493_vm0, %v3057_v6 }
  0x19   : > { %3007 = vmatprep.mubr.msk.bf16.mxu0 %vm5493_vm0, %v3058_v7 }
  0x20   : > { %3008 = vmatmul.mubr.msk.bf16.gmra.mrb[4].mxu0 %vm5493_vm0, %v3059_v8 }
  0x21   : > { %3011 = vmatprep.mubr.msk.bf16.mxu0 %vm5493_vm0, %v3060_v9 }
  0x28   : > { %3012 = vmatmul.mubr.msk.bf16.gmra.mrb[8].mxu0 %vm5493_vm0, %v3061_v10 }
  0xeb   : > { %v3160_v18 = vpop.f32.mrb[0].mxu0  ;;  %v3166_v22 = vpop.f32.mrb[0].mxu1 }
  0xec   : > { %v3162_v19 = vpop.f32.mrb[1].mxu0  ;;  %v1552_v20 = vrot.slane %v3160_v18, 2  ;;  %v518_v21 = vrot.slane %v3160_v18, 1  ;;  %v1651_v24 = vrot.slane %v3160_v18, 4  ;;  %v3174_v28 = vpop.f32.mrb[1].mxu1  ;;  %v542_v33 = vrot.slane %v3166_v22, 1 }
  0xed   : > { %v3168_v23 = vpop.f32.mrb[2].mxu0  ;;  %v515_v25 = vrot.slane %v3162_v19, 1  ;;  %v1549_v26 = vrot.slane %v3162_v19, 2  ;;  %v1648_v27 = vrot.slane %v3162_v19, 4  ;;  %v3182_v34 = vpop.f32.mrb[2].mxu1  ;;  %v1576_v35 = vrot.slane %v3166_v22, 2 }
  0xee   : > { %v3176_v29 = vpop.f32.mrb[3].mxu0  ;;  %v1554_v30 = vrot.slane %v3168_v23, 2  ;;  %v520_v31 = vrot.slane %v3168_v23, 1  ;;  %v1653_v32 = vrot.slane %v3168_v23, 4  ;;  %v3188_v39 = vpop.f32.mrb[3].mxu1  ;;  %v544_v43 = vrot.slane %v3182_v34, 1 }
  0xef   : > { %v1550_v36 = vrot.slane %v3176_v29, 2  ;;  %v1649_v37 = vrot.slane %v3176_v29, 4  ;;  %v516_v38 = vrot.slane %v3176_v29, 1  ;;  %v1578_v44 = vrot.slane %v3182_v34, 2 }
  0xf0   : > { %v1555_v40 = vsel %vm1548_vm1, %v1552_v20, %v1554_v30  ;;  %v521_v41 = vsel %vm514_vm2, %v518_v21, %v520_v31  ;;  %v1654_v42 = vsel %vm1647_vm3, %v1651_v24, %v1653_v32  ;;  %v545_v48 = vsel %vm514_vm2, %v542_v33, %v544_v43 }
  0xf1   : > { %1587 = vrot.lane.b32.xlu0 %v1555_v40, %s3074_s16  ;;  %553 = vrot.lane.b32.xlu1 %v521_v41, %s3074_s16  ;;  %v1553_v45 = vsel %vm1548_vm1, %v1550_v36, %v1552_v20  ;;  %v3199_v46 = vsel %vm1647_vm3, %v1649_v37, %v1651_v24  ;;  %v3202_v47 = vsel %vm514_vm2, %v515_v25, %v516_v38  ;;  %v547_v49 = vsel %vm514_vm2, %v544_v43, 0.0 }
  0xf2   : > { %v538_v50 = vrot.slane %v3174_v28, 1  ;;  %v540_v51 = vrot.slane %v3188_v39, 1  ;;  %v1579_v53 = vsel %vm1548_vm1, %v1576_v35, %v1578_v44  ;;  %v1581_v54 = vsel %vm1548_vm1, %v1578_v44, 0.0 }
  0xf3   : > { %v3208_v52 = vpop.f32.mrb[4].mxu0  ;;  %v3213_v55 = vsel %vm514_vm2, %v516_v38, %v518_v21  ;;  %v1572_v56 = vrot.slane %v3174_v28, 2  ;;  %v1574_v59 = vrot.slane %v3188_v39, 2  ;;  %v3225_v60 = vsel %vm1548_vm1, %v1549_v26, %v1550_v36 }
  0xf4   : > { %v3216_v57 = vpop.f32.mrb[5].mxu0  ;;  %v3221_v58 = vsel %vm514_vm2, %v538_v50, %v540_v51  ;;  %v5482_v61 = vrot.slane %v3174_v28, 4  ;;  %v1673_v63 = vrot.slane %v3188_v39, 4  ;;  %v3234_v0 = vsel %vm1647_vm3, %v1648_v27, %v1649_v37 }
  0xf5   : > { %1686 = vrot.lane.b32.xlu0 %v1654_v42, %s3075_s17  ;;  %577 = vrot.lane.b32.xlu1 %v545_v48, %s3074_s16  ;;  %v3230_v62 = vpop.f32.mrb[6].mxu0  ;;  %v3237_v1 = vsel %vm514_vm2, %v540_v51, %v542_v33  ;;  %v522_v2 = vrot.slane %v3216_v57, 1  ;;  %v3245_v4 = vsel %vm1548_vm1, %v1572_v56, %v1574_v59  ;;  %v3248_v5 = vsel %vm1548_vm1, %v1574_v59, %v1576_v35 }
  0xf6   : > { %v3240_v3 = vpop.f32.mrb[7].mxu0  ;;  %v1556_v6 = vrot.slane %v3216_v57, 2  ;;  %v5481_v7 = vrot.slane %v3166_v22, 4  ;;  %v3255_v8 = vsel %vm1647_vm3, %v5482_v61, %v1673_v63  ;;  %v1655_v10 = vrot.slane %v3216_v57, 4 }
  0xf7   : > { %v3258_v9 = vsel %vm514_vm2, %v520_v31, %v522_v2  ;;  %v526_v11 = vrot.slane %v3208_v52, 1  ;;  %v528_v15 = vrot.slane %v3230_v62, 1  ;;  %v524_v16 = vrot.slane %v3240_v3, 1 }
  0xf8   : > { %v3263_v13 = vsel %vm1548_vm1, %v1554_v30, %v1556_v6  ;;  %v3268_v14 = vsel %vm1647_vm3, %v1673_v63, %v5481_v7  ;;  %v3275_v20 = vsel %vm1647_vm3, %v1653_v32, %v1655_v10  ;;  %v1560_v21 = vrot.slane %v3208_v52, 2 }
  0xf9   : > { %579 = vrot.lane.b32.xlu0 %v547_v49, %s3074_s16  ;;  %1611 = vrot.lane.b32.xlu1 %v1579_v53, %s3074_s16  ;;  %v1562_v24 = vrot.slane %v3230_v62, 2  ;;  %v1558_v25 = vrot.slane %v3240_v3, 2  ;;  %v529_v26 = vsel %vm514_vm2, %v526_v11, %v528_v15  ;;  %v527_v27 = vsel %vm514_vm2, %v524_v16, %v526_v11 }
  0xfa   : > { %v1659_v30 = vrot.slane %v3208_v52, 4  ;;  %v1661_v31 = vrot.slane %v3230_v62, 4  ;;  %v1657_v36 = vrot.slane %v3240_v3, 4  ;;  %v525_v37 = vsel %vm514_vm2, %v522_v2, %v524_v16 }
  0xfb   : > { %v3284_v33 = vpop.f32.mrb[8].mxu0  ;;  %v1563_v35 = vsel %vm1548_vm1, %v1560_v21, %v1562_v24  ;;  %v1561_v32 = vsel %vm1548_vm1, %v1558_v25, %v1560_v21  ;;  %v1559_v41 = vsel %vm1548_vm1, %v1556_v6, %v1558_v25 }
  0xfc   : > { %5545 = vst [vmem:[#allocation3_spill] sm:$0xff] %v3284_v33  ;;  %v3290_v38 = vpop.f32.mrb[9].mxu0  ;;  %v1662_v40 = vsel %vm1647_vm3, %v1659_v30, %v1661_v31  ;;  %v534_v42 = vrot.slane %v3284_v33, 1  ;;  %v1568_v43 = vrot.slane %v3284_v33, 2  ;;  %v1660_v48 = vsel %vm1647_vm3, %v1657_v36, %v1659_v30 }
  0xfd   : > { %5546 = vst [vmem:[#allocation4_spill] sm:$0xff] %v3290_v38  ;;  %1613 = vrot.lane.b32.xlu0 %v1581_v54, %s3074_s16  ;;  %1585 = vrot.lane.b32.xlu1 %v1553_v45, %s3074_s16  ;;  %v3298_v44 = vpop.f32.mrb[10].mxu0  ;;  %v530_v49 = vrot.slane %v3290_v38, 1  ;;  %v1564_v51 = vrot.slane %v3290_v38, 2  ;;  %v1658_v53 = vsel %vm1647_vm3, %v1655_v10, %v1657_v36  ;;  %v1663_v63 = vrot.slane %v3290_v38, 4 }
  0xfe   : > { %5547 = vst [vmem:[#allocation5_spill] sm:$0xff] %v3298_v44  ;;  %v3304_v59 = vpop.f32.mrb[11].mxu0  ;;  %v536_v2 = vrot.slane %v3298_v44, 1  ;;  %v1570_v54 = vrot.slane %v3298_v44, 2  ;;  %v1667_v45 = vrot.slane %v3284_v33, 4  ;;  %v5549_v38 = vrot.slane %v3174_v28, 4 }
  0xff   : > { %5548 = vst [vmem:[#allocation6_spill] sm:$0xff] %v3304_v59  ;;  %v532_v6 = vrot.slane %v3304_v59, 1  ;;  %v1566_v11 = vrot.slane %v3304_v59, 2  ;;  %v1665_v16 = vrot.slane %v3304_v59, 4  ;;  %v531_v21 = vsel %vm514_vm2, %v528_v15, %v530_v49 }
 0x100   : > { %v1565_v10 = vsel %vm1548_vm1, %v1562_v24, %v1564_v51  ;;  %v1664_v25 = vsel %vm1647_vm3, %v1661_v31, %v1663_v63  ;;  %v539_v30 = vsel %vm514_vm2, %v536_v2, %v538_v50  ;;  %v537_v36 = vsel %vm514_vm2, %v534_v42, %v536_v2 }
 0x101   : > { %1684 = vrot.lane.b32.xlu1 %v3199_v46, %s3075_s17  ;;  %549 = vrot.lane.b32.xlu0 %v3202_v47, %s3074_s16  ;;  %v1573_v15 = vsel %vm1548_vm1, %v1570_v54, %v1572_v56  ;;  %v1571_v24 = vsel %vm1548_vm1, %v1568_v43, %v1570_v54  ;;  %v1669_v31 = vrot.slane %v3298_v44, 4  ;;  %v535_v7 = vsel %vm514_vm2, %v532_v6, %v534_v42 }
 0x102   : > { %v533_v50 = vsel %vm514_vm2, %v530_v49, %v532_v6  ;;  %v1569_v2 = vsel %vm1548_vm1, %v1566_v11, %v1568_v43  ;;  %v1567_v61 = vsel %vm1548_vm1, %v1564_v51, %v1566_v11  ;;  %v1666_v46 = vsel %vm1647_vm3, %v1663_v63, %v1665_v16 }
 0x103   : > { %v1670_v47 = vsel %vm1647_vm3, %v1667_v45, %v1669_v31  ;;  %v1672_v56 = vsel %vm1647_vm3, %v1669_v31, %v5549_v38  ;;  %v1668_v54 = vsel %vm1647_vm3, %v1665_v16, %v1667_v45  ;;  %v1677_v59 = vrot.slane %v3182_v34, 4 }
 0x104   : > { %v5550_v42 = vrot.slane %v3166_v22, 4 }
 0x105   : > { %573 = vrot.lane.b32.xlu1 %v3221_v58, %s3074_s16  ;;  %551 = vrot.lane.b32.xlu0 %v3213_v55, %s3074_s16  ;;  %v1680_v49 = vsel %vm1647_vm3, %v1677_v59, 0.0  ;;  %v3394_v55 = vpop.permute.xlu0 %1751 }
 0x106   : > { %v1678_v43 = vsel %vm1647_vm3, %v5550_v42, %v1677_v59  ;;  %5551 = vst [vmem:[#allocation7_spill] sm:$0xff] %v3394_v55 }
 0x109   : > { %1607 = vrot.lane.b32.xlu1 %v3245_v4, %s3074_s16  ;;  %1583 = vrot.lane.b32.xlu0 %v3225_v60, %s3074_s16 }
 0x10d   : > { %1706 = vrot.lane.b32.xlu1 %v3255_v8, %s3075_s17  ;;  %1682 = vrot.lane.b32.xlu0 %v3234_v0, %s3075_s17 }
 0x111   : > { %575 = vrot.lane.b32.xlu0 %v3237_v1, %s3074_s16  ;;  %555 = vrot.lane.b32.xlu1 %v3258_v9, %s3074_s16 }
 0x115   : > { %1609 = vrot.lane.b32.xlu0 %v3248_v5, %s3074_s16  ;;  %1589 = vrot.lane.b32.xlu1 %v3263_v13, %s3074_s16 }
 0x119   : > { %1708 = vrot.lane.b32.xlu0 %v3268_v14, %s3075_s17  ;;  %1688 = vrot.lane.b32.xlu1 %v3275_v20, %s3075_s17  ;;  %v3407_v14 = vcvt.s32.f32 %v3151_v12 }
 0x11b   : > { %vm5494_vm4 = vcmp.lt.f32.partialorder %v3407_v14, 15.0  ;;  %vm5496_vm10 = vcmp.lt.f32.partialorder %v3407_v14, 12.0 }
 0x11d   : > { %561 = vrot.lane.b32.xlu0 %v529_v26, %s3074_s16  ;;  %559 = vrot.lane.b32.xlu1 %v527_v27, %s3074_s16 }
 0x121   : > { %1595 = vrot.lane.b32.xlu0 %v1563_v35, %s3074_s16  ;;  %1593 = vrot.lane.b32.xlu1 %v1561_v32, %s3074_s16 }
 0x125   : > { %1694 = vrot.lane.b32.xlu0 %v1662_v40, %s3075_s17  ;;  %1692 = vrot.lane.b32.xlu1 %v1660_v48, %s3075_s17 }
 0x129   : > { %557 = vrot.lane.b32.xlu0 %v525_v37, %s3074_s16  ;;  %563 = vrot.lane.b32.xlu1 %v531_v21, %s3074_s16 }
 0x12d   : > { %1591 = vrot.lane.b32.xlu0 %v1559_v41, %s3074_s16  ;;  %1597 = vrot.lane.b32.xlu1 %v1565_v10, %s3074_s16 }
 0x131   : > { %1690 = vrot.lane.b32.xlu0 %v1658_v53, %s3075_s17  ;;  %1696 = vrot.lane.b32.xlu1 %v1664_v25, %s3075_s17 }
 0x135   : > { %571 = vrot.lane.b32.xlu1 %v539_v30, %s3074_s16  ;;  %569 = vrot.lane.b32.xlu0 %v537_v36, %s3074_s16 }
 0x139   : > { %1605 = vrot.lane.b32.xlu1 %v1573_v15, %s3074_s16  ;;  %1603 = vrot.lane.b32.xlu0 %v1571_v24, %s3074_s16 }
 0x13d   : > { %1702 = vrot.lane.b32.xlu1 %v1670_v47, %s3075_s17  ;;  %1704 = vrot.lane.b32.xlu0 %v1672_v56, %s3075_s17 }
 0x141   : > { %567 = vrot.lane.b32.xlu1 %v535_v7, %s3074_s16  ;;  %565 = vrot.lane.b32.xlu0 %v533_v50, %s3074_s16 }
 0x145   : > { %1601 = vrot.lane.b32.xlu1 %v1569_v2, %s3074_s16  ;;  %1599 = vrot.lane.b32.xlu0 %v1567_v61, %s3074_s16  ;;  %v479_v61 = vadd.s32 8, %v3151_v12 }
 0x147   : > { %v3409_v20 = vcvt.s32.f32 %v479_v61 }
 0x149   : > { %1698 = vrot.lane.b32.xlu1 %v1666_v46, %s3075_s17  ;;  %1700 = vrot.lane.b32.xlu0 %v1668_v54, %s3075_s17  ;;  %vm5495_vm5 = vcmp.lt.f32.partialorder %v3409_v20, 15.0  ;;  %vm5497_vm7 = vcmp.lt.f32.partialorder %v3409_v20, 12.0 }
 0x14d   : > { %1710 = vrot.lane.b32.xlu1 %v1678_v43, %s3075_s17  ;;  %1712 = vrot.lane.b32.xlu0 %v1680_v49, %s3075_s17 }
 0x163   : > { %v1588_v58 = vpop.permute.xlu0 %1587  ;;  %v554_v60 = vpop.permute.xlu1 %553 }
 0x164   : > { %v1633_v0 = vadd.f32 %v3160_v18, %v1588_v58  ;;  %v599_v1 = vadd.f32 %v3160_v18, %v554_v60 }
 0x166   : > { %v3399_v4 = vadd.f32 %v3158_v17, %v599_v1 }
 0x167   : > { %v1687_v5 = vpop.permute.xlu0 %1686  ;;  %v578_v7 = vpop.permute.xlu1 %577 }
 0x168   : > { %v3402_v8 = vadd.f32 %v1687_v5, %v1633_v0  ;;  %v611_v9 = vadd.f32 %v3166_v22, %v578_v7 }
 0x16a   : > { %v631_v13 = vadd.f32 %v3158_v17, %v611_v9 }
 0x16b   : > { %v580_v26 = vpop.permute.xlu0 %579  ;;  %v1612_v18 = vpop.permute.xlu1 %1611 }
 0x16c   : > { %v3411_v27 = vmax.f32 %v631_v13, 0.0  ;;  %v612_v35 = vadd.f32 %v3182_v34, %v580_v26  ;;  %v3415_v32 = vadd.f32 %v3166_v22, %v1612_v18 }
 0x16e   : > { %5552 = vst [vmem:[#allocation8_spill] sm:$0xff] %v3415_v32  ;;  %v632_v37 = vadd.f32 %v3158_v17, %v612_v35  ;;  %v3423_v40 = vsel %vm5494_vm4, %v3411_v27, -inf }
 0x16f   : > { %v1614_v38 = vpop.permute.xlu0 %1613  ;;  %v1586_v12 = vpop.permute.xlu1 %1585  ;;  %v731_v53 = vsel %vm5526_vm6, %v3423_v40, -inf }
 0x170   : > { %v3425_v41 = vmax.f32 %v632_v37, 0.0  ;;  %v3428_v48 = vadd.f32 %v3182_v34, %v1614_v38  ;;  %v1632_v22 = vadd.f32 %v1586_v12, %v3176_v29 }
 0x172   : > { %5553 = vst [vmem:[#allocation9_spill] sm:$0xff] %v3428_v48  ;;  %v3434_v51 = vsel %vm5495_vm5, %v3425_v41, -inf }
 0x173   : > { %v732_v59 = vsel %vm5526_vm6, %v3434_v51, -inf  ;;  %v1685_v63 = vpop.permute.xlu1 %1684  ;;  %v550_v45 = vpop.permute.xlu0 %549 }
 0x174   : > { %v733_v6 = vmax.f32 %v731_v53, %v732_v59  ;;  %v1731_v11 = vadd.f32 %v1685_v63, %v1632_v22  ;;  %v597_v34 = vadd.f32 %v550_v45, %v3162_v19 }
 0x176   : > { %v734_v16 = vrot.slane %v733_v6, 4  ;;  %v617_v21 = vadd.f32 %v3158_v17, %v597_v34  ;;  %v1755_v2 = vadd.f32 %v3394_v55, %v1731_v11 }
 0x177   : > { %v574_v10 = vpop.permute.xlu1 %573  ;;  %v552_v25 = vpop.permute.xlu0 %551 }
 0x178   : > { %v735_v30 = vmax.f32 %v733_v6, %v734_v16  ;;  %v609_v36 = vadd.f32 %v574_v10, %v3174_v28  ;;  %v598_v15 = vadd.f32 %v552_v25, %v3176_v29  ;;  %v3444_v31 = vmax.f32 %v617_v21, 0.0 }
 0x179   : > { %v3458_v60 = vmax.f32 %v1755_v2, 0.0  ;;  %v3492_v21 = vmax.f32 %v3399_v4, 0.0 }
 0x17a   : > { %v736_v24 = vrot.slane %v735_v30, 2  ;;  %v629_v50 = vadd.f32 %v3158_v17, %v609_v36  ;;  %v618_v54 = vadd.f32 %v3158_v17, %v598_v15  ;;  %v3454_v29 = vsel %vm5494_vm4, %v3444_v31, -inf }
 0x17b   : > { %v1608_v46 = vpop.permute.xlu1 %1607  ;;  %v1584_v47 = vpop.permute.xlu0 %1583  ;;  %v668_v7 = vsel %vm5526_vm6, %v3454_v29, -inf  ;;  %v3482_v53 = vsel %vm5497_vm7, %v3458_v60, -inf }
 0x17c   : > { %v737_v56 = vmax.f32 %v735_v30, %v736_v24  ;;  %v1643_v42 = vadd.f32 %v1608_v46, %v3174_v28  ;;  %v1631_v43 = vadd.f32 %v1584_v47, %v3162_v19  ;;  %v3456_v58 = vmax.f32 %v618_v54, 0.0 }
 0x17d   : > { %v3489_v34 = vmax.f32 %v629_v50, 0.0  ;;  %v1806_v15 = vsel %vm5498_vm11, %v3482_v53, -inf  ;;  %vm2238_vm0 = vcmp.gt.f32.partialorder %v3482_v53, -inf }
 0x17e   : > { %v738_v49 = vrot.slane %v737_v56, 1  ;;  %v3463_v5 = vsel %vm5495_vm5, %v3456_v58, -inf }
 0x17f   : > { %v1707_v0 = vpop.permute.xlu1 %1706  ;;  %v1683_v1 = vpop.permute.xlu0 %1682  ;;  %v669_v9 = vsel %vm5526_vm6, %v3463_v5, -inf  ;;  %v3509_v54 = vsel %vm5494_vm4, %v3489_v34, -inf }
 0x180   : > { %v739_v61 = vmax.f32 %v737_v56, %v738_v49  ;;  %v3465_v28 = vadd.f32 %v1707_v0, %v1643_v42  ;;  %v1730_v19 = vadd.f32 %v1683_v1, %v1631_v43  ;;  %v670_v13 = vmax.f32 %v668_v7, %v669_v9 }
 0x181   : > { %v3517_v0 = vsel %vm5494_vm4, %v3492_v21, -inf }
 0x182   : > { %vm754_vm8 = vcmp.eq.f32.partialorder %v3423_v40, %v739_v61  ;;  %vm755_vm9 = vcmp.eq.f32.partialorder %v3434_v51, %v739_v61  ;;  %v1754_v35 = vadd.f32 %v3394_v55, %v1730_v19  ;;  %v671_v59 = vrot.slane %v670_v13, 4 }
 0x183   : > { %v770_v26 = vsel %vm754_vm8, %v3407_v14, 16.0  ;;  %v771_v18 = vsel %vm755_vm9, %v3409_v20, 16.0  ;;  %v576_v37 = vpop.permute.xlu0 %575  ;;  %v556_v38 = vpop.permute.xlu1 %555 }
 0x184   : > { %v835_v12 = vsel %vm5526_vm6, %v770_v26, inf  ;;  %v836_v22 = vsel %vm5526_vm6, %v771_v18, inf  ;;  %v3484_v45 = vmax.f32 %v1754_v35, 0.0  ;;  %v610_v6 = vadd.f32 %v576_v37, %v3188_v39 }
 0x185   : > { %v837_v63 = vmin.f32 %v835_v12, %v836_v22  ;;  %v600_v11 = vadd.f32 %v3168_v23, %v556_v38  ;;  %v672_v16 = vmax.f32 %v670_v13, %v671_v59  ;;  %v722_v35 = vsel %vm5526_vm6, %v3509_v54, -inf }
 0x186   : > { %v3497_v25 = vsel %vm5496_vm10, %v3484_v45, -inf  ;;  %v630_v2 = vadd.f32 %v3158_v17, %v610_v6 }
 0x187   : > { %v838_v10 = vrot.slane %v837_v63, 4  ;;  %v1610_v30 = vpop.permute.xlu0 %1609  ;;  %v1590_v36 = vpop.permute.xlu1 %1589  ;;  %v673_v24 = vrot.slane %v672_v16, 2  ;;  %v1805_v50 = vsel %vm5498_vm11, %v3497_v25, -inf  ;;  %v620_v47 = vadd.f32 %v3158_v17, %v600_v11 }
 0x188   : > { %v1807_v46 = vmax.f32 %v1805_v50, %v1806_v15  ;;  %v1644_v56 = vadd.f32 %v1610_v30, %v3188_v39  ;;  %v3511_v43 = vmax.f32 %v630_v2, 0.0  ;;  %v1634_v49 = vadd.f32 %v3168_v23, %v1590_v36 }
 0x189   : > { %v839_v4 = vmin.f32 %v837_v63, %v838_v10  ;;  %v674_v42 = vmax.f32 %v672_v16, %v673_v24  ;;  %v3519_v19 = vmax.f32 %v620_v47, 0.0  ;;  %v677_v63 = vsel %vm5526_vm6, %v3517_v0, -inf }
 0x18a   : > { %v1808_v61 = vrot.slane %v1807_v46, 4  ;;  %v3524_v13 = vsel %vm5495_vm5, %v3511_v43, -inf }
 0x18b   : > { %v840_v1 = vrot.slane %v839_v4, 2  ;;  %5554 = vst [vmem:[#allocation10_spill] sm:$0xff] %v3519_v19  ;;  %v1709_v39 = vpop.permute.xlu0 %1708  ;;  %v1689_v7 = vpop.permute.xlu1 %1688  ;;  %v675_v9 = vrot.slane %v674_v42, 1  ;;  %v723_v38 = vsel %vm5526_vm6, %v3524_v13, -inf  ;;  %v3535_v59 = vsel %vm5495_vm5, %v3519_v19, -inf }
 0x18c   : > { %v1743_v26 = vadd.f32 %v1709_v39, %v1644_v56  ;;  %v3526_v18 = vadd.f32 %v1689_v7, %v1634_v49  ;;  %v1809_v37 = vmax.f32 %v1807_v46, %v1808_v61  ;;  %v724_v22 = vmax.f32 %v722_v35, %v723_v38 }
 0x18d   : > { %v841_v23 = vmin.f32 %v839_v4, %v840_v1  ;;  %v676_v12 = vmax.f32 %v674_v42, %v675_v9  ;;  %v678_v16 = vsel %vm5526_vm6, %v3535_v59, -inf }
 0x18e   : > { %v1810_v11 = vrot.slane %v1809_v37, 2  ;;  %v725_v10 = vrot.slane %v724_v22, 4  ;;  %v679_v30 = vmax.f32 %v677_v63, %v678_v16  ;;  %v1767_v63 = vadd.f32 %v3394_v55, %v1743_v26 }
 0x18f   : > { %v842_v6 = vrot.slane %v841_v23, 1  ;;  %vm740_vm12 = vcmp.eq.f32.partialorder %v3454_v29, %v676_v12  ;;  %vm741_vm13 = vcmp.eq.f32.partialorder %v3463_v5, %v676_v12 }
 0x190   : > { %v756_v15 = vsel %vm740_vm12, %v3407_v14, 16.0  ;;  %v757_v24 = vsel %vm741_vm13, %v3409_v20, 16.0  ;;  %v1811_v50 = vmax.f32 %v1809_v37, %v1810_v11  ;;  %v726_v46 = vmax.f32 %v724_v22, %v725_v10 }
 0x191   : > { %v843_v36 = vmin.f32 %v841_v23, %v842_v6  ;;  %v772_v2 = vsel %vm5526_vm6, %v756_v15, inf  ;;  %v773_v4 = vsel %vm5526_vm6, %v757_v24, inf  ;;  %v680_v47 = vrot.slane %v679_v30, 4 }
 0x192   : > { %v774_v56 = vmin.f32 %v772_v2, %v773_v4  ;;  %v1812_v42 = vrot.slane %v1811_v50, 1  ;;  %v727_v61 = vrot.slane %v726_v46, 2 }
 0x193   : > { %vm858_vm14 = vcmp.eq.f32.partialorder %v3407_v14, %v843_v36  ;;  %vm859_vm15 = vcmp.eq.f32.partialorder %v3409_v20, %v843_v36  ;;  %v681_v39 = vmax.f32 %v679_v30, %v680_v47  ;;  %v1766_v47 = vadd.f32 %v3394_v55, %v3465_v28 }
 0x194   : > { %v3550_v49 = vsel %vm858_vm14, -inf, %v3423_v40  ;;  %v3553_v1 = vsel %vm859_vm15, -inf, %v3434_v51  ;;  %v775_v23 = vrot.slane %v774_v56, 4  ;;  %v1813_v35 = vmax.f32 %v1811_v50, %v1812_v42 }
 0x195   : > { %v939_v7 = vsel %vm5526_vm6, %v3550_v49, -inf  ;;  %v940_v9 = vsel %vm5526_vm6, %v3553_v1, -inf  ;;  %v728_v38 = vmax.f32 %v726_v46, %v727_v61  ;;  %v682_v12 = vrot.slane %v681_v39, 2 }
 0x196   : > { %v941_v37 = vmax.f32 %v939_v7, %v940_v9  ;;  %v776_v22 = vmin.f32 %v774_v56, %v775_v23  ;;  %vm1877_vm1 = vcmp.eq.f32.partialorder %v3497_v25, %v1813_v35  ;;  %vm1878_vm2 = vcmp.eq.f32.partialorder %v3482_v53, %v1813_v35 }
 0x197   : > { %v1893_v11 = vsel %vm1877_vm1, %v3407_v14, 16.0  ;;  %v1894_v16 = vsel %vm1878_vm2, %v3409_v20, 16.0  ;;  %v729_v10 = vrot.slane %v728_v38, 1  ;;  %v683_v24 = vmax.f32 %v681_v39, %v682_v12 }
 0x198   : > { %v942_v6 = vrot.slane %v941_v37, 4  ;;  %v777_v30 = vrot.slane %v776_v22, 2  ;;  %v1909_v36 = vsel %vm5498_vm11, %v1893_v11, inf  ;;  %v1910_v15 = vsel %vm5498_vm11, %v1894_v16, inf }
 0x199   : > { %v1911_v2 = vmin.f32 %v1909_v36, %v1910_v15  ;;  %v730_v4 = vmax.f32 %v728_v38, %v729_v10  ;;  %v684_v26 = vrot.slane %v683_v24, 1  ;;  %v3568_v56 = vmax.f32 %v1767_v63, 0.0 }
 0x19a   : > { %v943_v50 = vmax.f32 %v941_v37, %v942_v6  ;;  %v778_v46 = vmin.f32 %v776_v22, %v777_v30 }
 0x19b   : > { %5555 = vst [vmem:[#allocation11_spill] sm:$0xff] %v3568_v56  ;;  %v1912_v61 = vrot.slane %v1911_v2, 4  ;;  %vm752_vm3 = vcmp.eq.f32.partialorder %v3509_v54, %v730_v4  ;;  %vm753_vm8 = vcmp.eq.f32.partialorder %v3524_v13, %v730_v4  ;;  %v685_v23 = vmax.f32 %v683_v24, %v684_v26 }
 0x19c   : > { %v944_v42 = vrot.slane %v943_v50, 2  ;;  %v779_v7 = vrot.slane %v778_v46, 1  ;;  %v768_v9 = vsel %vm752_vm3, %v3407_v14, 16.0  ;;  %v769_v39 = vsel %vm753_vm8, %v3409_v20, 16.0 }
 0x19d   : > { %v1913_v37 = vmin.f32 %v1911_v2, %v1912_v61  ;;  %v826_v38 = vsel %vm5526_vm6, %v768_v9, inf  ;;  %v827_v28 = vsel %vm5526_vm6, %v769_v39, inf  ;;  %vm742_vm9 = vcmp.eq.f32.partialorder %v3517_v0, %v685_v23 }
 0x19e   : > { %v945_v35 = vmax.f32 %v943_v50, %v944_v42  ;;  %v780_v12 = vmin.f32 %v778_v46, %v779_v7  ;;  %v828_v22 = vmin.f32 %v826_v38, %v827_v28  ;;  %vm743_vm12 = vcmp.eq.f32.partialorder %v3535_v59, %v685_v23 }
 0x19f   : > { %v1914_v6 = vrot.slane %v1913_v37, 2  ;;  %v758_v11 = vsel %vm742_vm9, %v3407_v14, 16.0  ;;  %v759_v16 = vsel %vm743_vm12, %v3409_v20, 16.0  ;;  %vm1114_vm12 = vcmp.gt.f32.partialorder %v3423_v40, -inf }
 0x1a0   : > { %v946_v63 = vrot.slane %v945_v35, 1  ;;  %vm844_vm13 = vcmp.eq.f32.partialorder %v3407_v14, %v780_v12  ;;  %vm845_vm14 = vcmp.eq.f32.partialorder %v3409_v20, %v780_v12  ;;  %v829_v10 = vrot.slane %v828_v22, 4 }
 0x1a1   : > { %v781_v30 = vsel %vm5526_vm6, %v758_v11, inf  ;;  %v3584_v15 = vsel %vm844_vm13, -inf, %v3454_v29  ;;  %v3587_v24 = vsel %vm845_vm14, -inf, %v3463_v5  ;;  %v1915_v50 = vmin.f32 %v1913_v37, %v1914_v6 }
 0x1a2   : > { %v947_v36 = vmax.f32 %v945_v35, %v946_v63  ;;  %v876_v2 = vsel %vm5526_vm6, %v3584_v15, -inf  ;;  %v877_v4 = vsel %vm5526_vm6, %v3587_v24, -inf  ;;  %v830_v46 = vmin.f32 %v828_v22, %v829_v10 }
 0x1a3   : > { %v782_v26 = vsel %vm5526_vm6, %v759_v16, inf  ;;  %v878_v42 = vmax.f32 %v876_v2, %v877_v4  ;;  %v1916_v61 = vrot.slane %v1915_v50, 1  ;;  %v3600_v22 = vmax.f32 %v1766_v47, 0.0 }
 0x1a4   : > { %vm962_vm15 = vcmp.eq.f32.partialorder %v3550_v49, %v947_v36  ;;  %vm963_vm1 = vcmp.eq.f32.partialorder %v3553_v1, %v947_v36  ;;  %v831_v39 = vrot.slane %v830_v46, 2  ;;  %v783_v23 = vmin.f32 %v781_v30, %v782_v26 }
 0x1a5   : > { %v978_v7 = vsel %vm962_vm15, %v3407_v14, 16.0  ;;  %v979_v9 = vsel %vm963_vm1, %v3409_v20, 16.0  ;;  %v879_v38 = vrot.slane %v878_v42, 4  ;;  %v1917_v28 = vmin.f32 %v1915_v50, %v1916_v61  ;;  %5556 = vst [vmem:[#allocation12_spill] sm:$0xff] %v3600_v22 }
 0x1a6   : > { %v1043_v35 = vsel %vm5526_vm6, %v978_v7, inf  ;;  %v1044_v37 = vsel %vm5526_vm6, %v979_v9, inf  ;;  %v832_v63 = vmin.f32 %v830_v46, %v831_v39  ;;  %v784_v6 = vrot.slane %v783_v23, 4 }
 0x1a7   : > { %v1045_v12 = vmin.f32 %v1043_v35, %v1044_v37  ;;  %v880_v11 = vmax.f32 %v878_v42, %v879_v38  ;;  %vm1981_vm2 = vcmp.eq.f32.partialorder %v3407_v14, %v1917_v28  ;;  %vm1982_vm3 = vcmp.eq.f32.partialorder %v3409_v20, %v1917_v28 }
 0x1a8   : > { %v3607_v16 = vsel %vm5497_vm7, %v3568_v56, -inf  ;;  %v3610_v30 = vsel %vm1981_vm2, -inf, %v3497_v25  ;;  %v3613_v36 = vsel %vm1982_vm3, -inf, %v3482_v53  ;;  %v833_v47 = vrot.slane %v832_v63, 1 }
 0x1a9   : > { %v1046_v10 = vrot.slane %v1045_v12, 4  ;;  %v881_v50 = vrot.slane %v880_v11, 2  ;;  %v2013_v2 = vsel %vm5498_vm11, %v3610_v30, -inf  ;;  %v2014_v4 = vsel %vm5498_vm11, %v3613_v36, -inf }
 0x1aa   : > { %v785_v46 = vmin.f32 %v783_v23, %v784_v6  ;;  %v2015_v42 = vmax.f32 %v2013_v2, %v2014_v4  ;;  %v834_v61 = vmin.f32 %v832_v63, %v833_v47  ;;  %v3622_v9 = vsel %vm5496_vm10, %v3600_v22, -inf }
 0x1ab   : > { %v1047_v26 = vmin.f32 %v1045_v12, %v1046_v10  ;;  %v882_v7 = vmax.f32 %v880_v11, %v881_v50  ;;  %v1860_v35 = vsel %vm5498_vm11, %v3607_v16, -inf  ;;  %v1859_v2 = vsel %vm5498_vm11, %v3622_v9, -inf }
 0x1ac   : > { %v786_v39 = vrot.slane %v785_v46, 2  ;;  %v2016_v38 = vrot.slane %v2015_v42, 4  ;;  %vm856_vm8 = vcmp.eq.f32.partialorder %v3407_v14, %v834_v61  ;;  %vm857_vm9 = vcmp.eq.f32.partialorder %v3409_v20, %v834_v61 }
 0x1ad   : > { %v1048_v37 = vrot.slane %v1047_v26, 2  ;;  %v883_v23 = vrot.slane %v882_v7, 1  ;;  %v3629_v28 = vsel %vm856_vm8, -inf, %v3509_v54  ;;  %v3632_v12 = vsel %vm857_vm9, -inf, %v3524_v13 }
 0x1ae   : > { %v787_v63 = vmin.f32 %v785_v46, %v786_v39  ;;  %v2017_v11 = vmax.f32 %v2015_v42, %v2016_v38  ;;  %v930_v10 = vsel %vm5526_vm6, %v3629_v28, -inf  ;;  %v931_v47 = vsel %vm5526_vm6, %v3632_v12, -inf }
 0x1af   : > { %v1049_v6 = vmin.f32 %v1047_v26, %v1048_v37  ;;  %v884_v50 = vmax.f32 %v882_v7, %v883_v23  ;;  %v932_v4 = vmax.f32 %v930_v10, %v931_v47  ;;  %vm1115_vm13 = vcmp.gt.f32.partialorder %v3434_v51, -inf }
 0x1b0   : > { %v788_v61 = vrot.slane %v787_v63, 1  ;;  %v2018_v46 = vrot.slane %v2017_v11, 2  ;;  %v3642_v39 = vmax.f32 %v1859_v2, %v1860_v35 }
 0x1b1   : > { %v1050_v48 = vrot.slane %v1049_v6, 1  ;;  %vm948_vm14 = vcmp.eq.f32.partialorder %v3584_v15, %v884_v50  ;;  %vm949_vm15 = vcmp.eq.f32.partialorder %v3587_v24, %v884_v50  ;;  %v933_v26 = vrot.slane %v932_v4, 4 }
 0x1b2   : > { %v789_v42 = vmin.f32 %v787_v63, %v788_v61  ;;  %v964_v7 = vsel %vm948_vm14, %v3407_v14, 16.0  ;;  %v965_v38 = vsel %vm949_vm15, %v3409_v20, 16.0  ;;  %v2019_v23 = vmax.f32 %v2017_v11, %v2018_v46  ;;  %v562_v63 = vpop.permute.xlu0 %561 }
 0x1b3   : > { %v1051_v37 = vmin.f32 %v1049_v6, %v1050_v48  ;;  %v980_v10 = vsel %vm5526_vm6, %v964_v7, inf  ;;  %v981_v47 = vsel %vm5526_vm6, %v965_v38, inf  ;;  %v934_v32 = vmax.f32 %v932_v4, %v933_v26 }
 0x1b4   : > { %vm846_vm1 = vcmp.eq.f32.partialorder %v3407_v14, %v789_v42  ;;  %v982_v35 = vmin.f32 %v980_v10, %v981_v47  ;;  %v2020_v50 = vrot.slane %v2019_v23, 1  ;;  %vm847_vm8 = vcmp.eq.f32.partialorder %v3409_v20, %v789_v42 }
 0x1b5   : > { %vm1066_vm2 = vcmp.eq.f32.partialorder %v3407_v14, %v1051_v37  ;;  %vm1067_vm3 = vcmp.eq.f32.partialorder %v3409_v20, %v1051_v37  ;;  %v935_v2 = vrot.slane %v934_v32, 2  ;;  %v603_v26 = vadd.f32 %v3208_v52, %v562_v63 }
 0x1b6   : > { %v1082_v48 = vsel %vm1066_vm2, -inf, %v3550_v49  ;;  %v1083_v6 = vsel %vm1067_vm3, -inf, %v3553_v1  ;;  %v983_v11 = vrot.slane %v982_v35, 4  ;;  %v2021_v4 = vmax.f32 %v2019_v23, %v2020_v50 }
 0x1b7   : > { %vm1098_vm9 = vcmp.eq.f32.partialorder %v1082_v48, -inf  ;;  %vm1099_vm14 = vcmp.eq.f32.partialorder %v1083_v6, -inf  ;;  %v936_v46 = vmax.f32 %v934_v32, %v935_v2  ;;  %v3665_v49 = vsel %vm846_vm1, -inf, %v3517_v0 }
 0x1b8   : > { %vm3658_vm15 = vmand %vm1098_vm9, %vm1114_vm12  ;;  %v3668_v1 = vsel %vm847_vm8, -inf, %v3535_v59  ;;  %v984_v40 = vmin.f32 %v982_v35, %v983_v11  ;;  %vm2085_vm12 = vcmp.eq.f32.partialorder %v3610_v30, %v2021_v4  ;;  %vm2086_vm1 = vcmp.eq.f32.partialorder %v3613_v36, %v2021_v4 }
 0x1b9   : > { %vm3673_vm2 = vmand %vm1099_vm14, %vm1115_vm13  ;;  %v1146_v32 = vsel %vm3658_vm15, %v3407_v14, 16.0  ;;  %v2101_v51 = vsel %vm2085_vm12, %v3407_v14, 16.0  ;;  %v2102_v38 = vsel %vm2086_vm1, %v3409_v20, 16.0  ;;  %v937_v48 = vrot.slane %v936_v46, 1 }
 0x1ba   : > { %v1147_v42 = vsel %vm3673_vm2, %v3409_v20, 16.0  ;;  %v1211_v7 = vsel %vm5526_vm6, %v1146_v32, inf  ;;  %v985_v10 = vrot.slane %v984_v40, 2  ;;  %v2117_v47 = vsel %vm5498_vm11, %v2101_v51, inf }
 0x1bb   : > { %v1212_v23 = vsel %vm5526_vm6, %v1147_v42, inf  ;;  %v2118_v35 = vsel %vm5498_vm11, %v2102_v38, inf  ;;  %v885_v6 = vsel %vm5526_vm6, %v3665_v49, -inf  ;;  %v886_v11 = vsel %vm5526_vm6, %v3668_v1, -inf }
 0x1bc   : > { %v1213_v50 = vmin.f32 %v1211_v7, %v1212_v23  ;;  %v2119_v63 = vmin.f32 %v2117_v47, %v2118_v35  ;;  %v986_v2 = vmin.f32 %v984_v40, %v985_v10  ;;  %v938_v33 = vmax.f32 %v936_v46, %v937_v48 }
 0x1bd   : > { %v887_v56 = vmax.f32 %v885_v6, %v886_v11  ;;  %vm1100_vm13 = vcmp.gt.f32.partialorder %v3454_v29, -inf  ;;  %v1862_v51 = vrot.slane %v3642_v39, 4  ;;  %v3698_v7 = vadd.f32 %v3158_v17, %v603_v26 }
 0x1be   : > { %v1214_v4 = vrot.slane %v1213_v50, 4  ;;  %v2120_v32 = vrot.slane %v2119_v63, 4  ;;  %v987_v42 = vrot.slane %v986_v2, 1  ;;  %vm960_vm3 = vcmp.eq.f32.partialorder %v3629_v28, %v938_v33 }
 0x1bf   : > { %vm961_vm8 = vcmp.eq.f32.partialorder %v3632_v12, %v938_v33  ;;  %v976_v10 = vsel %vm960_vm3, %v3407_v14, 16.0  ;;  %v888_v47 = vrot.slane %v887_v56, 4  ;;  %vm1101_vm3 = vcmp.gt.f32.partialorder %v3463_v5, -inf }
 0x1c0   : > { %v1215_v38 = vmin.f32 %v1213_v50, %v1214_v4  ;;  %v2121_v23 = vmin.f32 %v2119_v63, %v2120_v32  ;;  %v988_v40 = vmin.f32 %v986_v2, %v987_v42  ;;  %v977_v46 = vsel %vm961_vm8, %v3409_v20, 16.0 }
 0x1c1   : > { %v1034_v6 = vsel %vm5526_vm6, %v976_v10, inf  ;;  %v1035_v11 = vsel %vm5526_vm6, %v977_v46, inf  ;;  %v889_v50 = vmax.f32 %v887_v56, %v888_v47  ;;  %vm2237_vm11 = vcmp.gt.f32.partialorder %v3497_v25, -inf }
 0x1c2   : > { %v1216_v35 = vrot.slane %v1215_v38, 2  ;;  %v2122_v48 = vrot.slane %v2121_v23, 2  ;;  %vm1052_vm9 = vcmp.eq.f32.partialorder %v3407_v14, %v988_v40  ;;  %vm1053_vm14 = vcmp.eq.f32.partialorder %v3409_v20, %v988_v40 }
 0x1c3   : > { %v1036_v26 = vmin.f32 %v1034_v6, %v1035_v11  ;;  %v1068_v33 = vsel %vm1052_vm9, -inf, %v3584_v15  ;;  %v1069_v2 = vsel %vm1053_vm14, -inf, %v3587_v24  ;;  %v890_v42 = vrot.slane %v889_v50, 2 }
 0x1c4   : > { %v1217_v63 = vmin.f32 %v1215_v38, %v1216_v35  ;;  %v2123_v4 = vmin.f32 %v2121_v23, %v2122_v48  ;;  %vm1084_vm12 = vcmp.eq.f32.partialorder %v1068_v33, -inf  ;;  %vm1085_vm1 = vcmp.eq.f32.partialorder %v1069_v2, -inf }
 0x1c5   : > { %v1037_v32 = vrot.slane %v1036_v26, 4  ;;  %vm3713_vm8 = vmand %vm1084_vm12, %vm1100_vm13  ;;  %v891_v23 = vmax.f32 %v889_v50, %v890_v42  ;;  %v1863_v6 = vmax.f32 %v3642_v39, %v1862_v51 }
 0x1c6   : > { %v1218_v22 = vrot.slane %v1217_v63, 1  ;;  %v2124_v56 = vrot.slane %v2123_v4, 1  ;;  %vm3718_vm9 = vmand %vm1085_vm1, %vm1101_vm3  ;;  %v1132_v24 = vsel %vm3713_vm8, %v3407_v14, 16.0  ;;  %vm5523_vm1 = vmmov 1  }
 0x1c7   : > { %v1038_v38 = vmin.f32 %v1036_v26, %v1037_v32  ;;  %v1133_v29 = vsel %vm3718_vm9, %v3409_v20, 16.0  ;;  %v1148_v40 = vsel %vm5526_vm6, %v1132_v24, inf  ;;  %v892_v48 = vrot.slane %v891_v23, 1 }
 0x1c8   : > { %v1219_v5 = vmin.f32 %v1217_v63, %v1218_v22  ;;  %v2125_v46 = vmin.f32 %v2123_v4, %v2124_v56  ;;  %v1149_v47 = vsel %vm5526_vm6, %v1133_v29, inf }
 0x1c9   : > { %v1039_v35 = vrot.slane %v1038_v38, 2  ;;  %v1150_v11 = vmin.f32 %v1148_v40, %v1149_v47  ;;  %v893_v42 = vmax.f32 %v891_v23, %v892_v48 }
 0x1ca   : > { %vm1234_vm13 = vcmp.eq.f32.partialorder %v3407_v14, %v1219_v5  ;;  %vm1235_vm14 = vcmp.eq.f32.partialorder %v3409_v20, %v1219_v5  ;;  %vm2189_vm12 = vcmp.eq.f32.partialorder %v3407_v14, %v2125_v46  ;;  %vm2190_vm4 = vcmp.eq.f32.partialorder %v3409_v20, %v2125_v46 }
 0x1cb   : > { %v1250_v22 = vsel %vm1234_vm13, %v3411_v27, 0.0  ;;  %v1251_v26 = vsel %vm1235_vm14, %v3425_v41, 0.0  ;;  %vm1338_vm3 = vmxor %vm1234_vm13, %vm5523_vm1  ;;  %v2205_v50 = vsel %vm2189_vm12, -inf, %v3610_v30  ;;  %v1151_v63 = vrot.slane %v1150_v11, 4 }
 0x1cc   : > { %v1315_v39 = vsel %vm5526_vm6, %v1250_v22, 0.0  ;;  %v1316_v51 = vsel %vm5526_vm6, %v1251_v26, 0.0  ;;  %vm1339_vm5 = vmxor %vm1235_vm14, %vm5523_vm1  ;;  %v2206_v33 = vsel %vm2190_vm4, -inf, %v3613_v36  ;;  %vm2221_vm7 = vcmp.eq.f32.partialorder %v2205_v50, -inf }
 0x1cd   : > { %v3743_v2 = vadd.f32 %v1316_v51, %v1315_v39  ;;  %vm1354_vm10 = vmand %vm3658_vm15, %vm1338_vm3  ;;  %vm2222_vm13 = vcmp.eq.f32.partialorder %v2206_v33, -inf  ;;  %v1040_v4 = vmin.f32 %v1038_v38, %v1039_v35  ;;  %v1152_v32 = vmin.f32 %v1150_v11, %v1151_v63 }
 0x1ce   : > { %vm1355_vm12 = vmand %vm3673_vm2, %vm1339_vm5  ;;  %v1370_v30 = vsel %vm1354_vm10, %v3407_v14, 16.0  ;;  %v1864_v5 = vrot.slane %v1863_v6, 2  ;;  %vm1112_vm10 = vcmp.gt.f32.partialorder %v3509_v54, -inf  ;;  %vm951_vm15 = vcmp.eq.f32.partialorder %v3668_v1, %v893_v42 }
 0x1cf   : > { %v1371_v56 = vsel %vm1355_vm12, %v3409_v20, 16.0  ;;  %v1435_v36 = vsel %vm5526_vm6, %v1370_v30, inf  ;;  %vm3753_vm4 = vmand %vm2221_vm7, %vm2237_vm11  ;;  %v1041_v61 = vrot.slane %v1040_v4, 1  ;;  %v1153_v37 = vrot.slane %v1152_v32, 2 }
 0x1d0   : > { %v1436_v38 = vsel %vm5526_vm6, %v1371_v56, inf  ;;  %vm3760_vm5 = vmand %vm2222_vm13, %vm2238_vm0  ;;  %v2269_v25 = vsel %vm3753_vm4, %v3407_v14, 16.0  ;;  %vm950_vm7 = vcmp.eq.f32.partialorder %v3665_v49, %v893_v42  ;;  %vm5569_vm11 = vcmask 195712  }
 0x1d1   : > { %v3768_v23 = vmin.f32 %v1435_v36, %v1436_v38  ;;  %v2270_v40 = vsel %vm3760_vm5, %v3409_v20, 16.0  ;;  %v2285_v53 = vsel %vm5569_vm11, %v2269_v25, inf  ;;  %v1154_v46 = vmin.f32 %v1152_v32, %v1153_v37  ;;  %vm5570_vm0 = vmmov %vm5569_vm11 }
 0x1d2   : > { %v2286_v47 = vsel %vm5570_vm0, %v2270_v40, inf  ;;  %v1042_v35 = vmin.f32 %v1040_v4, %v1041_v61  ;;  %v966_v11 = vsel %vm950_vm7, %v3407_v14, 16.0  ;;  %v967_v22 = vsel %vm951_vm15, %v3409_v20, 16.0 }
 0x1d3   : > { %v2287_v48 = vmin.f32 %v2285_v53, %v2286_v47  ;;  %v1757_v26 = vadd.f32 %v3394_v55, %v3526_v18  ;;  %v1155_v50 = vrot.slane %v1154_v46, 1  ;;  %v1865_v39 = vmax.f32 %v1863_v6, %v1864_v5 }
 0x1d4   : > { %vm1064_vm2 = vcmp.eq.f32.partialorder %v3407_v14, %v1042_v35  ;;  %vm1065_vm14 = vcmp.eq.f32.partialorder %v3409_v20, %v1042_v35  ;;  %v989_v4 = vsel %vm5526_vm6, %v966_v11, inf  ;;  %v990_v32 = vsel %vm5526_vm6, %v967_v22, inf }
 0x1d5   : > { %v2288_v51 = vrot.slane %v2287_v48, 4  ;;  %v1080_v63 = vsel %vm1064_vm2, -inf, %v3629_v28  ;;  %v1081_v33 = vsel %vm1065_vm14, -inf, %v3632_v12  ;;  %v1156_v30 = vmin.f32 %v1154_v46, %v1155_v50 }
 0x1d6   : > { %vm1096_vm3 = vcmp.eq.f32.partialorder %v1080_v63, -inf  ;;  %vm1097_vm13 = vcmp.eq.f32.partialorder %v1081_v33, -inf  ;;  %v1756_v18 = vadd.f32 %v3394_v55, %v3402_v8  ;;  %vm1113_vm12 = vcmp.gt.f32.partialorder %v3524_v13, -inf }
 0x1d7   : > { %v2289_v42 = vmin.f32 %v2287_v48, %v2288_v51  ;;  %vm3792_vm7 = vmand %vm1096_vm3, %vm1112_vm10  ;;  %v3796_v28 = vmax.f32 %v1757_v26, 0.0  ;;  %vm1220_vm11 = vcmp.eq.f32.partialorder %v3407_v14, %v1156_v30  ;;  %vm1221_vm0 = vcmp.eq.f32.partialorder %v3409_v20, %v1156_v30 }
 0x1d8   : > { %vm3800_vm15 = vmand %vm1097_vm13, %vm1113_vm12  ;;  %v1144_v8 = vsel %vm3792_vm7, %v3407_v14, 16.0  ;;  %v1866_v13 = vrot.slane %v1865_v39, 1  ;;  %v1236_v54 = vsel %vm1220_vm11, %v3444_v31, 0.0  ;;  %v1237_v56 = vsel %vm1221_vm0, %v3456_v58, 0.0 }
 0x1d9   : > { %vm1324_vm10 = vmxor %vm1220_vm11, %vm5523_vm1  ;;  %v2290_v36 = vrot.slane %v2289_v42, 2  ;;  %v991_v61 = vmin.f32 %v989_v4, %v990_v32  ;;  %v1252_v5 = vsel %vm5526_vm6, %v1236_v54, 0.0  ;;  %v1253_v38 = vsel %vm5526_vm6, %v1237_v56, 0.0 }
 0x1da   : > { %vm1325_vm2 = vmxor %vm1221_vm0, %vm5523_vm1  ;;  %v1145_v37 = vsel %vm3800_vm15, %v3409_v20, 16.0  ;;  %v1202_v25 = vsel %vm5526_vm6, %v1144_v8, inf  ;;  %v3817_v40 = vmax.f32 %v1756_v18, 0.0  ;;  %v3819_v53 = vadd.f32 %v1253_v38, %v1252_v5 }
 0x1db   : > { %vm1340_vm14 = vmand %vm3713_vm8, %vm1324_vm10  ;;  %v2291_v46 = vmin.f32 %v2289_v42, %v2290_v36  ;;  %v1203_v47 = vsel %vm5526_vm6, %v1145_v37, inf  ;;  %v1867_v11 = vmax.f32 %v1865_v39, %v1866_v13  ;;  %v992_v50 = vrot.slane %v991_v61, 4 }
 0x1dc   : > { %vm1341_vm3 = vmand %vm3718_vm9, %vm1325_vm2  ;;  %v1356_v35 = vsel %vm1340_vm14, %v3407_v14, 16.0  ;;  %v1204_v48 = vmin.f32 %v1202_v25, %v1203_v47  ;;  %vm5575_vm13 = vcmp.lt.f32.partialorder %v3409_v20, 12.0  ;;  %vm5576_vm8 = vcmp.lt.f32.partialorder %v3407_v14, 12.0 }
 0x1dd   : > { %v1357_v22 = vsel %vm1341_vm3, %v3409_v20, 16.0  ;;  %v1372_v26 = vsel %vm5526_vm6, %v1356_v35, inf  ;;  %v3832_v10 = vsel %vm5575_vm13, %v3796_v28, -inf  ;;  %v2292_v63 = vrot.slane %v2291_v46, 1 }
 0x1de   : > { %v1373_v51 = vsel %vm5526_vm6, %v1357_v22, inf  ;;  %v1205_v33 = vrot.slane %v1204_v48, 4  ;;  %v3838_v15 = vsel %vm5576_vm8, %v3817_v40, -inf  ;;  %vm1889_vm9 = vcmp.eq.f32.partialorder %v3622_v9, %v1867_v11 }
 0x1df   : > { %v3840_v39 = vmin.f32 %v1372_v26, %v1373_v51  ;;  %v2293_v4 = vmin.f32 %v2291_v46, %v2292_v63  ;;  %vm5577_vm12 = vcmask 195712   ;;  %v993_v18 = vmin.f32 %v991_v61, %v992_v50 }
 0x1e0   : > { %v1206_v30 = vmin.f32 %v1204_v48, %v1205_v33  ;;  %v1815_v32 = vsel %vm5577_vm12, %v3832_v10, -inf  ;;  %vm1890_vm11 = vcmp.eq.f32.partialorder %v3607_v16, %v1867_v11  ;;  %vm5578_vm0 = vmmov %vm5577_vm12  ;;  %v1905_v56 = vsel %vm1889_vm9, %v3407_v14, 16.0 }
 0x1e1   : > { %v1814_v42 = vsel %vm5578_vm0, %v3838_v15, -inf  ;;  %vm2357_vm10 = vcmp.eq.f32.partialorder %v3407_v14, %v2293_v4  ;;  %vm2358_vm2 = vcmp.eq.f32.partialorder %v3409_v20, %v2293_v4  ;;  %vm5579_vm3 = vmmov %vm5578_vm0  ;;  %v1906_v37 = vsel %vm1890_vm11, %v3409_v20, 16.0 }
 0x1e2   : > { %v1207_v8 = vrot.slane %v1206_v30, 2  ;;  %v2373_v13 = vsel %vm2357_vm10, %v3484_v45, 0.0  ;;  %v2374_v54 = vsel %vm2358_vm2, %v3458_v60, 0.0  ;;  %vm2461_vm14 = vmxor %vm2357_vm10, %vm5523_vm1  ;;  %v1816_v36 = vmax.f32 %v1814_v42, %v1815_v32 }
 0x1e3   : > { %v2389_v61 = vsel %vm5579_vm3, %v2373_v13, 0.0  ;;  %vm5580_vm13 = vmmov %vm5578_vm0  ;;  %v994_v46 = vrot.slane %v993_v18, 2  ;;  %v1438_v29 = vrot.slane %v3768_v23, 4 }
 0x1e4   : > { %v2390_v5 = vsel %vm5580_vm13, %v2374_v54, 0.0  ;;  %vm2462_vm8 = vmxor %vm2358_vm2, %vm5523_vm1  ;;  %v1208_v38 = vmin.f32 %v1206_v30, %v1207_v8  ;;  %v1817_v26 = vrot.slane %v1816_v36, 4 }
 0x1e5   : > { %v3858_v25 = vadd.f32 %v2390_v5, %v2389_v61  ;;  %vm2477_vm12 = vmand %vm3753_vm4, %vm2461_vm14  ;;  %v995_v63 = vmin.f32 %v993_v18, %v994_v46  ;;  %v1439_v54 = vmin.f32 %v3768_v23, %v1438_v29 }
 0x1e6   : > { %vm2478_vm0 = vmand %vm3760_vm5, %vm2462_vm8  ;;  %v2493_v47 = vsel %vm2477_vm12, %v3407_v14, 16.0  ;;  %v1209_v35 = vrot.slane %v1208_v38, 1  ;;  %v1818_v42 = vmax.f32 %v1816_v36, %v1817_v26  ;;  %vm1102_vm12 = vcmp.gt.f32.partialorder %v3517_v0, -inf  ;;  %v560_v0 = vpop.permute.xlu1 %559 }
 0x1e7   : > { %v2494_v48 = vsel %vm2478_vm0, %v3409_v20, 16.0  ;;  %vm5581_vm9 = vmmov %vm5579_vm3  ;;  %v996_v4 = vrot.slane %v995_v63, 1  ;;  %v1440_v23 = vrot.slane %v1439_v54, 2 }
 0x1e8   : > { %v1963_v11 = vsel %vm5581_vm9, %v1905_v56, inf  ;;  %vm5582_vm10 = vmmov %vm5579_vm3  ;;  %v1210_v24 = vmin.f32 %v1208_v38, %v1209_v35  ;;  %v1819_v5 = vrot.slane %v1818_v42, 2  ;;  %v1375_v38 = vrot.slane %v3840_v39, 4 }
 0x1e9   : > { %v1964_v22 = vsel %vm5582_vm10, %v1906_v37, inf  ;;  %vm5583_vm11 = vmmov %vm5579_vm3  ;;  %v997_v13 = vmin.f32 %v995_v63, %v996_v4  ;;  %vm1103_vm10 = vcmp.gt.f32.partialorder %v3535_v59, -inf }
 0x1ea   : > { %v2509_v50 = vsel %vm5583_vm11, %v2493_v47, inf  ;;  %vm5584_vm2 = vmmov %vm5579_vm3  ;;  %vm1232_vm4 = vcmp.eq.f32.partialorder %v3407_v14, %v1210_v24  ;;  %vm1233_vm5 = vcmp.eq.f32.partialorder %v3409_v20, %v1210_v24  ;;  %v1965_v32 = vmin.f32 %v1963_v11, %v1964_v22 }
 0x1eb   : > { %v2510_v51 = vsel %vm5584_vm2, %v2494_v48, inf  ;;  %v1248_v30 = vsel %vm1232_vm4, %v3489_v34, 0.0  ;;  %vm1336_vm14 = vmxor %vm1232_vm4, %vm5523_vm1  ;;  %v1249_v8 = vsel %vm1233_vm5, %v3511_v43, 0.0  ;;  %v1820_v22 = vmax.f32 %v1818_v42, %v1819_v5 }
 0x1ec   : > { %v3870_v33 = vmin.f32 %v2509_v50, %v2510_v51  ;;  %vm1337_vm3 = vmxor %vm1233_vm5, %vm5523_vm1  ;;  %v1306_v18 = vsel %vm5526_vm6, %v1248_v30, 0.0  ;;  %v1307_v56 = vsel %vm5526_vm6, %v1249_v8, 0.0  ;;  %v1966_v36 = vrot.slane %v1965_v32, 4 }
 0x1ed   : > { %vm1352_vm13 = vmand %vm3792_vm7, %vm1336_vm14  ;;  %v3888_v37 = vadd.f32 %v1307_v56, %v1306_v18  ;;  %vm1054_vm7 = vcmp.eq.f32.partialorder %v3407_v14, %v997_v13  ;;  %v1376_v26 = vmin.f32 %v3840_v39, %v1375_v38  ;;  %v1821_v63 = vrot.slane %v1820_v22, 1 }
 0x1ee   : > { %vm1353_vm8 = vmand %vm3800_vm15, %vm1337_vm3  ;;  %v1368_v61 = vsel %vm1352_vm13, %v3407_v14, 16.0  ;;  %vm1055_vm15 = vcmp.eq.f32.partialorder %v3409_v20, %v997_v13  ;;  %v1070_v12 = vsel %vm1054_vm7, -inf, %v3665_v49  ;;  %v1967_v11 = vmin.f32 %v1965_v32, %v1966_v36 }
 0x1ef   : > { %v1369_v46 = vsel %vm1353_vm8, %v3409_v20, 16.0  ;;  %v1426_v6 = vsel %vm5526_vm6, %v1368_v61, inf  ;;  %v1071_v48 = vsel %vm1055_vm15, -inf, %v3668_v1  ;;  %vm1086_vm0 = vcmp.eq.f32.partialorder %v1070_v12, -inf  ;;  %v3918_v61 = vpop.permute.xlu1 %1593 }
 0x1f0   : > { %v1427_v47 = vsel %vm5526_vm6, %v1369_v46, inf  ;;  %vm1087_vm9 = vcmp.eq.f32.partialorder %v1071_v48, -inf  ;;  %vm3902_vm11 = vmand %vm1086_vm0, %vm1102_vm12  ;;  %v1968_v51 = vrot.slane %v1967_v11, 2  ;;  %v1441_v1 = vmin.f32 %v1439_v54, %v1440_v23 }
 0x1f1   : > { %v3894_v35 = vmin.f32 %v1426_v6, %v1427_v47  ;;  %vm3906_vm2 = vmand %vm1087_vm9, %vm1103_vm10  ;;  %v1134_v49 = vsel %vm3902_vm11, %v3407_v14, 16.0  ;;  %v1377_v29 = vrot.slane %v1376_v26, 2  ;;  %v1822_v18 = vmax.f32 %v1820_v22, %v1821_v63 }
 0x1f2   : > { %v1135_v39 = vsel %vm3906_vm2, %v3409_v20, 16.0  ;;  %v1157_v59 = vsel %vm5526_vm6, %v1134_v49, inf  ;;  %v1969_v30 = vmin.f32 %v1967_v11, %v1968_v51  ;;  %v1442_v42 = vrot.slane %v1441_v1, 1 }
 0x1f3   : > { %v1158_v4 = vsel %vm5526_vm6, %v1135_v39, inf  ;;  %v1378_v13 = vmin.f32 %v1376_v26, %v1377_v29  ;;  %vm1879_vm4 = vcmp.eq.f32.partialorder %v3838_v15, %v1822_v18  ;;  %vm1880_vm5 = vcmp.eq.f32.partialorder %v3832_v10, %v1822_v18  ;;  %v3935_v26 = vpop.permute.xlu0 %1595 }
 0x1f4   : > { %v1159_v32 = vmin.f32 %v1157_v59, %v1158_v4  ;;  %v1970_v8 = vrot.slane %v1969_v30, 1  ;;  %v1895_v5 = vsel %vm1879_vm4, %v3407_v14, 16.0  ;;  %v1443_v38 = vmin.f32 %v1441_v1, %v1442_v42  ;;  %v3938_v1 = vpop.permute.xlu1 %1692 }
 0x1f5   : > { %v1379_v46 = vrot.slane %v1378_v13, 1  ;;  %v2512_v6 = vrot.slane %v3870_v33, 4  ;;  %v1896_v23 = vsel %vm1880_vm5, %v3409_v20, 16.0  ;;  %vm5589_vm13 = vcmask 195712  }
 0x1f6   : > { %v1160_v56 = vrot.slane %v1159_v32, 4  ;;  %v1971_v54 = vmin.f32 %v1969_v30, %v1970_v8  ;;  %v1918_v11 = vsel %vm5589_vm13, %v1895_v5, inf  ;;  %v602_v22 = vadd.f32 %v560_v0, %v3240_v3  ;;  %vm5590_vm7 = vmmov %vm5589_vm13 }
 0x1f7   : > { %v1255_v51 = vrot.slane %v3819_v53, 4  ;;  %vm1458_vm8 = vcmp.eq.f32.partialorder %v3407_v14, %v1443_v38  ;;  %vm5591_vm15 = vmmov %vm5590_vm7  ;;  %vm1459_vm0 = vcmp.eq.f32.partialorder %v3409_v20, %v1443_v38  ;;  %v1380_v30 = vmin.f32 %v1378_v13, %v1379_v46 }
 0x1f8   : > { %v1161_v36 = vmin.f32 %v1159_v32, %v1160_v56  ;;  %vm1993_vm14 = vcmp.eq.f32.partialorder %v3407_v14, %v1971_v54  ;;  %vm1994_vm3 = vcmp.eq.f32.partialorder %v3409_v20, %v1971_v54  ;;  %vm5592_vm12 = vmmov %vm5590_vm7  ;;  %v2513_v32 = vmin.f32 %v3870_v33, %v2512_v6  ;;  %v564_v46 = vpop.permute.xlu1 %563 }
 0x1f9   : > { %v3928_v12 = vsel %vm1993_vm14, -inf, %v3622_v9  ;;  %v3931_v48 = vsel %vm1994_vm3, -inf, %v3607_v16  ;;  %v1919_v63 = vsel %vm5592_vm12, %v1896_v23, inf  ;;  %v622_v42 = vadd.f32 %v3158_v17, %v602_v22  ;;  %vm5596_vm12 = vmmov %vm5590_vm7 }
 0x1fa   : > { %v1162_v47 = vrot.slane %v1161_v36, 2  ;;  %v2067_v39 = vsel %vm5590_vm7, %v3928_v12, -inf  ;;  %v2068_v59 = vsel %vm5591_vm15, %v3931_v48, -inf  ;;  %v1920_v4 = vmin.f32 %v1918_v11, %v1919_v63  ;;  %vm5595_vm15 = vmmov %vm5590_vm7 }
 0x1fb   : > { %v2069_v29 = vmax.f32 %v2067_v39, %v2068_v59  ;;  %v1474_v54 = vsel %vm1458_vm8, %v3411_v27, 0.0  ;;  %v1256_v5 = vadd.f32 %v1255_v51, %v3819_v53  ;;  %v2392_v38 = vrot.slane %v3858_v25, 4 }
 0x1fc   : > { %v1163_v49 = vmin.f32 %v1161_v36, %v1162_v47  ;;  %v1921_v56 = vrot.slane %v1920_v4, 4  ;;  %v1475_v36 = vsel %vm1459_vm0, %v3425_v41, 0.0  ;;  %v3955_v47 = vpop.permute.xlu0 %1694  ;;  %vm1444_vm4 = vcmp.eq.f32.partialorder %v3407_v14, %v1380_v30  ;;  %vm5597_vm0 = vmmov %vm5590_vm7 }
 0x1fd   : > { %v2070_v18 = vrot.slane %v2069_v29, 4  ;;  %v2514_v27 = vrot.slane %v2513_v32, 2  ;;  %v1539_v51 = vsel %vm5526_vm6, %v1474_v54, 0.0  ;;  %vm1445_vm5 = vcmp.eq.f32.partialorder %v3409_v20, %v1380_v30 }
 0x1fe   : > { %v1164_v0 = vrot.slane %v1163_v49, 1  ;;  %v1922_v13 = vmin.f32 %v1920_v4, %v1921_v56  ;;  %v1540_v59 = vsel %vm5526_vm6, %v1475_v36, 0.0  ;;  %v2393_v63 = vadd.f32 %v2392_v38, %v3858_v25 }
 0x1ff   : > { %v2071_v33 = vmax.f32 %v2069_v29, %v2070_v18  ;;  %v1460_v4 = vsel %vm1444_vm4, %v3444_v31, 0.0  ;;  %v2515_v18 = vmin.f32 %v2513_v32, %v2514_v27  ;;  %v3990_v25 = vmax.f32 %v3698_v7, 0.0 }
 0x200   : > { %v3949_v8 = vmin.f32 %v1163_v49, %v1164_v0  ;;  %v1923_v22 = vrot.slane %v1922_v13, 2  ;;  %v1257_v49 = vrot.slane %v1256_v5, 2  ;;  %v558_v56 = vpop.permute.xlu0 %557  ;;  %v1476_v30 = vsel %vm5526_vm6, %v1460_v4, 0.0 }
 0x201   : > { %v2072_v11 = vrot.slane %v2071_v33, 2  ;;  %5594 = vst [vmem:[#allocation14_spill] sm:$0xff] %v3990_v25  ;;  %v2394_v31 = vrot.slane %v2393_v63, 2  ;;  %v604_v27 = vadd.f32 %v3230_v62, %v564_v46  ;;  %vm5598_vm4 = vcmp.lt.f32.partialorder %v3409_v20, 15.0 }
 0x202   : > { %vm1222_vm9 = vcmp.eq.f32.partialorder %v3407_v14, %v3949_v8  ;;  %vm1223_vm10 = vcmp.eq.f32.partialorder %v3409_v20, %v3949_v8  ;;  %v1924_v29 = vmin.f32 %v1922_v13, %v1923_v22  ;;  %v3987_v36 = vadd.f32 %v1257_v49, %v1256_v5 }
 0x203   : > { %v1238_v41 = vsel %vm1222_vm9, %v3492_v21, 0.0  ;;  %v1239_v53 = vsel %vm1223_vm10, %v3519_v19, 0.0  ;;  %v2073_v0 = vmax.f32 %v2071_v33, %v2072_v11  ;;  %v3982_v19 = vpop.permute.xlu1 %1597  ;;  %v2516_v33 = vrot.slane %v2515_v18, 1 }
 0x204   : > { %v1261_v6 = vsel %vm5526_vm6, %v1238_v41, 0.0  ;;  %v1262_v23 = vsel %vm5526_vm6, %v1239_v53, 0.0  ;;  %v1461_v41 = vsel %vm1445_vm5, %v3456_v58, 0.0  ;;  %v1925_v53 = vrot.slane %v1924_v29, 1 }
 0x205   : > { %v3974_v39 = vadd.f32 %v1262_v23, %v1261_v6  ;;  %v2074_v54 = vrot.slane %v2073_v0, 1  ;;  %v3985_v23 = vadd.f32 %v1540_v59, %v1539_v51  ;;  %v1477_v58 = vsel %vm5526_vm6, %v1461_v41, 0.0  ;;  %v1592_v51 = vpop.permute.xlu0 %1591 }
 0x206   : > { %v1926_v38 = vmin.f32 %v1924_v29, %v1925_v53  ;;  %v601_v13 = vadd.f32 %v558_v56, %v3216_v57  ;;  %v4002_v11 = vmax.f32 %v622_v42, 0.0  ;;  %v1636_v22 = vadd.f32 %v3918_v61, %v3240_v3 }
 0x207   : > { %5593 = vst [vmem:[#allocation13_spill] sm:$0xff] %v3985_v23  ;;  %v2075_v32 = vmax.f32 %v2073_v0, %v2074_v54  ;;  %v4014_v29 = vpop.permute.xlu1 %1696  ;;  %v1429_v42 = vrot.slane %v3894_v35, 4  ;;  %v624_v53 = vadd.f32 %v3158_v17, %v604_v27  ;;  %v2517_v4 = vmin.f32 %v2515_v18, %v2516_v33  ;;  %v5737_v23 = vld [vmem:[#allocation4_spill] sm:$0xff] }
 0x208   : > { %vm1983_vm13 = vcmp.eq.f32.partialorder %v3407_v14, %v1926_v38  ;;  %vm1984_vm8 = vcmp.eq.f32.partialorder %v3409_v20, %v1926_v38  ;;  %v1735_v41 = vadd.f32 %v3938_v1, %v1636_v22  ;;  %v621_v54 = vadd.f32 %v3158_v17, %v601_v13 }
 0x209   : > { %vm2097_vm14 = vcmp.eq.f32.partialorder %v3928_v12, %v2075_v32  ;;  %vm2098_vm3 = vcmp.eq.f32.partialorder %v3931_v48, %v2075_v32  ;;  %v4009_v59 = vsel %vm1983_vm13, -inf, %v3838_v15  ;;  %v4012_v0 = vsel %vm1984_vm8, -inf, %v3832_v10  ;;  %v1691_v18 = vpop.permute.xlu0 %1690 }
 0x20a   : > { %v2113_v7 = vsel %vm2097_vm14, %v3407_v14, 16.0  ;;  %v2114_v5 = vsel %vm2098_vm3, %v3409_v20, 16.0  ;;  %v2022_v3 = vsel %vm5596_vm12, %v4009_v59, -inf  ;;  %v2023_v61 = vsel %vm5597_vm0, %v4012_v0, -inf  ;;  %vm5602_vm3 = vmmov %vm5598_vm4 }
 0x20b   : > { %v2171_v46 = vsel %vm5590_vm7, %v2113_v7, inf  ;;  %v2172_v49 = vsel %vm5595_vm15, %v2114_v5, inf  ;;  %v4025_v32 = vadd.f32 %v1477_v58, %v1476_v30  ;;  %v4027_v38 = vadd.f32 %v2394_v31, %v2393_v63  ;;  %v572_v27 = vpop.permute.xlu1 %571 }
 0x20c   : > { %v2173_v56 = vmin.f32 %v2171_v46, %v2172_v49  ;;  %v2024_v5 = vmax.f32 %v2022_v3, %v2023_v61  ;;  %v4032_v46 = vsel %vm5598_vm4, %v4002_v11, -inf  ;;  %v4034_v49 = vmax.f32 %v621_v54, 0.0 }
 0x20d   : > { %v4036_v6 = vmax.f32 %v624_v53, 0.0  ;;  %v4039_v1 = vmin.f32 %v3894_v35, %v1429_v42  ;;  %vm5600_vm5 = vcmp.lt.f32.partialorder %v3407_v14, 15.0  ;;  %v1759_v31 = vadd.f32 %v3394_v55, %v1735_v41 }
 0x20e   : > { %v2174_v7 = vrot.slane %v2173_v56, 4  ;;  %v2025_v30 = vrot.slane %v2024_v5, 4  ;;  %v4044_v63 = vsel %vm5600_vm5, %v3990_v25, -inf  ;;  %vm5601_vm14 = vmmov %vm5600_vm5  ;;  %v1635_v33 = vadd.f32 %v1592_v51, %v3216_v57 }
 0x20f   : > { %5599 = vst [vmem:[#allocation15_spill] sm:$0xff] %v4036_v6  ;;  %v4050_v58 = vsel %vm5601_vm14, %v4034_v49, -inf  ;;  %v4055_v35 = vsel %vm5602_vm3, %v4036_v6, -inf  ;;  %vm2581_vm13 = vcmp.eq.f32.partialorder %v3407_v14, %v2517_v4  ;;  %vm2249_vm8 = vcmp.gt.f32.partialorder %v3622_v9, -inf }
 0x210   : > { %v2175_v13 = vmin.f32 %v2173_v56, %v2174_v7  ;;  %v2026_v42 = vmax.f32 %v2024_v5, %v2025_v30  ;;  %v687_v56 = vsel %vm5526_vm6, %v4032_v46, -inf  ;;  %v686_v3 = vsel %vm5526_vm6, %v4050_v58, -inf }
 0x211   : > { %v688_v61 = vmax.f32 %v686_v3, %v687_v56  ;;  %v696_v41 = vsel %vm5526_vm6, %v4055_v35, -inf  ;;  %v1734_v54 = vadd.f32 %v1691_v18, %v1635_v33  ;;  %v695_v51 = vsel %vm5526_vm6, %v4044_v63, -inf }
 0x212   : > { %v2176_v22 = vrot.slane %v2175_v13, 2  ;;  %v2027_v57 = vrot.slane %v2026_v42, 2  ;;  %v608_v7 = vadd.f32 %v3298_v44, %v572_v27  ;;  %vm2582_vm7 = vcmp.eq.f32.partialorder %v3409_v20, %v2517_v4 }
 0x213   : > { %vm2250_vm15 = vcmp.gt.f32.partialorder %v3607_v16, -inf  ;;  %v4071_v5 = vmax.f32 %v1759_v31, 0.0  ;;  %v689_v30 = vrot.slane %v688_v61, 4  ;;  %v697_v56 = vmax.f32 %v695_v51, %v696_v41 }
 0x214   : > { %v2177_v53 = vmin.f32 %v2175_v13, %v2176_v22  ;;  %v1479_v3 = vrot.slane %v4025_v32, 4  ;;  %v4075_v18 = vsel %vm2581_vm13, %v3484_v45, 0.0  ;;  %v2028_v33 = vmax.f32 %v2026_v42, %v2027_v57 }
 0x215   : > { %5603 = vst [vmem:[#allocation16_spill] sm:$0xff] %v4071_v5  ;;  %v1637_v22 = vadd.f32 %v3208_v52, %v3935_v26  ;;  %v690_v6 = vmax.f32 %v688_v61, %v689_v30  ;;  %v698_v27 = vrot.slane %v697_v56, 4  ;;  %v1758_v4 = vadd.f32 %v3394_v55, %v1734_v54 }
 0x216   : > { %v2178_v13 = vrot.slane %v2177_v53, 1  ;;  %v4081_v44 = vsel %vm2582_vm7, %v3458_v60, 0.0  ;;  %v2029_v25 = vrot.slane %v2028_v33, 1  ;;  %v4084_v41 = vadd.f32 %v3158_v17, %v608_v7 }
 0x217   : > { %v1431_v45 = vrot.slane %v4039_v1, 2  ;;  %v1736_v51 = vadd.f32 %v3955_v47, %v1637_v22  ;;  %vm5604_vm12 = vcmp.lt.f32.partialorder %v3409_v20, 12.0  ;;  %v691_v26 = vrot.slane %v690_v6, 2 }
 0x218   : > { %v2179_v31 = vmin.f32 %v2177_v53, %v2178_v13  ;;  %v4091_v52 = vsel %vm5604_vm12, %v4071_v5, -inf  ;;  %v2030_v60 = vmax.f32 %v2028_v33, %v2029_v25  ;;  %v699_v42 = vmax.f32 %v697_v56, %v698_v27 }
 0x219   : > { %v692_v53 = vmax.f32 %v690_v6, %v691_v26  ;;  %v4097_v57 = vmax.f32 %v1758_v4, 0.0  ;;  %v5606_v47 = vmov 0  ;;  %vm5609_vm12 = vcmask 195712  }
 0x21a   : > { %vm2201_vm0 = vcmp.eq.f32.partialorder %v3407_v14, %v2179_v31  ;;  %vm2202_vm4 = vcmp.eq.f32.partialorder %v3409_v20, %v2179_v31  ;;  %vm2087_vm3 = vcmp.eq.f32.partialorder %v4009_v59, %v2030_v60  ;;  %vm2088_vm13 = vcmp.eq.f32.partialorder %v4012_v0, %v2030_v60 }
 0x21b   : > { %v2217_v61 = vsel %vm2201_vm0, -inf, %v3928_v12  ;;  %v2218_v54 = vsel %vm2202_vm4, -inf, %v3931_v48  ;;  %5605 = vst [vmem:[#allocation17_spill] sm:$0xff] %v4097_v57  ;;  %v2103_v25 = vsel %vm2087_vm3, %v3407_v14, 16.0  ;;  %v2104_v12 = vsel %vm2088_vm13, %v3409_v20, 16.0 }
 0x21c   : > { %vm2233_vm5 = vcmp.eq.f32.partialorder %v2217_v61, -inf  ;;  %vm2234_vm14 = vcmp.eq.f32.partialorder %v2218_v54, -inf  ;;  %v1824_v48 = vsel %vm5609_vm12, %v4091_v52, -inf  ;;  %v693_v6 = vrot.slane %v692_v53, 1 }
 0x21d   : > { %vm4103_vm7 = vmand %vm2233_vm5, %vm2249_vm8  ;;  %v5610_v7 = vmov 0  ;;  %v700_v13 = vrot.slane %v699_v42, 2  ;;  %v1638_v27 = vadd.f32 %v3230_v62, %v3982_v19 }
 0x21e   : > { %v5607_v47 = vsel %vm4103_vm7, 4294967295, %v5606_v47  ;;  %vm4113_vm0 = vmand %vm2234_vm14, %vm2250_vm15  ;;  %v2281_v9 = vsel %vm4103_vm7, %v3407_v14, 16.0  ;;  %v694_v31 = vmax.f32 %v692_v53, %v693_v6  ;;  %vm5617_vm14 = vcmp.lt.f32.partialorder %v3407_v14, 12.0 }
 0x21f   : > { %5608 = vst [vmem:[#allocation18_spill] sm:$0xff] %v5607_v47  ;;  %v5611_v7 = vsel %vm4113_vm0, 4294967295, %v5610_v7  ;;  %vm5613_vm8 = vmmov %vm5609_vm12  ;;  %v2282_v33 = vsel %vm4113_vm0, %v3409_v20, 16.0  ;;  %v701_v26 = vmax.f32 %v699_v42, %v700_v13  ;;  %v4132_v60 = vsel %vm5617_vm14, %v4097_v57, -inf }
 0x220   : > { %5612 = vst [vmem:[#allocation19_spill] sm:$0xff] %v5611_v7  ;;  %v2126_v30 = vsel %vm5613_vm8, %v2103_v25, inf  ;;  %vm5614_vm4 = vmmov %vm5613_vm8  ;;  %vm744_vm13 = vcmp.eq.f32.partialorder %v4050_v58, %v694_v31  ;;  %vm745_vm12 = vcmp.eq.f32.partialorder %v4032_v46, %v694_v31  ;;  %v1760_v6 = vadd.f32 %v3394_v55, %v1736_v51 }
 0x221   : > { %v2127_v56 = vsel %vm5614_vm4, %v2104_v12, inf  ;;  %vm5615_vm5 = vmmov %vm5614_vm4  ;;  %v1737_v12 = vadd.f32 %v4014_v29, %v1638_v27  ;;  %v702_v62 = vrot.slane %v701_v26, 1  ;;  %v5645_v47 = vrot.slane %v3743_v2, 4 }
 0x222   : > { %v2339_v22 = vsel %vm5615_vm5, %v2281_v9, inf  ;;  %v2128_v16 = vmin.f32 %v2126_v30, %v2127_v56  ;;  %vm5616_vm15 = vmmov %vm5614_vm4  ;;  %v760_v9 = vsel %vm744_vm13, %v3407_v14, 16.0  ;;  %v761_v30 = vsel %vm745_vm12, %v3409_v20, 16.0 }
 0x223   : > { %v2340_v4 = vsel %vm5616_vm15, %v2282_v33, inf  ;;  %vm5618_vm3 = vmmov %vm5614_vm4  ;;  %v790_v56 = vsel %vm5526_vm6, %v760_v9, inf  ;;  %v703_v13 = vmax.f32 %v701_v26, %v702_v62  ;;  %v791_v51 = vsel %vm5526_vm6, %v761_v30, inf }
 0x224   : > { %v2341_v61 = vmin.f32 %v2339_v22, %v2340_v4  ;;  %v2129_v54 = vrot.slane %v2128_v16, 4  ;;  %v1823_v25 = vsel %vm5618_vm3, %v4132_v60, -inf  ;;  %vm4147_vm8 = vmxor %vm1222_vm9, %vm5523_vm1  ;;  %v792_v4 = vmin.f32 %v790_v56, %v791_v51 }
 0x225   : > { %v1825_v19 = vmax.f32 %v1823_v25, %v1824_v48  ;;  %vm4157_vm4 = vmxor %vm1223_vm10, %vm5523_vm1  ;;  %vm746_vm9 = vcmp.eq.f32.partialorder %v4044_v63, %v703_v13  ;;  %vm747_vm5 = vcmp.eq.f32.partialorder %v4055_v35, %v703_v13  ;;  %v2614_v56 = vsel %vm5618_vm3, %v4081_v44, 0.0 }
 0x226   : > { %v2342_v53 = vrot.slane %v2341_v61, 4  ;;  %v2130_v42 = vmin.f32 %v2128_v16, %v2129_v54  ;;  %v1761_v16 = vadd.f32 %v3394_v55, %v1737_v12  ;;  %v762_v54 = vsel %vm746_vm9, %v3407_v14, 16.0  ;;  %vm1342_vm10 = vmand %vm3902_vm11, %vm4147_vm8 }
 0x227   : > { %v1826_v33 = vrot.slane %v1825_v19, 4  ;;  %v763_v25 = vsel %vm747_vm5, %v3409_v20, 16.0  ;;  %v793_v8 = vrot.slane %v792_v4, 4  ;;  %v799_v12 = vsel %vm5526_vm6, %v762_v54, inf  ;;  %vm5623_vm15 = vmmov %vm5618_vm3 }
 0x228   : > { %v2343_v48 = vmin.f32 %v2341_v61, %v2342_v53  ;;  %v2131_v22 = vrot.slane %v2130_v42, 2  ;;  %v800_v62 = vsel %vm5526_vm6, %v763_v25, inf  ;;  %vm1343_vm14 = vmand %vm3906_vm2, %vm4157_vm4  ;;  %v4179_v13 = vmax.f32 %v1760_v6, 0.0 }
 0x229   : > { %v1827_v31 = vmax.f32 %v1825_v19, %v1826_v33  ;;  %v2613_v19 = vsel %vm5623_vm15, %v4075_v18, 0.0  ;;  %v801_v30 = vmin.f32 %v799_v12, %v800_v62  ;;  %v794_v33 = vmin.f32 %v792_v4, %v793_v8  ;;  %v5630_v12 = vld [vmem:[#allocation11_spill] sm:$0xff]  ;;  %vm5632_vm15 = vmmov %vm5618_vm3 }
 0x22a   : > { %v2344_v26 = vrot.slane %v2343_v48, 2  ;;  %v2132_v61 = vmin.f32 %v2130_v42, %v2131_v22  ;;  %5624 = vst [vmem:[#allocation20_spill] sm:$0xff] %v4179_v13  ;;  %vm2239_vm13 = vcmp.gt.f32.partialorder %v3838_v15, -inf  ;;  %v4182_v25 = vmax.f32 %v1761_v16, 0.0 }
 0x22b   : > { %v1828_v53 = vrot.slane %v1827_v31, 2  ;;  %v802_v18 = vrot.slane %v801_v30, 4  ;;  %v1358_v24 = vsel %vm1342_vm10, %v3407_v14, 16.0  ;;  %v1359_v44 = vsel %vm1343_vm14, %v3409_v20, 16.0  ;;  %vm5631_vm10 = vmmov %vm5618_vm3 }
 0x22c   : > { %v2345_v42 = vmin.f32 %v2343_v48, %v2344_v26  ;;  %v2133_v9 = vrot.slane %v2132_v61, 1  ;;  %5625 = vst [vmem:[#allocation21_spill] sm:$0xff] %v4182_v25  ;;  %vm2240_vm2 = vcmp.gt.f32.partialorder %v3832_v10, -inf  ;;  %v795_v6 = vrot.slane %v794_v33, 2 }
 0x22d   : > { %v1829_v22 = vmax.f32 %v1827_v31, %v1828_v53  ;;  %v803_v16 = vmin.f32 %v801_v30, %v802_v18  ;;  %vm5627_vm9 = vcmp.lt.f32.partialorder %v3407_v14, 12.0  ;;  %vm5628_vm5 = vcmp.lt.f32.partialorder %v3409_v20, 12.0 }
 0x22e   : > { %v2346_v51 = vrot.slane %v2345_v42, 1  ;;  %v2134_v54 = vmin.f32 %v2132_v61, %v2133_v9  ;;  %v4200_v50 = vsel %vm5627_vm9, %v4179_v13, -inf  ;;  %v796_v29 = vmin.f32 %v794_v33, %v795_v6  ;;  %vm5634_vm9 = vmmov %vm5631_vm10  ;;  %v5644_v13 = vld [vmem:[#allocation3_spill] sm:$0xff] }
 0x22f   : > { %v1830_v48 = vrot.slane %v1829_v22, 1  ;;  %v4210_v61 = vsel %vm5628_vm5, %v4182_v25, -inf  ;;  %v1381_v6 = vsel %vm5526_vm6, %v1358_v24, inf }
 0x230   : > { %v4192_v27 = vmin.f32 %v2345_v42, %v2346_v51  ;;  %vm2191_vm12 = vcmp.eq.f32.partialorder %v3407_v14, %v2134_v54  ;;  %vm2192_vm4 = vcmp.eq.f32.partialorder %v3409_v20, %v2134_v54  ;;  %v797_v53 = vrot.slane %v796_v29, 1 }
 0x231   : > { %v2207_v4 = vsel %vm2191_vm12, -inf, %v4009_v59  ;;  %v1831_v31 = vmax.f32 %v1829_v22, %v1830_v48  ;;  %v2208_v26 = vsel %vm2192_vm4, -inf, %v4012_v0  ;;  %v5629_v59 = vld [vmem:[#allocation12_spill] sm:$0xff]  ;;  %v804_v42 = vrot.slane %v803_v16, 2 }
 0x232   : > { %5626 = vst [vmem:[#allocation22_spill] sm:$0xff] %v4192_v27  ;;  %vm5522_vm11 = vcmp.eq.f32.partialorder %v3407_v14, %v4192_v27  ;;  %vm5521_vm8 = vcmp.eq.f32.partialorder %v3409_v20, %v4192_v27  ;;  %vm2223_vm14 = vcmp.eq.f32.partialorder %v2207_v4, -inf  ;;  %vm2224_vm12 = vcmp.eq.f32.partialorder %v2208_v26, -inf }
 0x233   : > { %v2385_v8 = vsel %vm5522_vm11, %v5629_v59, 0.0  ;;  %v2386_v62 = vsel %vm5521_vm8, %v5630_v12, 0.0  ;;  %vm1881_vm3 = vcmp.eq.f32.partialorder %v4132_v60, %v1831_v31  ;;  %v798_v33 = vmin.f32 %v796_v29, %v797_v53  ;;  %vm4233_vm5 = vmand %vm2223_vm14, %vm2239_vm13 }
 0x234   : > { %v2443_v9 = vsel %vm5631_vm10, %v2385_v8, 0.0  ;;  %v2444_v0 = vsel %vm5632_vm15, %v2386_v62, 0.0  ;;  %vm1882_vm4 = vcmp.eq.f32.partialorder %v4091_v52, %v1831_v31  ;;  %v2615_v22 = vadd.f32 %v2614_v56, %v2613_v19  ;;  %vm5637_vm10 = vmmov %vm5634_vm9 }
 0x235   : > { %v4223_v30 = vadd.f32 %v2444_v0, %v2443_v9  ;;  %v805_v51 = vmin.f32 %v803_v16, %v804_v42  ;;  %v1897_v54 = vsel %vm1881_vm3, %v3407_v14, 16.0  ;;  %v1833_v18 = vsel %vm5634_vm9, %v4210_v61, -inf  ;;  %vm4242_vm3 = vmand %vm2224_vm12, %vm2240_vm2  ;;  %v570_v42 = vpop.permute.xlu0 %569 }
 0x236   : > { %v1382_v48 = vsel %vm5526_vm6, %v1359_v44, inf  ;;  %v1832_v29 = vsel %vm5637_vm10, %v4200_v50, -inf  ;;  %vm848_vm15 = vcmp.eq.f32.partialorder %v3407_v14, %v798_v33  ;;  %v2271_v56 = vsel %vm4233_vm5, %v3407_v14, 16.0  ;;  %vm5640_vm14 = vmmov %vm5634_vm9 }
 0x237   : > { %5633 = vst [vmem:[#allocation23_spill] sm:$0xff] %v4223_v30  ;;  %vm849_vm13 = vcmp.eq.f32.partialorder %v3409_v20, %v798_v33  ;;  %v4251_v15 = vsel %vm848_vm15, -inf, %v4050_v58  ;;  %v1898_v24 = vsel %vm1882_vm4, %v3409_v20, 16.0  ;;  %v2272_v44 = vsel %vm4242_vm3, %v3409_v20, 16.0  ;;  %vm5641_vm2 = vmmov %vm5634_vm9 }
 0x238   : > { %v2294_v10 = vsel %vm5640_vm14, %v2271_v56, inf  ;;  %v1927_v16 = vsel %vm5641_vm2, %v1897_v54, inf  ;;  %v1834_v31 = vmax.f32 %v1832_v29, %v1833_v18  ;;  %vm5642_vm12 = vmmov %vm5641_vm2  ;;  %v4261_v8 = vsel %vm849_vm13, -inf, %v4032_v46 }
 0x239   : > { %v2295_v26 = vsel %vm5642_vm12, %v2272_v44, inf  ;;  %v894_v62 = vsel %vm5526_vm6, %v4251_v15, -inf  ;;  %v806_v53 = vrot.slane %v805_v51, 1  ;;  %v1480_v9 = vadd.f32 %v1479_v3, %v4025_v32  ;;  %vm5643_vm4 = vmmov %vm5641_vm2 }
 0x23a   : > { %v1383_v0 = vmin.f32 %v1381_v6, %v1382_v48  ;;  %v2296_v33 = vmin.f32 %v2294_v10, %v2295_v26  ;;  %v895_v54 = vsel %vm5526_vm6, %v4261_v8, -inf  ;;  %v1432_v18 = vmin.f32 %v4039_v1, %v1431_v45  ;;  %vm5651_vm12 = vmmov %vm5641_vm2 }
 0x23b   : > { %v896_v29 = vmax.f32 %v894_v62, %v895_v54  ;;  %v807_v56 = vmin.f32 %v805_v51, %v806_v53  ;;  %v1928_v44 = vsel %vm5643_vm4, %v1898_v24, inf  ;;  %v2616_v12 = vrot.slane %v2615_v22, 4 }
 0x23c   : > { %v2297_v59 = vrot.slane %v2296_v33, 4  ;;  %v1929_v25 = vmin.f32 %v1927_v16, %v1928_v44  ;;  %v607_v30 = vadd.f32 %v5644_v13, %v570_v42  ;;  %v1835_v32 = vrot.slane %v1834_v31, 4 }
 0x23d   : > { %v897_v5 = vrot.slane %v896_v29, 4  ;;  %vm850_vm9 = vcmp.eq.f32.partialorder %v3407_v14, %v807_v56  ;;  %vm851_vm10 = vcmp.eq.f32.partialorder %v3409_v20, %v807_v56  ;;  %v1384_v3 = vrot.slane %v1383_v0, 4 }
 0x23e   : > { %v2298_v6 = vmin.f32 %v2296_v33, %v2297_v59  ;;  %v4278_v48 = vsel %vm850_vm9, -inf, %v4044_v63  ;;  %v4281_v1 = vsel %vm851_vm10, -inf, %v4055_v35  ;;  %v1930_v10 = vrot.slane %v1929_v25, 4 }
 0x23f   : > { %v898_v45 = vmax.f32 %v896_v29, %v897_v5  ;;  %v903_v51 = vsel %vm5526_vm6, %v4278_v48, -inf  ;;  %v904_v24 = vsel %vm5526_vm6, %v4281_v1, -inf  ;;  %v2396_v16 = vrot.slane %v4027_v38, 1 }
 0x240   : > { %v1309_v26 = vrot.slane %v3888_v37, 4  ;;  %v2299_v62 = vrot.slane %v2298_v6, 2  ;;  %v905_v59 = vmax.f32 %v903_v51, %v904_v24  ;;  %v1931_v42 = vmin.f32 %v1929_v25, %v1930_v10 }
 0x241   : > { %v899_v53 = vrot.slane %v898_v45, 2  ;;  %v1836_v33 = vmax.f32 %v1834_v31, %v1835_v32  ;;  %v4290_v54 = vadd.f32 %v3158_v17, %v607_v30  ;;  %v1481_v5 = vrot.slane %v1480_v9, 2 }
 0x242   : > { %v1433_v29 = vrot.slane %v1432_v18, 1  ;;  %v2300_v56 = vmin.f32 %v2298_v6, %v2299_v62  ;;  %v906_v44 = vrot.slane %v905_v59, 4  ;;  %v2617_v57 = vadd.f32 %v2616_v12, %v2615_v22 }
 0x243   : > { %v1385_v55 = vmin.f32 %v1383_v0, %v1384_v3  ;;  %v900_v13 = vmax.f32 %v898_v45, %v899_v53  ;;  %v1932_v7 = vrot.slane %v1931_v42, 2  ;;  %v4295_v27 = vadd.f32 %v5645_v47, %v3743_v2 }
 0x244   : > { %v2301_v25 = vrot.slane %v2300_v56, 1  ;;  %v907_v31 = vmax.f32 %v905_v59, %v906_v44  ;;  %v5647_v30 = vrot.slane %v3987_v36, 1  ;;  %v1837_v12 = vrot.slane %v1836_v33, 2 }
 0x245   : > { %5646 = vst [vmem:[#allocation24_spill] sm:$0xff] %v4295_v27  ;;  %v901_v6 = vrot.slane %v900_v13, 1  ;;  %v1933_v24 = vmin.f32 %v1931_v42, %v1932_v7  ;;  %v4303_v22 = vadd.f32 %v1481_v5, %v1480_v9  ;;  %v4306_v0 = vadd.f32 %v2396_v16, %v4027_v38 }
 0x246   : > { %v4301_v32 = vadd.f32 %v5647_v30, %v3987_v36  ;;  %v4309_v2 = vadd.f32 %v1309_v26, %v3888_v37  ;;  %v2302_v47 = vmin.f32 %v2300_v56, %v2301_v25  ;;  %v2618_v3 = vrot.slane %v2617_v57, 2 }
 0x247   : > { %5649 = vst [vmem:[#allocation26_spill] sm:$0xff] %v4306_v0  ;;  %v1434_v45 = vmin.f32 %v1432_v18, %v1433_v29  ;;  %v1386_v10 = vrot.slane %v1385_v55, 2  ;;  %v902_v62 = vmax.f32 %v900_v13, %v901_v6  ;;  %v908_v36 = vrot.slane %v907_v31, 2 }
 0x248   : > { %5648 = vst [vmem:[#allocation25_spill] sm:$0xff] %v4301_v32  ;;  %5650 = vst [vmem:[#allocation27_spill] sm:$0xff] %v4309_v2  ;;  %vm2359_vm15 = vcmp.eq.f32.partialorder %v3407_v14, %v2302_v47  ;;  %vm2360_vm13 = vcmp.eq.f32.partialorder %v3409_v20, %v2302_v47  ;;  %v1934_v7 = vrot.slane %v1933_v24, 1  ;;  %v1838_v38 = vmax.f32 %v1836_v33, %v1837_v12 }
 0x249   : > { %v2375_v9 = vsel %vm2359_vm15, %v3817_v40, 0.0  ;;  %v2376_v37 = vsel %vm2360_vm13, %v3796_v28, 0.0  ;;  %vm952_vm14 = vcmp.eq.f32.partialorder %v4251_v15, %v902_v62  ;;  %vm953_vm4 = vcmp.eq.f32.partialorder %v4261_v8, %v902_v62 }
 0x24a   : > { %v2398_v18 = vsel %vm5641_vm2, %v2375_v9, 0.0  ;;  %v2399_v13 = vsel %vm5651_vm12, %v2376_v37, 0.0  ;;  %v968_v16 = vsel %vm952_vm14, %v3407_v14, 16.0  ;;  %vm1456_vm9 = vcmp.eq.f32.partialorder %v3407_v14, %v1434_v45  ;;  %vm4333_vm2 = vmxor %vm2359_vm15, %vm5523_vm1 }
 0x24b   : > { %v4325_v26 = vadd.f32 %v2399_v13, %v2398_v18  ;;  %v969_v59 = vsel %vm953_vm4, %v3409_v20, 16.0  ;;  %v998_v53 = vsel %vm5526_vm6, %v968_v16, inf  ;;  %vm1457_vm10 = vcmp.eq.f32.partialorder %v3409_v20, %v1434_v45  ;;  %vm4343_vm14 = vmxor %vm2360_vm13, %vm5523_vm1 }
 0x24c   : > { %v999_v33 = vsel %vm5526_vm6, %v969_v59, inf  ;;  %v909_v5 = vmax.f32 %v907_v31, %v908_v36  ;;  %v1935_v29 = vmin.f32 %v1933_v24, %v1934_v7  ;;  %v1483_v56 = vrot.slane %v4303_v22, 1  ;;  %vm2479_vm12 = vmand %vm4233_vm5, %vm4333_vm2 }
 0x24d   : > { %v1387_v25 = vmin.f32 %v1385_v55, %v1386_v10  ;;  %v1839_v6 = vrot.slane %v1838_v38, 1  ;;  %v1472_v12 = vsel %vm1456_vm9, %v3489_v34, 0.0  ;;  %v1000_v45 = vmin.f32 %v998_v53, %v999_v33  ;;  %vm2480_vm4 = vmand %vm4242_vm3, %vm4343_vm14 }
 0x24e   : > { %v910_v62 = vrot.slane %v909_v5, 1  ;;  %vm1985_vm15 = vcmp.eq.f32.partialorder %v3407_v14, %v1935_v29  ;;  %v4349_v31 = vadd.f32 %v2618_v3, %v2617_v57  ;;  %v1473_v24 = vsel %vm1457_vm10, %v3511_v43, 0.0 }
 0x24f   : > { %vm1986_vm13 = vcmp.eq.f32.partialorder %v3409_v20, %v1935_v29  ;;  %v4358_v55 = vsel %vm1985_vm15, -inf, %v4132_v60  ;;  %v1001_v34 = vrot.slane %v1000_v45, 4  ;;  %vm5656_vm9 = vcmask 195712  }
 0x250   : > { %v911_v57 = vmax.f32 %v909_v5, %v910_v62  ;;  %v4365_v47 = vsel %vm1986_vm13, -inf, %v4091_v52  ;;  %v2031_v43 = vsel %vm5656_vm9, %v4358_v55, -inf  ;;  %v1388_v3 = vrot.slane %v1387_v25, 1  ;;  %vm5657_vm10 = vmmov %vm5656_vm9 }
 0x251   : > { %v2032_v10 = vsel %vm5657_vm10, %v4365_v47, -inf  ;;  %v1840_v36 = vmax.f32 %v1838_v38, %v1839_v6  ;;  %v4372_v7 = vmax.f32 %v4084_v41, 0.0  ;;  %v1002_v9 = vmin.f32 %v1000_v45, %v1001_v34  ;;  %vm5659_vm2 = vmmov %vm5656_vm9 }
 0x252   : > { %vm954_vm15 = vcmp.eq.f32.partialorder %v4278_v48, %v911_v57  ;;  %vm955_vm3 = vcmp.eq.f32.partialorder %v4281_v1, %v911_v57  ;;  %v2033_v19 = vmax.f32 %v2031_v43, %v2032_v10  ;;  %v2495_v37 = vsel %vm2479_vm12, %v3407_v14, 16.0  ;;  %vm5660_vm12 = vmmov %vm5659_vm2 }
 0x253   : > { %v2496_v18 = vsel %vm2480_vm4, %v3409_v20, 16.0  ;;  %v970_v38 = vsel %vm954_vm15, %v3407_v14, 16.0  ;;  %v971_v41 = vsel %vm955_vm3, %v3409_v20, 16.0  ;;  %v1003_v13 = vrot.slane %v1002_v9, 2  ;;  %vm5661_vm4 = vmmov %vm5659_vm2 }
 0x254   : > { %v1007_v16 = vsel %vm5526_vm6, %v970_v38, inf  ;;  %v1008_v59 = vsel %vm5526_vm6, %v971_v41, inf  ;;  %v2034_v53 = vrot.slane %v2033_v19, 4  ;;  %vm1883_vm14 = vcmp.eq.f32.partialorder %v4200_v50, %v1840_v36  ;;  %vm5662_vm9 = vmmov %vm5659_vm2 }
 0x255   : > { %v1009_v33 = vmin.f32 %v1007_v16, %v1008_v59  ;;  %vm5658_vm13 = vcmp.lt.f32.partialorder %v3409_v20, 15.0  ;;  %v4394_v42 = vmax.f32 %v4290_v54, 0.0  ;;  %v1004_v5 = vmin.f32 %v1002_v9, %v1003_v13 }
 0x256   : > { %v4391_v4 = vsel %vm5658_vm13, %v4372_v7, -inf  ;;  %v2035_v29 = vmax.f32 %v2033_v19, %v2034_v53  ;;  %vm1884_vm5 = vcmp.eq.f32.partialorder %v4210_v61, %v1840_v36  ;;  %v1899_v30 = vsel %vm1883_vm14, %v3407_v14, 16.0 }
 0x257   : > { %v2518_v6 = vsel %vm5659_vm2, %v2495_v37, inf  ;;  %v2519_v45 = vsel %vm5660_vm12, %v2496_v18, inf  ;;  %v1010_v62 = vrot.slane %v1009_v33, 4  ;;  %v1900_v34 = vsel %vm1884_vm5, %v3409_v20, 16.0 }
 0x258   : > { %v1005_v57 = vrot.slane %v1004_v5, 1  ;;  %v2036_v43 = vrot.slane %v2035_v29, 2  ;;  %v1936_v10 = vsel %vm5661_vm4, %v1899_v30, inf  ;;  %v1937_v54 = vsel %vm5662_vm9, %v1900_v34, inf }
 0x259   : > { %v1389_v38 = vmin.f32 %v1387_v25, %v1388_v3  ;;  %v1011_v9 = vmin.f32 %v1009_v33, %v1010_v62  ;;  %v1938_v19 = vmin.f32 %v1936_v10, %v1937_v54  ;;  %vm5663_vm10 = vcmp.lt.f32.partialorder %v3407_v14, 15.0 }
 0x25a   : > { %v4406_v36 = vsel %vm5663_vm10, %v4394_v42, -inf  ;;  %v1530_v37 = vsel %vm5526_vm6, %v1472_v12, 0.0  ;;  %v1531_v18 = vsel %vm5526_vm6, %v1473_v24, 0.0  ;;  %v1006_v41 = vmin.f32 %v1004_v5, %v1005_v57 }
 0x25b   : > { %v2037_v13 = vmax.f32 %v2035_v29, %v2036_v43  ;;  %v2520_v16 = vmin.f32 %v2518_v6, %v2519_v45  ;;  %v1012_v59 = vrot.slane %v1011_v9, 2  ;;  %v714_v53 = vsel %vm5526_vm6, %v4391_v4, -inf }
 0x25c   : > { %v713_v25 = vsel %vm5526_vm6, %v4406_v36, -inf  ;;  %vm1056_vm15 = vcmp.eq.f32.partialorder %v3407_v14, %v1006_v41  ;;  %vm1057_vm3 = vcmp.eq.f32.partialorder %v3409_v20, %v1006_v41  ;;  %v1939_v33 = vrot.slane %v1938_v19, 4  ;;  %v5669_v41 = vld [vmem:[#allocation10_spill] sm:$0xff] }
 0x25d   : > { %v2038_v3 = vrot.slane %v2037_v13, 1  ;;  %v4416_v30 = vadd.f32 %v1531_v18, %v1530_v37  ;;  %vm1446_vm14 = vcmp.eq.f32.partialorder %v3407_v14, %v1389_v38  ;;  %v1072_v12 = vsel %vm1056_vm15, -inf, %v4251_v15 }
 0x25e   : > { %v1073_v24 = vsel %vm1057_vm3, -inf, %v4261_v8  ;;  %vm1088_vm13 = vcmp.eq.f32.partialorder %v1072_v12, -inf  ;;  %vm1104_vm2 = vcmp.gt.f32.partialorder %v4050_v58, -inf  ;;  %v715_v5 = vmax.f32 %v713_v25, %v714_v53 }
 0x25f   : > { %vm1089_vm5 = vcmp.eq.f32.partialorder %v1073_v24, -inf  ;;  %vm1447_vm12 = vcmp.eq.f32.partialorder %v3409_v20, %v1389_v38  ;;  %vm1106_vm4 = vcmp.gt.f32.partialorder %v4044_v63, -inf  ;;  %vm1105_vm9 = vcmp.gt.f32.partialorder %v4032_v46, -inf  ;;  %vm4425_vm10 = vmand %vm1088_vm13, %vm1104_vm2 }
 0x260   : > { %v1013_v6 = vmin.f32 %v1011_v9, %v1012_v59  ;;  %v2039_v45 = vmax.f32 %v2037_v13, %v2038_v3  ;;  %v1462_v15 = vsel %vm1446_vm14, %v3492_v21, 0.0  ;;  %v2521_v8 = vrot.slane %v2520_v16, 4  ;;  %vm4430_vm15 = vmand %vm1089_vm5, %vm1105_vm9 }
 0x261   : > { %v1136_v58 = vsel %vm4425_vm10, %v3407_v14, 16.0  ;;  %vm1107_vm3 = vcmp.gt.f32.partialorder %v4055_v35, -inf  ;;  %v1940_v46 = vmin.f32 %v1938_v19, %v1939_v33  ;;  %v1137_v34 = vsel %vm4430_vm15, %v3409_v20, 16.0 }
 0x262   : > { %v1166_v57 = vsel %vm5526_vm6, %v1136_v58, inf  ;;  %v1014_v43 = vrot.slane %v1013_v6, 1  ;;  %vm2089_vm14 = vcmp.eq.f32.partialorder %v4358_v55, %v2039_v45  ;;  %v1167_v21 = vsel %vm5526_vm6, %v1137_v34, inf }
 0x263   : > { %vm2090_vm13 = vcmp.eq.f32.partialorder %v4365_v47, %v2039_v45  ;;  %v2105_v10 = vsel %vm2089_vm14, %v3407_v14, 16.0  ;;  %v716_v54 = vrot.slane %v715_v5, 4  ;;  %v1168_v9 = vmin.f32 %v1166_v57, %v1167_v21 }
 0x264   : > { %v1015_v37 = vmin.f32 %v1013_v6, %v1014_v43  ;;  %v2106_v19 = vsel %vm2090_vm13, %v3409_v20, 16.0  ;;  %vm5668_vm5 = vcmask 195712   ;;  %v1463_v13 = vsel %vm1447_vm12, %v5669_v41, 0.0 }
 0x265   : > { %v2135_v18 = vsel %vm5668_vm5, %v2105_v10, inf  ;;  %v2522_v59 = vmin.f32 %v2520_v16, %v2521_v8  ;;  %vm5670_vm2 = vmmov %vm5668_vm5  ;;  %v1941_v25 = vrot.slane %v1940_v46, 2  ;;  %v1169_v3 = vrot.slane %v1168_v9, 4 }
 0x266   : > { %v2136_v53 = vsel %vm5670_vm2, %v2106_v19, inf  ;;  %vm1058_vm9 = vcmp.eq.f32.partialorder %v3407_v14, %v1015_v37  ;;  %vm1059_vm14 = vcmp.eq.f32.partialorder %v3409_v20, %v1015_v37  ;;  %v717_v45 = vmax.f32 %v715_v5, %v716_v54 }
 0x267   : > { %v2137_v33 = vmin.f32 %v2135_v18, %v2136_v53  ;;  %v1074_v12 = vsel %vm1058_vm9, -inf, %v4278_v48  ;;  %v1075_v24 = vsel %vm1059_vm14, -inf, %v4281_v1  ;;  %v1942_v6 = vmin.f32 %v1940_v46, %v1941_v25 }
 0x268   : > { %v1170_v58 = vmin.f32 %v1168_v9, %v1169_v3  ;;  %vm1090_vm13 = vcmp.eq.f32.partialorder %v1074_v12, -inf  ;;  %vm1091_vm5 = vcmp.eq.f32.partialorder %v1075_v24, -inf  ;;  %v1485_v16 = vsel %vm5526_vm6, %v1462_v15, 0.0 }
 0x269   : > { %v2138_v38 = vrot.slane %v2137_v33, 4  ;;  %v1486_v8 = vsel %vm5526_vm6, %v1463_v13, 0.0  ;;  %v2523_v34 = vrot.slane %v2522_v59, 2  ;;  %vm4460_vm12 = vmand %vm1090_vm13, %vm1106_vm4  ;;  %v1943_v48 = vrot.slane %v1942_v6, 1 }
 0x26a   : > { %v1264_v1 = vrot.slane %v3974_v39, 4  ;;  %v1171_v46 = vrot.slane %v1170_v58, 2  ;;  %vm4467_vm2 = vmand %vm1091_vm5, %vm1107_vm3  ;;  %v1138_v15 = vsel %vm4460_vm12, %v3407_v14, 16.0  ;;  %v718_v54 = vrot.slane %v717_v45, 2 }
 0x26b   : > { %v2139_v43 = vmin.f32 %v2137_v33, %v2138_v38  ;;  %v1139_v63 = vsel %vm4467_vm2, %v3409_v20, 16.0  ;;  %v1175_v21 = vsel %vm5526_vm6, %v1138_v15, inf  ;;  %v1944_v10 = vmin.f32 %v1942_v6, %v1943_v48 }
 0x26c   : > { %v1487_v9 = vadd.f32 %v1486_v8, %v1485_v16  ;;  %v1172_v37 = vmin.f32 %v1170_v58, %v1171_v46  ;;  %v1176_v35 = vsel %vm5526_vm6, %v1139_v63, inf  ;;  %v2524_v18 = vmin.f32 %v2522_v59, %v2523_v34 }
 0x26d   : > { %v2140_v19 = vrot.slane %v2139_v43, 2  ;;  %v1177_v41 = vmin.f32 %v1175_v21, %v1176_v35  ;;  %vm1987_vm4 = vcmp.eq.f32.partialorder %v3407_v14, %v1944_v10  ;;  %vm1988_vm3 = vcmp.eq.f32.partialorder %v3409_v20, %v1944_v10 }
 0x26e   : > { %v1173_v13 = vrot.slane %v1172_v37, 1  ;;  %v4482_v25 = vsel %vm1987_vm4, -inf, %v4200_v50  ;;  %v4485_v3 = vsel %vm1988_vm3, -inf, %v4210_v61  ;;  %vm5675_vm9 = vcmask 195712  }
 0x26f   : > { %v2141_v53 = vmin.f32 %v2139_v43, %v2140_v19  ;;  %v1178_v33 = vrot.slane %v1177_v41, 4  ;;  %v2040_v12 = vsel %vm5675_vm9, %v4482_v25, -inf  ;;  %vm5676_vm14 = vmmov %vm5675_vm9  ;;  %v719_v24 = vmax.f32 %v717_v45, %v718_v54 }
 0x270   : > { %v2041_v59 = vsel %vm5676_vm14, %v4485_v3, -inf  ;;  %v1174_v6 = vmin.f32 %v1172_v37, %v1173_v13  ;;  %v1488_v16 = vrot.slane %v1487_v9, 4  ;;  %v2525_v8 = vrot.slane %v2524_v18, 1 }
 0x271   : > { %v2142_v58 = vrot.slane %v2141_v53, 1  ;;  %v2042_v38 = vmax.f32 %v2040_v12, %v2041_v59  ;;  %v1179_v34 = vmin.f32 %v1177_v41, %v1178_v33  ;;  %vm2241_vm5 = vcmp.gt.f32.partialorder %v4132_v60, -inf }
 0x272   : > { %vm1224_vm4 = vcmp.eq.f32.partialorder %v3407_v14, %v1174_v6  ;;  %vm1225_vm3 = vcmp.eq.f32.partialorder %v3409_v20, %v1174_v6  ;;  %v720_v63 = vrot.slane %v719_v24, 1 }
 0x273   : > { %v2143_v48 = vmin.f32 %v2141_v53, %v2142_v58  ;;  %v2043_v46 = vrot.slane %v2042_v38, 4  ;;  %v1240_v15 = vsel %vm1224_vm4, %v4034_v49, 0.0  ;;  %v1241_v45 = vsel %vm1225_vm3, %v4002_v11, 0.0  ;;  %vm1328_vm9 = vmxor %vm1224_vm4, %vm5523_vm1 }
 0x274   : > { %v1180_v43 = vrot.slane %v1179_v34, 2  ;;  %v1270_v21 = vsel %vm5526_vm6, %v1240_v15, 0.0  ;;  %v1271_v10 = vsel %vm5526_vm6, %v1241_v45, 0.0  ;;  %vm1329_vm14 = vmxor %vm1225_vm3, %vm5523_vm1  ;;  %v1489_v58 = vadd.f32 %v1488_v16, %v1487_v9  ;;  %v5685_v9 = vld [vmem:[#allocation22_spill] sm:$0xff] }
 0x275   : > { %vm2193_vm8 = vcmp.eq.f32.partialorder %v3407_v14, %v2143_v48  ;;  %vm2194_vm11 = vcmp.eq.f32.partialorder %v3409_v20, %v2143_v48  ;;  %v4503_v54 = vadd.f32 %v1271_v10, %v1270_v21  ;;  %vm1344_vm13 = vmand %vm4425_vm10, %vm1328_vm9  ;;  %v2044_v13 = vmax.f32 %v2042_v38, %v2043_v46 }
 0x276   : > { %v1181_v37 = vmin.f32 %v1179_v34, %v1180_v43  ;;  %v2209_v35 = vsel %vm2193_vm8, -inf, %v4358_v55  ;;  %v2210_v19 = vsel %vm2194_vm11, -inf, %v4365_v47  ;;  %vm1345_vm4 = vmand %vm4430_vm15, %vm1329_vm14  ;;  %v1360_v41 = vsel %vm1344_vm13, %v3407_v14, 16.0  ;;  %v5690_v43 = vld [vmem:[#allocation15_spill] sm:$0xff] }
 0x277   : > { %vm2225_vm3 = vcmp.eq.f32.partialorder %v2209_v35, -inf  ;;  %vm2226_vm1 = vcmp.eq.f32.partialorder %v2210_v19, -inf  ;;  %v1361_v53 = vsel %vm1345_vm4, %v3409_v20, 16.0  ;;  %v1390_v33 = vsel %vm5526_vm6, %v1360_v41, inf  ;;  %v1606_v19 = vpop.permute.xlu1 %1605 }
 0x278   : > { %v1182_v12 = vrot.slane %v1181_v37, 1  ;;  %vm4516_vm10 = vmand %vm2225_vm3, %vm2241_vm5  ;;  %v721_v55 = vmax.f32 %v719_v24, %v720_v63  ;;  %v2620_v47 = vrot.slane %v4349_v31, 1  ;;  %v1391_v62 = vsel %vm5526_vm6, %v1361_v53, inf }
 0x279   : > { %vm5679_vm11 = vcmp.gt.f32.partialorder %v4091_v52, -inf  ;;  %v2273_v6 = vsel %vm4516_vm10, %v3407_v14, 16.0  ;;  %v2045_v60 = vrot.slane %v2044_v13, 2  ;;  %v4531_v38 = vmin.f32 %v1390_v33, %v1391_v62 }
 0x27a   : > { %vm4524_vm8 = vmand %vm2226_vm1, %vm5679_vm11  ;;  %v1183_v34 = vmin.f32 %v1181_v37, %v1182_v12  ;;  %v2526_v48 = vmin.f32 %v2524_v18, %v2525_v8  ;;  %vm5682_vm15 = vcmask 195712   ;;  %v1265_v45 = vadd.f32 %v1264_v1, %v3974_v39  ;;  %v5689_v18 = vld [vmem:[#allocation14_spill] sm:$0xff] }
 0x27b   : > { %v2274_v24 = vsel %vm4524_vm8, %v3409_v20, 16.0  ;;  %v2303_v52 = vsel %vm5682_vm15, %v2273_v6, inf  ;;  %vm5683_vm1 = vmmov %vm5682_vm15  ;;  %v2046_v15 = vmax.f32 %v2044_v13, %v2045_v60  ;;  %vm5684_vm13 = vmmov 1   ;;  %v1604_v60 = vpop.permute.xlu0 %1603 }
 0x27c   : > { %v2304_v46 = vsel %vm5683_vm1, %v2274_v24, inf  ;;  %vm5686_vm5 = vcmp.eq.f32.partialorder %v3407_v14, %v5685_v9  ;;  %vm1226_vm14 = vcmp.eq.f32.partialorder %v3407_v14, %v1183_v34  ;;  %vm5525_vm4 = vcmp.eq.f32.partialorder %v3409_v20, %v1183_v34 }
 0x27d   : > { %vm4545_vm9 = vmxor %vm5686_vm5, %vm5684_vm13  ;;  %vm750_vm3 = vcmp.eq.f32.partialorder %v4406_v36, %v721_v55  ;;  %v1242_v8 = vsel %vm1226_vm14, %v5689_v18, 0.0  ;;  %v1243_v39 = vsel %vm5525_vm4, %v5690_v43, 0.0  ;;  %v2305_v1 = vmin.f32 %v2303_v52, %v2304_v46 }
 0x27e   : > { %v2047_v63 = vrot.slane %v2046_v15, 1  ;;  %v1490_v21 = vrot.slane %v1489_v58, 2  ;;  %vm5691_vm11 = vcmp.eq.f32.partialorder %v3409_v20, %v5685_v9  ;;  %v1279_v37 = vsel %vm5526_vm6, %v1242_v8, 0.0  ;;  %vm2489_vm5 = vmand %vm4103_vm7, %vm4545_vm9 }
 0x27f   : > { %vm4562_vm15 = vmxor %vm5691_vm11, %vm5684_vm13  ;;  %v1280_v35 = vsel %vm5526_vm6, %v1243_v39, 0.0  ;;  %vm751_vm1 = vcmp.eq.f32.partialorder %v4391_v4, %v721_v55  ;;  %vm2583_vm4 = vcmp.eq.f32.partialorder %v3407_v14, %v2526_v48  ;;  %v2306_v53 = vrot.slane %v2305_v1, 4  ;;  %v1705_v46 = vpop.permute.xlu0 %1704 }
 0x280   : > { %v4574_v13 = vadd.f32 %v1280_v35, %v1279_v37  ;;  %v2048_v33 = vmax.f32 %v2046_v15, %v2047_v63  ;;  %v4579_v12 = vadd.f32 %v1483_v56, %v4303_v22  ;;  %v1533_v62 = vrot.slane %v4416_v30, 4  ;;  %vm2490_vm6 = vmand %vm4113_vm0, %vm4562_vm15  ;;  %v5705_v37 = vld [vmem:[#allocation3_spill] sm:$0xff] }
 0x281   : > { %vm2584_vm11 = vcmp.eq.f32.partialorder %v3409_v20, %v2526_v48  ;;  %v766_v6 = vsel %vm750_vm3, %v3407_v14, 16.0  ;;  %v4587_v24 = vadd.f32 %v2620_v47, %v4349_v31  ;;  %v1266_v52 = vrot.slane %v1265_v45, 2  ;;  %vm4610_vm0 = vmxor %vm1226_vm14, %vm5684_vm13 }
 0x282   : > { %v2307_v22 = vmin.f32 %v2305_v1, %v2306_v53  ;;  %v767_v56 = vsel %vm751_vm1, %v3409_v20, 16.0  ;;  %v4596_v15 = vadd.f32 %v1490_v21, %v1489_v58  ;;  %v2505_v31 = vsel %vm2489_vm5, %v3407_v14, 16.0  ;;  %v1703_v1 = vpop.permute.xlu1 %1702  ;;  %vm1346_vm1 = vmand %vm4460_vm12, %vm4610_vm0  ;;  %v5704_v21 = vld [vmem:[#allocation5_spill] sm:$0xff] }
 0x283   : > { %v2599_v47 = vsel %vm2583_vm4, %v3817_v40, 0.0  ;;  %vm2091_vm3 = vcmp.eq.f32.partialorder %v4482_v25, %v2048_v33  ;;  %v2600_v55 = vsel %vm2584_vm11, %v3796_v28, 0.0  ;;  %vm5698_vm15 = vcmp.eq.f32.partialorder %v3409_v20, %v1183_v34 }
 0x284   : > { %vm4619_vm7 = vmxor %vm5698_vm15, %vm5684_vm13  ;;  %v2308_v48 = vrot.slane %v2307_v22, 2  ;;  %vm2092_vm9 = vcmp.eq.f32.partialorder %v4485_v3, %v2048_v33  ;;  %vm5701_vm4 = vcmask 64512   ;;  %v2506_v16 = vsel %vm2490_vm6, %v3409_v20, 16.0 }
 0x285   : > { %v817_v40 = vsel %vm5701_vm4, %v766_v6, inf  ;;  %v2107_v8 = vsel %vm2091_vm3, %v3407_v14, 16.0  ;;  %v2108_v39 = vsel %vm2092_vm9, %v3409_v20, 16.0  ;;  %vm5702_vm14 = vmmov %vm5701_vm4  ;;  %vm5703_vm5 = vcmask 195712  }
 0x286   : > { %v818_v28 = vsel %vm5702_vm14, %v767_v56, inf  ;;  %v2309_v34 = vmin.f32 %v2307_v22, %v2308_v48  ;;  %v2144_v63 = vsel %vm5703_vm5, %v2107_v8, inf  ;;  %v1642_v10 = vadd.f32 %v5704_v21, %v1606_v19  ;;  %vm5706_vm6 = vmmov %vm5703_vm5  ;;  %v5712_v21 = vld [vmem:[#allocation7_spill] sm:$0xff] }
 0x287   : > { %v1641_v35 = vadd.f32 %v5705_v37, %v1604_v60  ;;  %v2622_v41 = vsel %vm5706_vm6, %v2599_v47, 0.0  ;;  %vm5707_vm11 = vmmov %vm5703_vm5  ;;  %v819_v6 = vmin.f32 %v817_v40, %v818_v28  ;;  %v1393_v22 = vrot.slane %v4531_v38, 4 }
 0x288   : > { %v2623_v53 = vsel %vm5707_vm11, %v2600_v55, 0.0  ;;  %vm1347_vm3 = vmand %vm4467_vm2, %vm4619_vm7  ;;  %v2310_v56 = vrot.slane %v2309_v34, 1  ;;  %v4644_v8 = vadd.f32 %v1266_v52, %v1265_v45  ;;  %v1492_v60 = vrot.slane %v4596_v15, 1 }
 0x289   : > { %vm5708_vm15 = vmmov %vm5703_vm5  ;;  %v1740_v19 = vadd.f32 %v1703_v1, %v1641_v35  ;;  %v1362_v5 = vsel %vm1346_vm1, %v3407_v14, 16.0  ;;  %v820_v47 = vrot.slane %v819_v6, 4  ;;  %v2624_v58 = vadd.f32 %v2623_v53, %v2622_v41  ;;  %v5715_v53 = vld [vmem:[#allocation16_spill] sm:$0xff] }
 0x28a   : > { %v2145_v33 = vsel %vm5708_vm15, %v2108_v39, inf  ;;  %vm5709_vm2 = vmmov %vm5703_vm5  ;;  %v1363_v40 = vsel %vm1347_vm3, %v3409_v20, 16.0  ;;  %v1741_v39 = vadd.f32 %v1705_v46, %v1642_v10  ;;  %v2401_v45 = vrot.slane %v4325_v26, 4 }
 0x28b   : > { %v2146_v48 = vmin.f32 %v2144_v63, %v2145_v33  ;;  %v2563_v55 = vsel %vm5709_vm2, %v2505_v31, inf  ;;  %vm5710_vm7 = vmmov %vm5709_vm2  ;;  %v2311_v52 = vmin.f32 %v2309_v34, %v2310_v56  ;;  %v1394_v63 = vmin.f32 %v4531_v38, %v1393_v22 }
 0x28c   : > { %v2564_v28 = vsel %vm5710_vm7, %v2506_v16, inf  ;;  %vm5711_vm9 = vmmov %vm5701_vm4  ;;  %v821_v9 = vmin.f32 %v819_v6, %v820_v47  ;;  %v1764_v37 = vadd.f32 %v5712_v21, %v1740_v19  ;;  %v2625_v10 = vrot.slane %v2624_v58, 4  ;;  %v5714_v16 = vld [vmem:[#allocation17_spill] sm:$0xff] }
 0x28d   : > { %v2147_v1 = vrot.slane %v2146_v48, 4  ;;  %v1399_v57 = vsel %vm5711_vm9, %v1362_v5, inf  ;;  %vm5713_vm12 = vmmov %vm5701_vm4  ;;  %vm2361_vm0 = vcmp.eq.f32.partialorder %v3407_v14, %v2311_v52  ;;  %vm2362_vm4 = vcmp.eq.f32.partialorder %v3409_v20, %v2311_v52 }
 0x28e   : > { %v1400_v35 = vsel %vm5713_vm12, %v1363_v40, inf  ;;  %v2377_v41 = vsel %vm2361_vm0, %v5714_v16, 0.0  ;;  %v2378_v34 = vsel %vm2362_vm4, %v5715_v53, 0.0  ;;  %vm2465_vm14 = vmxor %vm2361_vm0, %vm5684_vm13  ;;  %v1765_v38 = vadd.f32 %v5712_v21, %v1741_v39 }
 0x28f   : > { %v2148_v31 = vmin.f32 %v2146_v48, %v2147_v1  ;;  %vm5716_vm1 = vmmov %vm5709_vm2  ;;  %v822_v56 = vrot.slane %v821_v9, 2  ;;  %v2402_v48 = vadd.f32 %v2401_v45, %v4325_v26  ;;  %v1395_v19 = vrot.slane %v1394_v63, 2 }
 0x290   : > { %v2407_v33 = vsel %vm5716_vm1, %v2377_v41, 0.0  ;;  %vm5717_vm5 = vmmov %vm5716_vm1  ;;  %v1401_v5 = vmin.f32 %v1399_v57, %v1400_v35  ;;  %v4684_v1 = vmax.f32 %v1764_v37, 0.0  ;;  %v4689_v26 = vadd.f32 %v1533_v62, %v4416_v30 }
 0x291   : > { %v2408_v6 = vsel %vm5717_vm5, %v2378_v34, 0.0  ;;  %vm4670_vm6 = vmxor %vm2362_vm4, %vm5684_vm13  ;;  %v2149_v22 = vrot.slane %v2148_v31, 2  ;;  %v823_v52 = vmin.f32 %v821_v9, %v822_v56  ;;  %v2626_v29 = vadd.f32 %v2625_v10, %v2624_v58 }
 0x292   : > { %v4675_v47 = vadd.f32 %v2408_v6, %v2407_v33  ;;  %vm2481_vm11 = vmand %vm4516_vm10, %vm2465_vm14  ;;  %5720 = vst [vmem:[#allocation10_spill] sm:$0xff] %v4689_v26  ;;  %v4692_v57 = vmax.f32 %v1765_v38, 0.0  ;;  %v4695_v35 = vadd.f32 %v1492_v60, %v4596_v15  ;;  %v4697_v59 = vmin.f32 %v2563_v55, %v2564_v28  ;;  %v568_v60 = vpop.permute.xlu1 %567 }
 0x293   : > { %vm2482_vm3 = vmand %vm4524_vm8, %vm4670_vm6  ;;  %v2497_v40 = vsel %vm2481_vm11, %v3407_v14, 16.0  ;;  %v2150_v39 = vmin.f32 %v2148_v31, %v2149_v22  ;;  %vm2243_vm10 = vcmp.gt.f32.partialorder %v4200_v50, -inf  ;;  %v2403_v31 = vrot.slane %v2402_v48, 2 }
 0x294   : > { %v2498_v9 = vsel %vm2482_vm3, %v3409_v20, 16.0  ;;  %vm5721_vm8 = vmmov %vm5716_vm1  ;;  %v1396_v41 = vmin.f32 %v1394_v63, %v1395_v19  ;;  %v1402_v30 = vrot.slane %v1401_v5, 4  ;;  %vm2244_vm15 = vcmp.gt.f32.partialorder %v4210_v61, -inf }
 0x295   : > { %v2527_v37 = vsel %vm5721_vm8, %v2497_v40, inf  ;;  %vm5722_vm2 = vmmov %vm5716_vm1  ;;  %v2151_v58 = vrot.slane %v2150_v39, 1  ;;  %v824_v10 = vrot.slane %v823_v52, 1  ;;  %vm5723_vm7 = vcmp.lt.f32.partialorder %v3407_v14, 12.0 }
 0x296   : > { %v2528_v62 = vsel %vm5722_vm2, %v2498_v9, inf  ;;  %v4707_v15 = vsel %vm5723_vm7, %v4684_v1, -inf  ;;  %v2627_v55 = vrot.slane %v2626_v29, 2  ;;  %v1273_v28 = vrot.slane %v4503_v54, 4  ;;  %vm5726_vm12 = vmmov %vm5716_vm1 }
 0x297   : > { %v2529_v34 = vmin.f32 %v2527_v37, %v2528_v62  ;;  %vm5724_vm9 = vcmp.lt.f32.partialorder %v3409_v20, 12.0  ;;  %v2152_v46 = vmin.f32 %v2150_v39, %v2151_v58  ;;  %v825_v22 = vmin.f32 %v823_v52, %v824_v10  ;;  %vm5727_vm0 = vmmov %vm5716_vm1  ;;  %v566_v62 = vpop.permute.xlu0 %565 }
 0x298   : > { %v4713_v63 = vsel %vm5724_vm9, %v4692_v57, -inf  ;;  %v4717_v56 = vadd.f32 %v2403_v31, %v2402_v48  ;;  %v1397_v19 = vrot.slane %v1396_v41, 1  ;;  %v1850_v40 = vsel %vm5726_vm12, %v4707_v15, -inf  ;;  %vm5735_vm7 = vmmov %vm5727_vm0 }
 0x299   : > { %v1851_v9 = vsel %vm5727_vm0, %v4713_v63, -inf  ;;  %v1403_v37 = vmin.f32 %v1401_v5, %v1402_v30  ;;  %vm2195_vm4 = vcmp.eq.f32.partialorder %v3407_v14, %v2152_v46  ;;  %vm2196_vm14 = vcmp.eq.f32.partialorder %v3409_v20, %v2152_v46  ;;  %v1602_v5 = vpop.permute.xlu1 %1601 }
 0x29a   : > { %vm854_vm1 = vcmp.eq.f32.partialorder %v3407_v14, %v825_v22  ;;  %v2628_v44 = vadd.f32 %v2627_v55, %v2626_v29  ;;  %v1274_v39 = vadd.f32 %v1273_v28, %v4503_v54  ;;  %v2211_v48 = vsel %vm2195_vm4, -inf, %v4482_v25 }
 0x29b   : > { %v2212_v52 = vsel %vm2196_vm14, -inf, %v4485_v3  ;;  %vm2227_vm5 = vcmp.eq.f32.partialorder %v2211_v48, -inf  ;;  %vm855_vm11 = vcmp.eq.f32.partialorder %v3409_v20, %v825_v22  ;;  %v1852_v31 = vmax.f32 %v1850_v40, %v1851_v9  ;;  %v5730_v3 = vld [vmem:[#allocation6_spill] sm:$0xff] }
 0x29c   : > { %vm2228_vm6 = vcmp.eq.f32.partialorder %v2212_v52, -inf  ;;  %v1398_v30 = vmin.f32 %v1396_v41, %v1397_v19  ;;  %vm4732_vm3 = vmand %vm2227_vm5, %vm2243_vm10  ;;  %v4737_v29 = vsel %vm854_vm1, -inf, %v4406_v36  ;;  %v4740_v25 = vsel %vm855_vm11, -inf, %v4391_v4  ;;  %v1600_v52 = vpop.permute.xlu0 %1599 }
 0x29d   : > { %v606_v54 = vadd.f32 %v568_v60, %v5730_v3  ;;  %v1404_v10 = vrot.slane %v1403_v37, 2  ;;  %vm4745_vm8 = vmand %vm2228_vm6, %vm2244_vm15  ;;  %v2275_v50 = vsel %vm4732_vm3, %v3407_v14, 16.0  ;;  %vm5733_vm10 = vcmask 64512  }
 0x29e   : > { %v921_v41 = vsel %vm5733_vm10, %v4737_v29, -inf  ;;  %vm5734_vm2 = vmmov %vm5733_vm10  ;;  %v2530_v46 = vrot.slane %v2529_v34, 4  ;;  %v2276_v60 = vsel %vm4745_vm8, %v3409_v20, 16.0  ;;  %v2312_v61 = vsel %vm5735_vm7, %v2275_v50, inf  ;;  %v1699_v50 = vpop.permute.xlu1 %1698 }
 0x29f   : > { %v922_v28 = vsel %vm5734_vm2, %v4740_v25, -inf  ;;  %v2629_v19 = vrot.slane %v2628_v44, 1  ;;  %v1275_v40 = vrot.slane %v1274_v39, 2  ;;  %vm5736_vm15 = vmmov %vm5727_vm0  ;;  %v1853_v48 = vrot.slane %v1852_v31, 4 }
 0x2a0   : > { %v923_v22 = vmax.f32 %v921_v41, %v922_v28  ;;  %v2313_v9 = vsel %vm5736_vm15, %v2276_v60, inf  ;;  %v1282_v51 = vrot.slane %v4574_v13, 4  ;;  %v626_v6 = vadd.f32 %v3158_v17, %v606_v54  ;;  %vm5739_vm4 = vmmov %vm5734_vm2 }
 0x2a1   : > { %v2314_v33 = vmin.f32 %v2312_v61, %v2313_v9  ;;  %vm1448_vm9 = vcmp.eq.f32.partialorder %v3407_v14, %v1398_v30  ;;  %v1405_v2 = vmin.f32 %v1403_v37, %v1404_v10  ;;  %v1854_v27 = vmax.f32 %v1852_v31, %v1853_v48  ;;  %vm5740_vm14 = vmmov %vm5734_vm2 }
 0x2a2   : > { %v924_v45 = vrot.slane %v923_v22, 4  ;;  %v605_v0 = vadd.f32 %v566_v62, %v5737_v23  ;;  %v2531_v41 = vmin.f32 %v2529_v34, %v2530_v46  ;;  %v1639_v60 = vadd.f32 %v1600_v52, %v5737_v23  ;;  %vm5741_vm6 = vmmov %vm5734_vm2 }
 0x2a3   : > { %v2315_v28 = vrot.slane %v2314_v33, 4  ;;  %vm1449_vm12 = vcmp.eq.f32.partialorder %v3409_v20, %v1398_v30  ;;  %v1855_v32 = vrot.slane %v1854_v27, 2  ;;  %v4767_v38 = vmax.f32 %v626_v6, 0.0 }
 0x2a4   : > { %v925_v26 = vmax.f32 %v923_v22, %v924_v45  ;;  %v625_v61 = vadd.f32 %v3158_v17, %v605_v0  ;;  %v4770_v54 = vadd.f32 %v2629_v19, %v2628_v44  ;;  %v1738_v31 = vadd.f32 %v1699_v50, %v1639_v60 }
 0x2a5   : > { %v2316_v9 = vmin.f32 %v2314_v33, %v2315_v28  ;;  %v4772_v10 = vadd.f32 %v1275_v40, %v1274_v39  ;;  %v1464_v45 = vsel %vm1448_vm9, %v4034_v49, 0.0  ;;  %v1406_v34 = vrot.slane %v1405_v2, 1  ;;  %v1701_v39 = vpop.permute.xlu0 %1700  ;;  %vm5743_vm9 = vmmov %vm5739_vm4 }
 0x2a6   : > { %v926_v37 = vrot.slane %v925_v26, 2  ;;  %v1856_v23 = vmax.f32 %v1854_v27, %v1855_v32  ;;  %v1465_v62 = vsel %vm1449_vm12, %v4002_v11, 0.0  ;;  %v2532_v46 = vrot.slane %v2531_v41, 2  ;;  %vm5744_vm12 = vmmov %vm5739_vm4 }
 0x2a7   : > { %v2317_v6 = vrot.slane %v2316_v9, 2  ;;  %v4779_v17 = vadd.f32 %v1282_v51, %v4574_v13  ;;  %vm5738_vm0 = vcmp.lt.f32.partialorder %v3409_v20, 15.0  ;;  %v1640_v33 = vadd.f32 %v1602_v5, %v5730_v3 }
 0x2a8   : > { %v927_v22 = vmax.f32 %v925_v26, %v926_v37  ;;  %v1857_v0 = vrot.slane %v1856_v23, 1  ;;  %v4784_v44 = vsel %vm5738_vm0, %v4767_v38, -inf  ;;  %v4787_v27 = vmax.f32 %v625_v61, 0.0 }
 0x2a9   : > { %v2318_v49 = vmin.f32 %v2316_v9, %v2317_v6  ;;  %v1762_v11 = vadd.f32 %v5712_v21, %v1738_v31  ;;  %v1494_v32 = vsel %vm5739_vm4, %v1464_v45, 0.0  ;;  %v1495_v51 = vsel %vm5740_vm14, %v1465_v62, 0.0  ;;  %v5745_v31 = vld [vmem:[#allocation20_spill] sm:$0xff] }
 0x2aa   : > { %v928_v30 = vrot.slane %v927_v22, 1  ;;  %v4792_v13 = vmin.f32 %v1405_v2, %v1406_v34  ;;  %v1858_v26 = vmax.f32 %v1856_v23, %v1857_v0  ;;  %v2533_v19 = vmin.f32 %v2531_v41, %v2532_v46  ;;  %v5746_v34 = vld [vmem:[#allocation21_spill] sm:$0xff] }
 0x2ab   : > { %v2319_v40 = vrot.slane %v2318_v49, 1  ;;  %v1739_v52 = vadd.f32 %v1701_v39, %v1640_v33  ;;  %v705_v5 = vsel %vm5741_vm6, %v4784_v44, -inf  ;;  %vm5742_vm11 = vcmp.lt.f32.partialorder %v3407_v14, 15.0 }
 0x2ac   : > { %v929_v48 = vmax.f32 %v927_v22, %v928_v30  ;;  %vm1887_vm1 = vcmp.eq.f32.partialorder %v4707_v15, %v1858_v26  ;;  %vm1888_vm5 = vcmp.eq.f32.partialorder %v4713_v63, %v1858_v26  ;;  %v4801_v3 = vsel %vm5742_vm11, %v4787_v27, -inf }
 0x2ad   : > { %v2320_v50 = vmin.f32 %v2318_v49, %v2319_v40  ;;  %v4805_v2 = vmax.f32 %v1762_v11, 0.0  ;;  %v1903_v60 = vsel %vm1887_vm1, %v3407_v14, 16.0  ;;  %v1904_v61 = vsel %vm1888_vm5, %v3409_v20, 16.0 }
 0x2ae   : > { %vm958_vm10 = vcmp.eq.f32.partialorder %v4737_v29, %v929_v48  ;;  %vm959_vm2 = vcmp.eq.f32.partialorder %v4740_v25, %v929_v48  ;;  %v704_v6 = vsel %vm5739_vm4, %v4801_v3, -inf  ;;  %vm5749_vm14 = vcmask 195712  }
 0x2af   : > { %v974_v41 = vsel %vm958_vm10, %v3407_v14, 16.0  ;;  %v975_v28 = vsel %vm959_vm2, %v3409_v20, 16.0  ;;  %vm2363_vm7 = vcmp.eq.f32.partialorder %v3407_v14, %v2320_v50  ;;  %vm2364_vm15 = vcmp.eq.f32.partialorder %v3409_v20, %v2320_v50  ;;  %vm5750_vm1 = vmmov %vm5749_vm14 }
 0x2b0   : > { %v1025_v9 = vsel %vm5743_vm9, %v974_v41, inf  ;;  %v1026_v37 = vsel %vm5744_vm12, %v975_v28, inf  ;;  %v2379_v45 = vsel %vm2363_vm7, %v5745_v31, 0.0  ;;  %v2380_v23 = vsel %vm2364_vm15, %v5746_v34, 0.0  ;;  %vm4818_vm0 = vmxor %vm2363_vm7, %vm5684_vm13 }
 0x2b1   : > { %v1027_v46 = vmin.f32 %v1025_v9, %v1026_v37  ;;  %v2416_v22 = vsel %vm5749_vm14, %v2379_v45, 0.0  ;;  %v2417_v0 = vsel %vm5750_vm1, %v2380_v23, 0.0  ;;  %vm2468_vm5 = vmxor %vm2364_vm15, %vm5684_vm13  ;;  %v2534_v49 = vrot.slane %v2533_v19, 1 }
 0x2b2   : > { %vm5751_vm6 = vmmov %vm5750_vm1  ;;  %v4829_v30 = vadd.f32 %v2417_v0, %v2416_v22  ;;  %v1496_v40 = vadd.f32 %v1495_v51, %v1494_v32  ;;  %v706_v50 = vmax.f32 %v704_v6, %v705_v5  ;;  %v1763_v41 = vadd.f32 %v5712_v21, %v1739_v52  ;;  %v1711_v6 = vpop.permute.xlu1 %1710 }
 0x2b3   : > { %v1954_v33 = vsel %vm5751_vm6, %v1903_v60, inf  ;;  %vm5752_vm11 = vmmov %vm5750_vm1  ;;  %v1028_v11 = vrot.slane %v1027_v46, 4  ;;  %vm1450_vm7 = vcmp.eq.f32.partialorder %v3407_v14, %v4792_v13  ;;  %v1284_v52 = vrot.slane %v4779_v17, 2 }
 0x2b4   : > { %v1955_v39 = vsel %vm5752_vm11, %v1904_v61, inf  ;;  %vm2483_vm10 = vmand %vm4732_vm3, %vm4818_vm0  ;;  %vm5754_vm3 = vcmp.lt.f32.partialorder %v3407_v14, 12.0  ;;  %v707_v61 = vrot.slane %v706_v50, 4  ;;  %v4853_v9 = vmin.f32 %v2533_v19, %v2534_v49 }
 0x2b5   : > { %v1956_v26 = vmin.f32 %v1954_v33, %v1955_v39  ;;  %vm2484_vm2 = vmand %vm4745_vm8, %vm2468_vm5  ;;  %v2499_v48 = vsel %vm2483_vm10, %v3407_v14, 16.0  ;;  %v4846_v58 = vsel %vm5754_vm3, %v4805_v2, -inf  ;;  %v1029_v32 = vmin.f32 %v1027_v46, %v1028_v11 }
 0x2b6   : > { %v2500_v28 = vsel %vm2484_vm2, %v3409_v20, 16.0  ;;  %vm5753_vm15 = vmmov %vm5750_vm1  ;;  %vm1451_vm8 = vcmp.eq.f32.partialorder %v3409_v20, %v4792_v13  ;;  %v708_v23 = vmax.f32 %v706_v50, %v707_v61  ;;  %v4855_v62 = vmax.f32 %v1763_v41, 0.0  ;;  %v5759_v50 = vld [vmem:[#allocation8_spill] sm:$0xff] }
 0x2b7   : > { %v2536_v60 = vsel %vm5753_vm15, %v2499_v48, inf  ;;  %vm5755_vm9 = vmmov %vm5750_vm1  ;;  %v1957_v51 = vrot.slane %v1956_v26, 4  ;;  %v1030_v37 = vrot.slane %v1029_v32, 2  ;;  %v1497_v22 = vrot.slane %v1496_v40, 4 }
 0x2b8   : > { %v2537_v55 = vsel %vm5755_vm9, %v2500_v28, inf  ;;  %5756 = vst [vmem:[#allocation22_spill] sm:$0xff] %v4855_v62  ;;  %v1466_v46 = vsel %vm1450_vm7, %v5689_v18, 0.0  ;;  %vm5757_vm12 = vmmov %vm5750_vm1  ;;  %vm1110_vm0 = vcmp.gt.f32.partialorder %v4406_v36, -inf  ;;  %v709_v49 = vrot.slane %v708_v23, 2 }
 0x2b9   : > { %v1958_v45 = vmin.f32 %v1956_v26, %v1957_v51  ;;  %v2538_v0 = vmin.f32 %v2536_v60, %v2537_v55  ;;  %v1841_v33 = vsel %vm5757_vm12, %v4846_v58, -inf  ;;  %v1031_v39 = vmin.f32 %v1029_v32, %v1030_v37 }
 0x2ba   : > { %vm5758_vm4 = vcmp.lt.f32.partialorder %v3409_v20, 12.0  ;;  %v4870_v26 = vadd.f32 %v1284_v52, %v4779_v17  ;;  %v1467_v18 = vsel %vm1451_vm8, %v5690_v43, 0.0  ;;  %vm1111_vm14 = vcmp.gt.f32.partialorder %v4391_v4, -inf  ;;  %v1713_v17 = vpop.permute.xlu0 %1712 }
 0x2bb   : > { %v1959_v19 = vrot.slane %v1958_v45, 2  ;;  %v4867_v11 = vsel %vm5758_vm4, %v4855_v62, -inf  ;;  %v1744_v41 = vadd.f32 %v1711_v6, %v5759_v50  ;;  %vm2585_vm5 = vcmp.eq.f32.partialorder %v3407_v14, %v4853_v9 }
 0x2bc   : > { %v1842_v48 = vsel %vm5750_vm1, %v4867_v11, -inf  ;;  %v1032_v28 = vrot.slane %v1031_v39, 1  ;;  %v710_v55 = vmax.f32 %v708_v23, %v709_v49  ;;  %v4882_v32 = vadd.f32 %v1497_v22, %v1496_v40  ;;  %v5762_v23 = vld [vmem:[#allocation9_spill] sm:$0xff] }
 0x2bd   : > { %v1960_v60 = vmin.f32 %v1958_v45, %v1959_v19  ;;  %vm5760_vm6 = vcmask 64512   ;;  %v2539_v13 = vrot.slane %v2538_v0, 4  ;;  %v1843_v43 = vmax.f32 %v1841_v33, %v1842_v48 }
 0x2be   : > { %v1503_v51 = vsel %vm5760_vm6, %v1466_v46, 0.0  ;;  %vm5761_vm11 = vmmov %vm5760_vm6  ;;  %v1033_v52 = vmin.f32 %v1031_v39, %v1032_v28  ;;  %v711_v5 = vrot.slane %v710_v55, 1  ;;  %vm2586_vm10 = vcmp.eq.f32.partialorder %v3409_v20, %v4853_v9 }
 0x2bf   : > { %v1504_v61 = vsel %vm5761_vm11, %v1467_v18, 0.0  ;;  %v1961_v37 = vrot.slane %v1960_v60, 1  ;;  %v2601_v6 = vsel %vm2585_vm5, %v5714_v16, 0.0  ;;  %v1768_v45 = vadd.f32 %v5712_v21, %v1744_v41 }
 0x2c0   : > { %v1745_v19 = vadd.f32 %v1713_v17, %v5762_v23  ;;  %vm1062_vm2 = vcmp.eq.f32.partialorder %v3407_v14, %v1033_v52  ;;  %vm1063_vm7 = vcmp.eq.f32.partialorder %v3409_v20, %v1033_v52  ;;  %v712_v22 = vmax.f32 %v710_v55, %v711_v5 }
 0x2c1   : > { %v1962_v40 = vmin.f32 %v1960_v60, %v1961_v37  ;;  %v2540_v46 = vmin.f32 %v2538_v0, %v2539_v13  ;;  %v1078_v33 = vsel %vm1062_vm2, -inf, %v4737_v29  ;;  %v1079_v39 = vsel %vm1063_vm7, -inf, %v4740_v25 }
 0x2c2   : > { %v1844_v49 = vrot.slane %v1843_v43, 4  ;;  %vm1094_vm15 = vcmp.eq.f32.partialorder %v1078_v33, -inf  ;;  %vm1095_vm3 = vcmp.eq.f32.partialorder %v1079_v39, -inf  ;;  %v4909_v25 = vmax.f32 %v1768_v45, 0.0 }
 0x2c3   : > { %vm1991_vm9 = vcmp.eq.f32.partialorder %v3407_v14, %v1962_v40  ;;  %vm1992_vm8 = vcmp.eq.f32.partialorder %v3409_v20, %v1962_v40  ;;  %vm4899_vm12 = vmand %vm1094_vm15, %vm1110_vm0  ;;  %v1769_v0 = vadd.f32 %v5712_v21, %v1745_v19  ;;  %vm748_vm5 = vcmp.eq.f32.partialorder %v4801_v3, %v712_v22 }
 0x2c4   : > { %v4904_v5 = vsel %vm1991_vm9, -inf, %v4707_v15  ;;  %v4907_v29 = vsel %vm1992_vm8, -inf, %v4713_v63  ;;  %5765 = vst [vmem:[#allocation14_spill] sm:$0xff] %v4909_v25  ;;  %vm4914_vm4 = vmand %vm1095_vm3, %vm1111_vm14  ;;  %v1142_v36 = vsel %vm4899_vm12, %v3407_v14, 16.0  ;;  %v1845_v41 = vmax.f32 %v1843_v43, %v1844_v49 }
 0x2c5   : > { %vm5768_vm0 = vmmov %vm5750_vm1  ;;  %v1143_v4 = vsel %vm4914_vm4, %v3409_v20, 16.0  ;;  %v2602_v28 = vsel %vm2586_vm10, %v5715_v53, 0.0  ;;  %v2541_v60 = vrot.slane %v2540_v46, 2  ;;  %v764_v52 = vsel %vm748_vm5, %v3407_v14, 16.0 }
 0x2c6   : > { %v2058_v48 = vsel %vm5768_vm0, %v4904_v5, -inf  ;;  %vm5769_vm1 = vmmov %vm5768_vm0  ;;  %v1194_v55 = vsel %vm5761_vm11, %v1143_v4, inf  ;;  %vm5771_vm2 = vcmp.lt.f32.partialorder %v3407_v14, 12.0  ;;  %v4942_v45 = vmax.f32 %v1769_v0, 0.0 }
 0x2c7   : > { %v2059_v50 = vsel %vm5769_vm1, %v4907_v29, -inf  ;;  %vm5770_vm14 = vmmov %vm5760_vm6  ;;  %vm749_vm6 = vcmp.eq.f32.partialorder %v4784_v44, %v712_v22  ;;  %v4940_v37 = vsel %vm5771_vm2, %v4909_v25, -inf  ;;  %v1846_v33 = vrot.slane %v1845_v41, 2 }
 0x2c8   : > { %v1193_v21 = vsel %vm5770_vm14, %v1142_v36, inf  ;;  %v2060_v17 = vmax.f32 %v2058_v48, %v2059_v50  ;;  %5772 = vst [vmem:[#allocation15_spill] sm:$0xff] %v4942_v45  ;;  %vm5773_vm7 = vmmov %vm5768_vm0  ;;  %v765_v9 = vsel %vm749_vm6, %v3409_v20, 16.0  ;;  %v2542_v39 = vmin.f32 %v2540_v46, %v2541_v60 }
 0x2c9   : > { %v1195_v13 = vmin.f32 %v1193_v21, %v1194_v55  ;;  %v2631_v43 = vsel %vm5773_vm7, %v2601_v6, 0.0  ;;  %vm5774_vm10 = vmmov %vm5761_vm11  ;;  %v4951_v48 = vadd.f32 %v1504_v61, %v1503_v51  ;;  %v1847_v50 = vmax.f32 %v1845_v41, %v1846_v33 }
 0x2ca   : > { %v2061_v23 = vrot.slane %v2060_v17, 4  ;;  %v808_v53 = vsel %vm5774_vm10, %v764_v52, inf  ;;  %vm5775_vm15 = vmmov %vm5768_vm0  ;;  %vm5778_vm8 = vcmp.lt.f32.partialorder %v3409_v20, 12.0  ;;  %v1499_v51 = vrot.slane %v4882_v32, 2 }
 0x2cb   : > { %v2632_v19 = vsel %vm5775_vm15, %v2602_v28, 0.0  ;;  %v1196_v40 = vrot.slane %v1195_v13, 4  ;;  %vm5776_vm3 = vmmov %vm5774_vm10  ;;  %v4956_v4 = vsel %vm5778_vm8, %v4942_v45, -inf  ;;  %v1848_v52 = vrot.slane %v1847_v50, 1 }
 0x2cc   : > { %v809_v22 = vsel %vm5776_vm3, %v765_v9, inf  ;;  %v2062_v49 = vmax.f32 %v2060_v17, %v2061_v23  ;;  %vm5777_vm9 = vmmov %vm5768_vm0  ;;  %v2633_v21 = vadd.f32 %v2632_v19, %v2631_v43  ;;  %v1869_v46 = vsel %vm5768_vm0, %v4956_v4, -inf }
 0x2cd   : > { %v810_v36 = vmin.f32 %v808_v53, %v809_v22  ;;  %v1868_v0 = vsel %vm5777_vm9, %v4940_v37, -inf  ;;  %v1197_v6 = vmin.f32 %v1195_v13, %v1196_v40  ;;  %v2543_v61 = vrot.slane %v2542_v39, 1  ;;  %vm5779_vm14 = vmmov %vm5768_vm0 }
 0x2ce   : > { %v2063_v28 = vrot.slane %v2062_v49, 2  ;;  %v1870_v23 = vmax.f32 %v1868_v0, %v1869_v46  ;;  %v2410_v9 = vrot.slane %v4675_v47, 4  ;;  %v1849_v40 = vmax.f32 %v1847_v50, %v1848_v52  ;;  %vm5780_vm2 = vmmov %vm5768_vm0 }
 0x2cf   : > { %v811_v55 = vrot.slane %v810_v36, 4  ;;  %v1198_v17 = vrot.slane %v1197_v6, 2  ;;  %v1506_v19 = vrot.slane %v4951_v48, 4  ;;  %v2634_v22 = vrot.slane %v2633_v21, 4  ;;  %vm5781_vm15 = vmmov %vm5768_vm0 }
 0x2d0   : > { %v2064_v41 = vmax.f32 %v2062_v49, %v2063_v28  ;;  %v1871_v43 = vrot.slane %v1870_v23, 4  ;;  %vm1885_vm1 = vcmp.eq.f32.partialorder %v4846_v58, %v1849_v40  ;;  %vm1886_vm5 = vcmp.eq.f32.partialorder %v4867_v11, %v1849_v40  ;;  %vm5782_vm3 = vmmov %vm5768_vm0 }
 0x2d1   : > { %v812_v13 = vmin.f32 %v810_v36, %v811_v55  ;;  %v1199_v53 = vmin.f32 %v1197_v6, %v1198_v17  ;;  %v2544_v46 = vmin.f32 %v2542_v39, %v2543_v61  ;;  %v1901_v36 = vsel %vm1885_vm1, %v3407_v14, 16.0 }
 0x2d2   : > { %v2065_v33 = vrot.slane %v2064_v41, 1  ;;  %v1872_v0 = vmax.f32 %v1870_v23, %v1871_v43  ;;  %v1902_v6 = vsel %vm1886_vm5, %v3409_v20, 16.0  ;;  %v1945_v50 = vsel %vm5779_vm14, %v1901_v36, inf }
 0x2d3   : > { %v813_v45 = vrot.slane %v812_v13, 2  ;;  %v1200_v25 = vrot.slane %v1199_v53, 1  ;;  %v1946_v52 = vsel %vm5780_vm2, %v1902_v6, inf  ;;  %vm5783_vm9 = vcmask 64512  }
 0x2d4   : > { %v2066_v60 = vmax.f32 %v2064_v41, %v2065_v33  ;;  %v1873_v55 = vrot.slane %v1872_v0, 2  ;;  %vm5784_vm8 = vmmov %vm5783_vm9  ;;  %vm2587_vm1 = vcmp.eq.f32.partialorder %v3407_v14, %v2544_v46  ;;  %vm2588_vm5 = vcmp.eq.f32.partialorder %v3409_v20, %v2544_v46 }
 0x2d5   : > { %v814_v49 = vmin.f32 %v812_v13, %v813_v45  ;;  %v1201_v28 = vmin.f32 %v1199_v53, %v1200_v25  ;;  %v1947_v36 = vmin.f32 %v1945_v50, %v1946_v52  ;;  %v5014_v50 = vadd.f32 %v2410_v9, %v4675_v47 }
 0x2d6   : > { %vm2095_vm6 = vcmp.eq.f32.partialorder %v4904_v5, %v2066_v60  ;;  %vm2096_vm11 = vcmp.eq.f32.partialorder %v4907_v29, %v2066_v60  ;;  %v2604_v16 = vsel %vm2588_vm5, %v5746_v34, 0.0  ;;  %vm5794_vm5 = vmmov %vm5782_vm3 }
 0x2d7   : > { %v815_v17 = vrot.slane %v814_v49, 1  ;;  %vm1230_vm7 = vcmp.eq.f32.partialorder %v3407_v14, %v1201_v28  ;;  %vm1231_vm10 = vcmp.eq.f32.partialorder %v3409_v20, %v1201_v28  ;;  %v2111_v45 = vsel %vm2095_vm6, %v3407_v14, 16.0 }
 0x2d8   : > { %v2112_v25 = vsel %vm2096_vm11, %v3409_v20, 16.0  ;;  %v1246_v39 = vsel %vm1230_vm7, %v4394_v42, 0.0  ;;  %v1247_v23 = vsel %vm1231_vm10, %v4372_v7, 0.0  ;;  %v2162_v61 = vsel %vm5781_vm15, %v2111_v45, inf  ;;  %vm4985_vm0 = vmxor %vm1230_vm7, %vm5684_vm13 }
 0x2d9   : > { %v2163_v60 = vsel %vm5782_vm3, %v2112_v25, inf  ;;  %v1297_v41 = vsel %vm5783_vm9, %v1246_v39, 0.0  ;;  %v1298_v13 = vsel %vm5784_vm8, %v1247_v23, 0.0  ;;  %v816_v43 = vmin.f32 %v814_v49, %v815_v17  ;;  %vm4996_vm14 = vmxor %vm1231_vm10, %vm5684_vm13 }
 0x2da   : > { %v2164_v40 = vmin.f32 %v2162_v61, %v2163_v60  ;;  %v4991_v33 = vadd.f32 %v1298_v13, %v1297_v41  ;;  %v1874_v49 = vmax.f32 %v1872_v0, %v1873_v55  ;;  %v5003_v17 = vadd.f32 %v1499_v51, %v4882_v32  ;;  %vm1350_vm2 = vmand %vm4899_vm12, %vm4985_vm0 }
 0x2db   : > { %vm852_vm6 = vcmp.eq.f32.partialorder %v3407_v14, %v816_v43  ;;  %vm853_vm11 = vcmp.eq.f32.partialorder %v3409_v20, %v816_v43  ;;  %v1507_v25 = vadd.f32 %v1506_v19, %v4951_v48  ;;  %v2635_v39 = vadd.f32 %v2634_v22, %v2633_v21  ;;  %vm5789_vm7 = vmmov %vm5784_vm8 }
 0x2dc   : > { %v2165_v45 = vrot.slane %v2164_v40, 4  ;;  %v5011_v28 = vsel %vm852_vm6, -inf, %v4801_v3  ;;  %v5017_v0 = vsel %vm853_vm11, -inf, %v4784_v44  ;;  %v2603_v48 = vsel %vm2587_vm1, %v5745_v31, 0.0  ;;  %vm1351_vm12 = vmand %vm4914_vm4, %vm4996_vm14 }
 0x2dd   : > { %v912_v32 = vsel %vm5789_vm7, %v5011_v28, -inf  ;;  %vm5790_vm10 = vmmov %vm5789_vm7  ;;  %v1948_v21 = vrot.slane %v1947_v36, 4  ;;  %v1366_v51 = vsel %vm1350_vm2, %v3407_v14, 16.0  ;;  %v1875_v22 = vrot.slane %v1874_v49, 1 }
 0x2de   : > { %v2166_v52 = vmin.f32 %v2164_v40, %v2165_v45  ;;  %v913_v47 = vsel %vm5790_vm10, %v5017_v0, -inf  ;;  %v1501_v31 = vrot.slane %v5003_v17, 1  ;;  %v1508_v55 = vrot.slane %v1507_v25, 2  ;;  %vm5791_vm4 = vmmov %vm5782_vm3 }
 0x2df   : > { %v914_v19 = vmax.f32 %v912_v32, %v913_v47  ;;  %v2636_v23 = vrot.slane %v2635_v39, 2  ;;  %v1949_v46 = vmin.f32 %v1947_v36, %v1948_v21  ;;  %v1367_v34 = vsel %vm1351_vm12, %v3409_v20, 16.0  ;;  %vm5792_vm9 = vmmov %vm5789_vm7 }
 0x2e0   : > { %v2167_v9 = vrot.slane %v2166_v52, 2  ;;  %vm2247_vm15 = vcmp.gt.f32.partialorder %v4707_v15, -inf  ;;  %v1876_v60 = vmax.f32 %v1874_v49, %v1875_v22  ;;  %v2640_v41 = vsel %vm5791_vm4, %v2603_v48, 0.0  ;;  %vm5793_vm1 = vmmov %vm5789_vm7 }
 0x2e1   : > { %v915_v61 = vrot.slane %v914_v19, 4  ;;  %v2641_v13 = vsel %vm5782_vm3, %v2604_v16, 0.0  ;;  %v1417_v53 = vsel %vm5792_vm9, %v1366_v51, inf  ;;  %v1950_v40 = vrot.slane %v1949_v46, 2  ;;  %vm5795_vm14 = vmmov %vm5782_vm3 }
 0x2e2   : > { %v2168_v18 = vmin.f32 %v2166_v52, %v2167_v9  ;;  %vm1891_vm8 = vcmp.eq.f32.partialorder %v4940_v37, %v1876_v60  ;;  %vm1892_vm0 = vcmp.eq.f32.partialorder %v4956_v4, %v1876_v60  ;;  %v1418_v36 = vsel %vm5793_vm1, %v1367_v34, inf }
 0x2e3   : > { %v916_v6 = vmax.f32 %v914_v19, %v915_v61  ;;  %v1951_v45 = vmin.f32 %v1949_v46, %v1950_v40  ;;  %v1907_v52 = vsel %vm1891_vm8, %v3407_v14, 16.0  ;;  %v1908_v49 = vsel %vm1892_vm0, %v3409_v20, 16.0  ;;  %vm5801_vm8 = vmmov %vm5794_vm5 }
 0x2e4   : > { %v2169_v43 = vrot.slane %v2168_v18, 1  ;;  %v5045_v32 = vadd.f32 %v1508_v55, %v1507_v25  ;;  %v2642_v21 = vadd.f32 %v2641_v13, %v2640_v41  ;;  %v1972_v9 = vsel %vm5794_vm5, %v1907_v52, inf }
 0x2e5   : > { %v917_v47 = vrot.slane %v916_v6, 2  ;;  %v1952_v51 = vrot.slane %v1951_v45, 1  ;;  %v1973_v19 = vsel %vm5795_vm14, %v1908_v49, inf  ;;  %v1419_v22 = vmin.f32 %v1417_v53, %v1418_v36 }
 0x2e6   : > { %v2170_v16 = vmin.f32 %v2168_v18, %v2169_v43  ;;  %v2637_v34 = vadd.f32 %v2636_v23, %v2635_v39  ;;  %v1974_v60 = vmin.f32 %v1972_v9, %v1973_v19  ;;  %v2643_v41 = vrot.slane %v2642_v21, 4 }
 0x2e7   : > { %v918_v46 = vmax.f32 %v916_v6, %v917_v47  ;;  %v1953_v61 = vmin.f32 %v1951_v45, %v1952_v51  ;;  %vm2248_vm12 = vcmp.gt.f32.partialorder %v4713_v63, -inf  ;;  %v2419_v52 = vrot.slane %v4829_v30, 4 }
 0x2e8   : > { %vm2199_vm6 = vcmp.eq.f32.partialorder %v3407_v14, %v2170_v16  ;;  %vm2200_vm11 = vcmp.eq.f32.partialorder %v3409_v20, %v2170_v16  ;;  %v2638_v23 = vrot.slane %v2637_v34, 1  ;;  %v1975_v45 = vrot.slane %v1974_v60, 4 }
 0x2e9   : > { %v2215_v25 = vsel %vm2199_vm6, -inf, %v4904_v5  ;;  %v2216_v55 = vsel %vm2200_vm11, -inf, %v4907_v29  ;;  %v919_v18 = vrot.slane %v918_v46, 1  ;;  %vm1989_vm4 = vcmp.eq.f32.partialorder %v3407_v14, %v1953_v61  ;;  %vm5804_vm11 = vmmov %vm5794_vm5 }
 0x2ea   : > { %vm2231_vm2 = vcmp.eq.f32.partialorder %v2215_v25, -inf  ;;  %vm2232_vm7 = vcmp.eq.f32.partialorder %v2216_v55, -inf  ;;  %vm1990_vm3 = vcmp.eq.f32.partialorder %v3409_v20, %v1953_v61  ;;  %v1510_v5 = vrot.slane %v5045_v32, 1 }
 0x2eb   : > { %vm5057_vm10 = vmand %vm2231_vm2, %vm2247_vm15  ;;  %v1420_v29 = vrot.slane %v1419_v22, 4  ;;  %v920_v15 = vmax.f32 %v918_v46, %v919_v18  ;;  %v5076_v43 = vsel %vm1989_vm4, -inf, %v4846_v58  ;;  %v5081_v36 = vsel %vm1990_vm3, -inf, %v4867_v11 }
 0x2ec   : > { %vm5064_vm9 = vmand %vm2232_vm7, %vm2248_vm12  ;;  %v2279_v63 = vsel %vm5057_vm10, %v3407_v14, 16.0  ;;  %v2644_v49 = vadd.f32 %v2643_v41, %v2642_v21  ;;  %v2049_v19 = vsel %vm5794_vm5, %v5076_v43, -inf  ;;  %vm5802_vm14 = vcmask 64512  }
 0x2ed   : > { %v2280_v53 = vsel %vm5064_vm9, %v3409_v20, 16.0  ;;  %vm5800_vm15 = vmmov %vm5794_vm5  ;;  %vm956_vm0 = vcmp.eq.f32.partialorder %v5011_v28, %v920_v15  ;;  %vm957_vm1 = vcmp.eq.f32.partialorder %v5017_v0, %v920_v15  ;;  %v1421_v47 = vmin.f32 %v1419_v22, %v1420_v29 }
 0x2ee   : > { %v2330_v40 = vsel %vm5800_vm15, %v2279_v63, inf  ;;  %v2331_v6 = vsel %vm5801_vm8, %v2280_v53, inf  ;;  %v972_v51 = vsel %vm956_vm0, %v3407_v14, 16.0  ;;  %v973_v9 = vsel %vm957_vm1, %v3409_v20, 16.0  ;;  %vm5803_vm6 = vmmov %vm5802_vm14 }
 0x2ef   : > { %v2332_v16 = vmin.f32 %v2330_v40, %v2331_v6  ;;  %v1016_v25 = vsel %vm5802_vm14, %v972_v51, inf  ;;  %v1017_v55 = vsel %vm5803_vm6, %v973_v9, inf  ;;  %v2050_v61 = vsel %vm5804_vm11, %v5081_v36, -inf  ;;  %vm5806_vm14 = vmmov %vm5804_vm11 }
 0x2f0   : > { %v1502_v21 = vadd.f32 %v1501_v31, %v5003_v17  ;;  %v1018_v22 = vmin.f32 %v1016_v25, %v1017_v55  ;;  %v2051_v18 = vmax.f32 %v2049_v19, %v2050_v61  ;;  %v1976_v41 = vmin.f32 %v1974_v60, %v1975_v45  ;;  %vm5807_vm6 = vmmov %vm5804_vm11 }
 0x2f1   : > { %v2333_v46 = vrot.slane %v2332_v16, 4  ;;  %v2639_v29 = vadd.f32 %v2638_v23, %v2637_v34  ;;  %v2420_v63 = vadd.f32 %v2419_v52, %v4829_v30  ;;  %v2645_v15 = vrot.slane %v2644_v49, 2 }
 0x2f2   : > { %v1019_v40 = vrot.slane %v1018_v22, 4  ;;  %v2052_v6 = vrot.slane %v2051_v18, 4  ;;  %v1977_v51 = vrot.slane %v1976_v41, 2  ;;  %vm5540_vm2 = vcmask 1041409  }
 0x2f3   : > { %v2334_v53 = vmin.f32 %v2332_v16, %v2333_v46  ;;  %v1422_v9 = vrot.slane %v1421_v47, 2  ;;  %v1511_v62 = vadd.f32 %v1510_v5, %v5045_v32  ;;  %v2716_v17 = vsel %vm5540_vm2, %v4695_v35, %v4579_v12 }
 0x2f4   : > { %v1020_v31 = vmin.f32 %v1018_v22, %v1019_v40  ;;  %v2053_v19 = vmax.f32 %v2051_v18, %v2052_v6  ;;  %v1978_v60 = vmin.f32 %v1976_v41, %v1977_v51  ;;  %vm5539_vm7 = vcmask 1042434  }
 0x2f5   : > { %v2335_v48 = vrot.slane %v2334_v53, 2  ;;  %v2421_v34 = vrot.slane %v2420_v63, 2  ;;  %v2646_v30 = vadd.f32 %v2645_v15, %v2644_v49  ;;  %v2717_v45 = vsel %vm5539_vm7, %v1502_v21, %v2716_v17 }
 0x2f6   : > { %v1021_v52 = vrot.slane %v1020_v31, 2  ;;  %v2054_v16 = vrot.slane %v2053_v19, 2  ;;  %v1979_v46 = vrot.slane %v1978_v60, 1  ;;  %vm5541_vm12 = vcmask 1043459  }
 0x2f7   : > { %v2336_v23 = vmin.f32 %v2334_v53, %v2335_v48  ;;  %v5805_v32 = vrot.slane %v5014_v50, 2  ;;  %v5107_v25 = vmin.f32 %v1421_v47, %v1422_v9  ;;  %v5110_v35 = vsel %vm5541_vm12, %v1511_v62, %v2717_v45 }
 0x2f8   : > { %v1022_v55 = vmin.f32 %v1020_v31, %v1021_v52  ;;  %vm1108_vm4 = vcmp.gt.f32.partialorder %v4801_v3, -inf  ;;  %v2055_v48 = vmax.f32 %v2053_v19, %v2054_v16  ;;  %v1980_v49 = vmin.f32 %v1978_v60, %v1979_v46 }
 0x2f9   : > { %v5105_v5 = vadd.f32 %v5805_v32, %v5014_v50  ;;  %v2337_v12 = vrot.slane %v2336_v23, 1  ;;  %v2750_v61 = vsel %vm5540_vm2, %v4770_v54, %v4587_v24  ;;  %v5116_v21 = vadd.f32 %v2421_v34, %v2420_v63 }
 0x2fa   : > { %v2647_v22 = vrot.slane %v2646_v30, 1  ;;  %vm1109_vm3 = vcmp.gt.f32.partialorder %v4784_v44, -inf  ;;  %v2751_v47 = vsel %vm5539_vm7, %v2639_v29, %v2750_v61  ;;  %v1023_v18 = vrot.slane %v1022_v55, 1 }
 0x2fb   : > { %v2338_v50 = vmin.f32 %v2336_v23, %v2337_v12  ;;  %v2056_v62 = vrot.slane %v2055_v48, 1  ;;  %vm1995_vm15 = vcmp.eq.f32.partialorder %v3407_v14, %v1980_v49  ;;  %vm1996_vm8 = vcmp.eq.f32.partialorder %v3409_v20, %v1980_v49 }
 0x2fc   : > { %v1424_v41 = vrot.slane %v5107_v25, 1  ;;  %v5126_v24 = vsel %vm1995_vm15, -inf, %v4940_v37  ;;  %v1024_v29 = vmin.f32 %v1022_v55, %v1023_v18  ;;  %v5135_v6 = vsel %vm1996_vm8, -inf, %v4956_v4  ;;  %vm5808_vm15 = vmmov %vm5807_vm6 }
 0x2fd   : > { %vm2367_vm0 = vcmp.eq.f32.partialorder %v3407_v14, %v2338_v50  ;;  %vm2368_vm1 = vcmp.eq.f32.partialorder %v3409_v20, %v2338_v50  ;;  %v2057_v15 = vmax.f32 %v2055_v48, %v2056_v62  ;;  %v2076_v51 = vsel %vm5808_vm15, %v5126_v24, -inf  ;;  %vm5810_vm15 = vmmov %vm5807_vm6 }
 0x2fe   : > { %v2383_v54 = vsel %vm2367_vm0, %v4684_v1, 0.0  ;;  %v2384_v63 = vsel %vm2368_vm1, %v4692_v57, 0.0  ;;  %vm2471_vm5 = vmxor %vm2367_vm0, %vm5684_vm13  ;;  %vm1060_vm0 = vcmp.eq.f32.partialorder %v3407_v14, %v1024_v29  ;;  %vm1061_vm2 = vcmp.eq.f32.partialorder %v3409_v20, %v1024_v29 }
 0x2ff   : > { %v2434_v53 = vsel %vm5806_vm14, %v2383_v54, 0.0  ;;  %v2435_v40 = vsel %vm5807_vm6, %v2384_v63, 0.0  ;;  %vm2472_vm11 = vmxor %vm2368_vm1, %vm5684_vm13  ;;  %vm2093_vm14 = vcmp.eq.f32.partialorder %v5076_v43, %v2057_v15  ;;  %v1076_v31 = vsel %vm1060_vm0, -inf, %v5011_v28 }
 0x300   : > { %v5139_v9 = vadd.f32 %v2435_v40, %v2434_v53  ;;  %vm2487_vm7 = vmand %vm5057_vm10, %vm2471_vm5  ;;  %v1077_v19 = vsel %vm1061_vm2, -inf, %v5017_v0  ;;  %vm2094_vm8 = vcmp.eq.f32.partialorder %v5081_v36, %v2057_v15  ;;  %vm1092_vm5 = vcmp.eq.f32.partialorder %v1076_v31, -inf }
 0x301   : > { %vm2488_vm1 = vmand %vm5064_vm9, %vm2472_vm11  ;;  %v2503_v17 = vsel %vm2487_vm7, %v3407_v14, 16.0  ;;  %v2077_v34 = vsel %vm5807_vm6, %v5135_v6, -inf  ;;  %vm1093_vm12 = vcmp.eq.f32.partialorder %v1077_v19, -inf  ;;  %v2109_v28 = vsel %vm2093_vm14, %v3407_v14, 16.0 }
 0x302   : > { %v2504_v13 = vsel %vm2488_vm1, %v3409_v20, 16.0  ;;  %vm5809_vm10 = vmmov %vm5807_vm6  ;;  %v2110_v0 = vsel %vm2094_vm8, %v3409_v20, 16.0  ;;  %v2648_v46 = vadd.f32 %v2647_v22, %v2646_v30  ;;  %v2078_v44 = vmax.f32 %v2076_v51, %v2077_v34 }
 0x303   : > { %v2554_v60 = vsel %vm5809_vm10, %v2503_v17, inf  ;;  %v2555_v23 = vsel %vm5810_vm15, %v2504_v13, inf  ;;  %vm5159_vm9 = vmand %vm1092_vm5, %vm1108_vm4  ;;  %vm5816_vm4 = vcmask 64512   ;;  %v5818_v48 = vrot.slane %v4697_v59, 4  ;;  %v5824_v13 = vld [vmem:[#allocation23_spill] sm:$0xff] }
 0x304   : > { %v5165_v45 = vmin.f32 %v2554_v60, %v2555_v23  ;;  %vm5169_vm2 = vmand %vm1093_vm12, %vm1109_vm3  ;;  %v1140_v3 = vsel %vm5159_vm9, %v3407_v14, 16.0  ;;  %v2405_v61 = vrot.slane %v4717_v56, 1  ;;  %v5820_v30 = vrot.slane %v4644_v8, 1 }
 0x305   : > { %vm5815_vm7 = vmmov %vm5807_vm6  ;;  %v1141_v32 = vsel %vm5169_vm2, %v3409_v20, 16.0  ;;  %v1184_v12 = vsel %vm5816_vm4, %v1140_v3, inf  ;;  %v2567_v49 = vmin.f32 %v4697_v59, %v5818_v48  ;;  %v5821_v62 = vrot.slane %v4772_v10, 1 }
 0x306   : > { %v2153_v16 = vsel %vm5815_vm7, %v2109_v28, inf  ;;  %vm5817_vm11 = vmmov %vm5807_vm6  ;;  %v1269_v22 = vadd.f32 %v5820_v30, %v4644_v8  ;;  %v2079_v29 = vrot.slane %v2078_v44, 4  ;;  %v2414_v15 = vrot.slane %v5105_v5, 1  ;;  %v5831_v30 = vld [vmem:[#allocation26_spill] sm:$0xff] }
 0x307   : > { %v2154_v55 = vsel %vm5817_vm11, %v2110_v0, inf  ;;  %vm5819_vm12 = vmmov %vm5816_vm4  ;;  %v1278_v54 = vadd.f32 %v5821_v62, %v4772_v10  ;;  %v2423_v53 = vrot.slane %v5116_v21, 1  ;;  %vm5822_vm3 = vcmask 1043459  }
 0x308   : > { %v1185_v50 = vsel %vm5819_vm12, %v1141_v32, inf  ;;  %v2155_v18 = vmin.f32 %v2153_v16, %v2154_v55  ;;  %v5196_v40 = vsel %vm5822_vm3, %v2648_v46, %v2751_v47  ;;  %v5823_v51 = vrot.slane %v4870_v26, 1  ;;  %v5826_v16 = vld [vmem:[#allocation25_spill] sm:$0xff]  ;;  %vm5829_vm8 = vmmov %vm5822_vm3 }
 0x309   : > { %v1186_v63 = vmin.f32 %v1184_v12, %v1185_v50  ;;  %v1425_v8 = vmin.f32 %v5107_v25, %v1424_v41  ;;  %v2080_v19 = vmax.f32 %v2078_v44, %v2079_v29  ;;  %v5825_v10 = vrot.slane %v5824_v13, 4  ;;  %vm5834_vm15 = vmmov %vm5822_vm3 }
 0x30a   : > { %v2156_v59 = vrot.slane %v2155_v18, 4  ;;  %v1287_v17 = vadd.f32 %v5823_v51, %v4870_v26  ;;  %v2568_v34 = vrot.slane %v2567_v49, 2  ;;  %v2406_v23 = vadd.f32 %v2405_v61, %v4717_v56  ;;  %v5830_v61 = vld [vmem:[#allocation10_spill] sm:$0xff]  ;;  %vm5837_vm11 = vmmov %vm5819_vm12 }
 0x30b   : > { %v1187_v31 = vrot.slane %v1186_v63, 4  ;;  %v5205_v60 = vadd.f32 %v5825_v10, %v5824_v13  ;;  %v1300_v47 = vrot.slane %v4991_v33, 4  ;;  %v2081_v3 = vrot.slane %v2080_v19, 2  ;;  %vm5838_vm12 = vmmov %vm5837_vm11 }
 0x30c   : > { %v2157_v28 = vmin.f32 %v2155_v18, %v2156_v59  ;;  %vm5827_vm0 = vcmask 1041409   ;;  %v2415_v25 = vadd.f32 %v2414_v15, %v5105_v5  ;;  %v2424_v41 = vadd.f32 %v2423_v53, %v5116_v21 }
 0x30d   : > { %v1188_v0 = vmin.f32 %v1186_v63, %v1187_v31  ;;  %v2694_v26 = vsel %vm5827_vm0, %v1269_v22, %v5826_v16  ;;  %vm5828_vm14 = vcmask 1042434   ;;  %vm1454_vm1 = vcmp.eq.f32.partialorder %v3407_v14, %v1425_v8  ;;  %vm5832_vm5 = vmmov %vm5827_vm0 }
 0x30e   : > { %v2158_v46 = vrot.slane %v2157_v28, 2  ;;  %v2696_v32 = vsel %vm5828_vm14, %v1278_v54, %v2694_v26  ;;  %v2082_v55 = vmax.f32 %v2080_v19, %v2081_v3  ;;  %v2448_v44 = vrot.slane %v5205_v60, 2  ;;  %vm5833_vm6 = vmmov %vm5828_vm14 }
 0x30f   : > { %v1189_v12 = vrot.slane %v1188_v0, 2  ;;  %v5216_v56 = vsel %vm5829_vm8, %v1287_v17, %v2696_v32  ;;  %vm1455_vm10 = vcmp.eq.f32.partialorder %v3409_v20, %v1425_v8  ;;  %v1535_v50 = vrot.slane %v5830_v61, 2  ;;  %v5835_v17 = vld [vmem:[#allocation13_spill] sm:$0xff] }
 0x310   : > { %v2159_v48 = vmin.f32 %v2157_v28, %v2158_v46  ;;  %v1301_v5 = vadd.f32 %v1300_v47, %v4991_v33  ;;  %v2083_v18 = vrot.slane %v2082_v55, 1  ;;  %v2734_v22 = vsel %vm5832_vm5, %v2406_v23, %v5831_v30  ;;  %vm5841_vm5 = vmmov %vm5837_vm11 }
 0x311   : > { %v1190_v21 = vmin.f32 %v1188_v0, %v1189_v12  ;;  %v5224_v62 = vmin.f32 %v2567_v49, %v2568_v34  ;;  %v1470_v54 = vsel %vm1454_vm1, %v4394_v42, 0.0  ;;  %v2735_v29 = vsel %vm5833_vm6, %v2415_v25, %v2734_v22  ;;  %vm5842_vm6 = vmmov %vm5841_vm5 }
 0x312   : > { %v2160_v63 = vrot.slane %v2159_v48, 1  ;;  %v1471_v15 = vsel %vm1455_vm10, %v4372_v7, 0.0  ;;  %v2084_v59 = vmax.f32 %v2082_v55, %v2083_v18  ;;  %v5230_v51 = vsel %vm5834_vm15, %v2424_v41, %v2735_v29 }
 0x313   : > { %v1191_v53 = vrot.slane %v1190_v21, 1  ;;  %vm2245_vm7 = vcmp.gt.f32.partialorder %v4846_v58, -inf  ;;  %vm2246_vm4 = vcmp.gt.f32.partialorder %v4867_v11, -inf  ;;  %v5836_v49 = vrot.slane %v5835_v17, 4  ;;  %v5851_v58 = vld [vmem:[#allocation24_spill] sm:$0xff] }
 0x314   : > { %v2161_v33 = vmin.f32 %v2159_v48, %v2160_v63  ;;  %v1302_v42 = vrot.slane %v1301_v5, 2  ;;  %v1521_v31 = vsel %vm5837_vm11, %v1470_v54, 0.0  ;;  %v5239_v7 = vadd.f32 %v1535_v50, %v5830_v61 }
 0x315   : > { %v1543_v8 = vadd.f32 %v5836_v49, %v5835_v17  ;;  %v1192_v19 = vmin.f32 %v1190_v21, %v1191_v53  ;;  %v1522_v13 = vsel %vm5838_vm12, %v1471_v15, 0.0  ;;  %v2557_v10 = vrot.slane %v5165_v45, 4 }
 0x316   : > { %vm2197_vm3 = vcmp.eq.f32.partialorder %v3407_v14, %v2161_v33  ;;  %vm2198_vm0 = vcmp.eq.f32.partialorder %v3409_v20, %v2161_v33  ;;  %vm2099_vm8 = vcmp.eq.f32.partialorder %v5126_v24, %v2084_v59  ;;  %v1523_v16 = vadd.f32 %v1522_v13, %v1521_v31  ;;  %v5854_v31 = vld [vmem:[#allocation27_spill] sm:$0xff] }
 0x317   : > { %vm1228_vm14 = vcmp.eq.f32.partialorder %v3407_v14, %v1192_v19  ;;  %vm1229_vm1 = vcmp.eq.f32.partialorder %v3409_v20, %v1192_v19  ;;  %v2213_v34 = vsel %vm2197_vm3, -inf, %v5076_v43  ;;  %v2214_v0 = vsel %vm2198_vm0, -inf, %v5081_v36 }
 0x318   : > { %v1244_v23 = vsel %vm1228_vm14, %v4787_v27, 0.0  ;;  %v1245_v28 = vsel %vm1229_vm1, %v4767_v38, 0.0  ;;  %vm5252_vm10 = vmxor %vm1228_vm14, %vm5684_vm13  ;;  %v1544_v3 = vrot.slane %v1543_v8, 2  ;;  %vm2229_vm11 = vcmp.eq.f32.partialorder %v2213_v34, -inf }
 0x319   : > { %v1288_v26 = vsel %vm5841_vm5, %v1244_v23, 0.0  ;;  %v1289_v25 = vsel %vm5842_vm6, %v1245_v28, 0.0  ;;  %vm1333_vm15 = vmxor %vm1229_vm1, %vm5684_vm13  ;;  %vm2230_vm3 = vcmp.eq.f32.partialorder %v2214_v0, -inf  ;;  %vm2100_vm14 = vcmp.eq.f32.partialorder %v5135_v6, %v2084_v59 }
 0x31a   : > { %v1290_v43 = vadd.f32 %v1289_v25, %v1288_v26  ;;  %vm1348_vm12 = vmand %vm5159_vm9, %vm5252_vm10  ;;  %v2115_v36 = vsel %vm2099_vm8, %v3407_v14, 16.0  ;;  %v2558_v41 = vmin.f32 %v5165_v45, %v2557_v10  ;;  %v2116_v32 = vsel %vm2100_vm14, %v3409_v20, 16.0 }
 0x31b   : > { %vm1349_vm0 = vmand %vm5169_vm2, %vm1333_vm15  ;;  %v1364_v46 = vsel %vm1348_vm12, %v3407_v14, 16.0  ;;  %vm5843_vm1 = vcmask 195712   ;;  %v1320_v30 = vrot.slane %v5851_v58, 2  ;;  %v1303_v11 = vadd.f32 %v1302_v42, %v1301_v5 }
 0x31c   : > { %v2180_v12 = vsel %vm5843_vm1, %v2115_v36, inf  ;;  %v1291_v55 = vrot.slane %v1290_v43, 4  ;;  %v1365_v39 = vsel %vm1349_vm0, %v3409_v20, 16.0  ;;  %vm5844_vm9 = vmmov %vm5841_vm5  ;;  %v2559_v15 = vrot.slane %v2558_v41, 2 }
 0x31d   : > { %v1408_v48 = vsel %vm5844_vm9, %v1364_v46, inf  ;;  %vm5276_vm10 = vmand %vm2229_vm11, %vm2245_vm7  ;;  %v5855_v19 = vrot.slane %v5854_v31, 2  ;;  %v1524_v10 = vrot.slane %v1523_v16, 4  ;;  %v5300_v23 = vadd.f32 %v1544_v3, %v1543_v8 }
 0x31e   : > { %vm5847_vm8 = vmmov %vm5843_vm1  ;;  %v2277_v21 = vsel %vm5276_vm10, %v3407_v14, 16.0  ;;  %v1292_v22 = vadd.f32 %v1291_v55, %v1290_v43  ;;  %v1321_v28 = vadd.f32 %v1320_v30, %v5851_v58  ;;  %vm2699_vm6 = vcmask 1044484  }
 0x31f   : > { %v2181_v45 = vsel %vm5847_vm8, %v2116_v32, inf  ;;  %vm5848_vm2 = vmmov %vm5841_vm5  ;;  %v1312_v13 = vadd.f32 %v5855_v19, %v5854_v31  ;;  %v2560_v42 = vmin.f32 %v2558_v41, %v2559_v15  ;;  %vm5544_vm15 = vcmask 1045509  }
 0x320   : > { %v1409_v52 = vsel %vm5848_vm2, %v1365_v39, inf  ;;  %vm5284_vm5 = vmand %vm2230_vm3, %vm2246_vm4  ;;  %v2182_v18 = vmin.f32 %v2180_v12, %v2181_v45  ;;  %v1293_v33 = vrot.slane %v1292_v22, 2  ;;  %v1304_v25 = vrot.slane %v1303_v11, 1 }
 0x321   : > { %v1410_v54 = vmin.f32 %v1408_v48, %v1409_v52  ;;  %v2278_v63 = vsel %vm5284_vm5, %v3409_v20, 16.0  ;;  %vm5852_vm7 = vmmov %vm5843_vm1  ;;  %v1313_v32 = vrot.slane %v1312_v13, 1  ;;  %v1525_v12 = vadd.f32 %v1524_v10, %v1523_v16 }
 0x322   : > { %v2321_v29 = vsel %vm5852_vm7, %v2277_v21, inf  ;;  %vm5853_vm4 = vmmov %vm5843_vm1  ;;  %v2183_v59 = vrot.slane %v2182_v18, 4  ;;  %v1294_v47 = vadd.f32 %v1293_v33, %v1292_v22  ;;  %vm2251_vm11 = vcmp.gt.f32.partialorder %v4940_v37, -inf }
 0x323   : > { %v2322_v53 = vsel %vm5853_vm4, %v2278_v63, inf  ;;  %v1411_v17 = vrot.slane %v1410_v54, 4  ;;  %vm5543_vm12 = vcmask 1046534   ;;  %v1322_v8 = vrot.slane %v1321_v28, 1 }
 0x324   : > { %v2323_v49 = vmin.f32 %v2321_v29, %v2322_v53  ;;  %v2184_v34 = vmin.f32 %v2182_v18, %v2183_v59  ;;  %v1295_v43 = vrot.slane %v1294_v47, 1  ;;  %v2437_v3 = vrot.slane %v5139_v9, 4 }
 0x325   : > { %v1412_v0 = vmin.f32 %v1410_v54, %v1411_v17  ;;  %v2561_v52 = vrot.slane %v2560_v42, 1  ;;  %vm5542_vm3 = vcmask 1047559   ;;  %v1305_v21 = vadd.f32 %v1304_v25, %v1303_v11 }
 0x326   : > { %v2324_v5 = vrot.slane %v2323_v49, 4  ;;  %v2185_v26 = vrot.slane %v2184_v34, 2  ;;  %v1296_v45 = vadd.f32 %v1295_v43, %v1294_v47  ;;  %v1314_v30 = vadd.f32 %v1313_v32, %v1312_v13 }
 0x327   : > { %v1413_v36 = vrot.slane %v1412_v0, 2  ;;  %v1526_v22 = vrot.slane %v1525_v12, 2  ;;  %v1323_v63 = vadd.f32 %v1322_v8, %v1321_v28  ;;  %v2438_v15 = vadd.f32 %v2437_v3, %v5139_v9 }
 0x328   : > { %v2325_v46 = vmin.f32 %v2323_v49, %v2324_v5  ;;  %v2186_v55 = vmin.f32 %v2184_v34, %v2185_v26  ;;  %v2700_v16 = vsel %vm2699_vm6, %v1296_v45, %v5216_v56  ;;  %vm2252_vm14 = vcmp.gt.f32.partialorder %v4956_v4, -inf }
 0x329   : > { %v1414_v39 = vmin.f32 %v1412_v0, %v1413_v36  ;;  %v2702_v29 = vsel %vm5544_vm15, %v1305_v21, %v2700_v16  ;;  %v2562_v11 = vmin.f32 %v2560_v42, %v2561_v52  ;;  %vm5856_vm7 = vcmask 64512  }
 0x32a   : > { %v2326_v48 = vrot.slane %v2325_v46, 2  ;;  %v2187_v41 = vrot.slane %v2186_v55, 1  ;;  %v2704_v33 = vsel %vm5543_vm12, %v1314_v30, %v2702_v29  ;;  %vm5857_vm4 = vmmov %vm5856_vm7  ;;  %v1527_v26 = vadd.f32 %v1526_v22, %v1525_v12  ;;  %v3063_v30 = vld [vmem:[%s5476_s3 + $0x8] sm:$0xff]  }
 0x32b   : > { %v1415_v18 = vrot.slane %v1414_v39, 1  ;;  %v5314_v56 = vsel %vm5542_vm3, %v1323_v63, %v2704_v33  ;;  %v2439_v25 = vrot.slane %v2438_v15, 2  ;;  %v2570_v21 = vrot.slane %v5224_v62, 1 }
 0x32c   : > { %v2327_v58 = vmin.f32 %v2325_v46, %v2326_v48  ;;  %v2188_v54 = vmin.f32 %v2186_v55, %v2187_v41  ;;  %v3077_v41 = vmov 0.0   ;;  %v1537_v63 = vrot.slane %v5239_v7, 1 }
 0x32d   : > { %v1416_v53 = vmin.f32 %v1414_v39, %v1415_v18  ;;  %v3062_v39 = vld [vmem:[%s5476_s3] sm:$0xff]   ;;  %3019 = vmatprep.subr.bf16.mxu1 %v3077_v41  ;;  %v2440_v18 = vadd.f32 %v2439_v25, %v2438_v15 }
 0x32e   : > { %v2328_v59 = vrot.slane %v2327_v58, 1  ;;  %vm2203_vm0 = vcmp.eq.f32.partialorder %v3407_v14, %v2188_v54  ;;  %vm2204_vm1 = vcmp.eq.f32.partialorder %v3409_v20, %v2188_v54  ;;  %3020 = vmatpush3.bf16.msra.mxu1 %v3062_v39 }
 0x32f   : > { %vm1452_vm9 = vcmp.eq.f32.partialorder %v3407_v14, %v1416_v53  ;;  %vm1453_vm8 = vcmp.eq.f32.partialorder %v3409_v20, %v1416_v53  ;;  %v2219_v9 = vsel %vm2203_vm0, -inf, %v5126_v24  ;;  %v2220_v19 = vsel %vm2204_vm1, -inf, %v5135_v6  ;;  %v5860_v24 = vld [vmem:[#allocation22_spill] sm:$0xff]  ;;  %3021 = vmatprep.subr.bf16.mxu1 %v3077_v41 }
 0x330   : > { %v2329_v17 = vmin.f32 %v2327_v58, %v2328_v59  ;;  %v1468_v49 = vsel %vm1452_vm9, %v4787_v27, 0.0  ;;  %v1469_v31 = vsel %vm1453_vm8, %v4767_v38, 0.0  ;;  %vm2235_vm2 = vcmp.eq.f32.partialorder %v2219_v9, -inf }
 0x331   : > { %v1512_v13 = vsel %vm5856_vm7, %v1468_v49, 0.0  ;;  %v1513_v10 = vsel %vm5857_vm4, %v1469_v31, 0.0  ;;  %vm5328_vm15 = vmand %vm2235_vm2, %vm2251_vm11  ;;  %vm2591_vm0 = vcmp.eq.f32.partialorder %v3407_v14, %v2562_v11  ;;  %vm5861_vm9 = vcmask 195712  }
 0x332   : > { %vm2365_vm3 = vcmp.eq.f32.partialorder %v3407_v14, %v2329_v17  ;;  %vm2366_vm12 = vcmp.eq.f32.partialorder %v3409_v20, %v2329_v17  ;;  %v1514_v38 = vadd.f32 %v1513_v10, %v1512_v13  ;;  %vm5862_vm8 = vmmov %vm5861_vm9  ;;  %vm2236_vm11 = vcmp.eq.f32.partialorder %v2220_v19, -inf  ;;  %3022 = vmatpush3.bf16.msra.mxu1 %v3063_v30 }
 0x333   : > { %v2381_v27 = vsel %vm2365_vm3, %v4805_v2, 0.0  ;;  %v2382_v6 = vsel %vm2366_vm12, %v5860_v24, 0.0  ;;  %vm2469_vm1 = vmxor %vm2365_vm3, %vm5684_vm13  ;;  %v2283_v0 = vsel %vm5328_vm15, %v3407_v14, 16.0  ;;  %vm2592_vm2 = vcmp.eq.f32.partialorder %v3409_v20, %v2562_v11  ;;  %3027 = vmatprep.subr.bf16.mxu1 %v3077_v41 }
 0x334   : > { %v2425_v28 = vsel %vm5861_vm9, %v2381_v27, 0.0  ;;  %v2426_v47 = vsel %vm5862_vm8, %v2382_v6, 0.0  ;;  %vm5339_vm7 = vmxor %vm2366_vm12, %vm5684_vm13  ;;  %v1515_v5 = vrot.slane %v1514_v38, 4  ;;  %v2607_v43 = vsel %vm2591_vm0, %v4684_v1, 0.0 }
 0x335   : > { %v2427_v42 = vadd.f32 %v2426_v47, %v2425_v28  ;;  %vm2485_vm3 = vmand %vm5276_vm10, %vm2469_vm1  ;;  %v2608_v50 = vsel %vm2592_vm2, %v4692_v57, 0.0  ;;  %v2449_v57 = vadd.f32 %v2448_v44, %v5205_v60  ;;  %v1528_v53 = vrot.slane %v1527_v26, 1 }
 0x336   : > { %vm2486_vm12 = vmand %vm5284_vm5, %vm5339_vm7  ;;  %v2501_v36 = vsel %vm2485_vm3, %v3407_v14, 16.0  ;;  %v1516_v32 = vadd.f32 %v1515_v5, %v1514_v38  ;;  %v1546_v11 = vrot.slane %v5300_v23, 1  ;;  %v2441_v17 = vrot.slane %v2440_v18, 1 }
 0x337   : > { %vm5865_vm4 = vmmov %vm5862_vm8  ;;  %v2428_v55 = vrot.slane %v2427_v42, 4  ;;  %v2502_v61 = vsel %vm2486_vm12, %v3409_v20, 16.0  ;;  %v2450_v49 = vrot.slane %v2449_v57, 1  ;;  %v2571_v38 = vmin.f32 %v5224_v62, %v2570_v21 }
 0x338   : > { %v2348_v46 = vsel %vm5865_vm4, %v2283_v0, inf  ;;  %vm5866_vm10 = vmmov %vm5865_vm4  ;;  %v1517_v4 = vrot.slane %v1516_v32, 2  ;;  %v1529_v6 = vadd.f32 %v1528_v53, %v1527_v26  ;;  %v1538_v28 = vadd.f32 %v1537_v63, %v5239_v7 }
 0x339   : > { %v2545_v12 = vsel %vm5866_vm10, %v2501_v36, inf  ;;  %vm5363_vm1 = vmand %vm2236_vm11, %vm2252_vm14  ;;  %v2429_v48 = vadd.f32 %v2428_v55, %v2427_v42  ;;  %v1547_v0 = vadd.f32 %v1546_v11, %v5300_v23  ;;  %vm5873_vm8 = vcmask 1045509  }
 0x33a   : > { %vm5869_vm5 = vmmov %vm5865_vm4  ;;  %v2284_v3 = vsel %vm5363_vm1, %v3409_v20, 16.0  ;;  %v1518_v16 = vadd.f32 %v1517_v4, %v1516_v32  ;;  %v2451_v36 = vadd.f32 %v2450_v49, %v2449_v57  ;;  %vm5874_vm7 = vcmask 1046534   ;;  %v5879_v4 = vld [vmem:[#allocation14_spill] sm:$0xff] }
 0x33b   : > { %v2546_v8 = vsel %vm5869_vm5, %v2502_v61, inf  ;;  %vm5870_vm14 = vmmov %vm5865_vm4  ;;  %v2430_v22 = vrot.slane %v2429_v48, 2  ;;  %vm5875_vm11 = vcmask 1047559   ;;  %vm2593_vm12 = vcmp.eq.f32.partialorder %v3407_v14, %v2571_v38 }
 0x33c   : > { %v2547_v45 = vmin.f32 %v2545_v12, %v2546_v8  ;;  %v2349_v52 = vsel %vm5870_vm14, %v2284_v3, inf  ;;  %vm5871_vm0 = vmmov %vm5865_vm4  ;;  %v1519_v33 = vrot.slane %v1518_v16, 1  ;;  %vm2594_vm4 = vcmp.eq.f32.partialorder %v3409_v20, %v2571_v38 }
 0x33d   : > { %v2350_v58 = vmin.f32 %v2348_v46, %v2349_v52  ;;  %v2658_v29 = vsel %vm5871_vm0, %v2607_v43, 0.0  ;;  %vm5872_vm9 = vmmov %vm5871_vm0  ;;  %v2431_v15 = vadd.f32 %v2430_v22, %v2429_v48  ;;  %v2442_v43 = vadd.f32 %v2441_v17, %v2440_v18 }
 0x33e   : > { %v2548_v54 = vrot.slane %v2547_v45, 4  ;;  %v2659_v60 = vsel %vm5872_vm9, %v2608_v50, 0.0  ;;  %v1520_v10 = vadd.f32 %v1519_v33, %v1518_v16  ;;  %vm5876_vm2 = vmmov %vm5873_vm8 }
 0x33f   : > { %v2351_v44 = vrot.slane %v2350_v58, 4  ;;  %v2660_v31 = vadd.f32 %v2659_v60, %v2658_v29  ;;  %v2432_v19 = vrot.slane %v2431_v15, 1  ;;  %vm5877_vm3 = vmmov %vm5874_vm7 }
 0x340   : > { %v2549_v59 = vmin.f32 %v2547_v45, %v2548_v54  ;;  %v2719_v5 = vsel %vm2699_vm6, %v1520_v10, %v5110_v35  ;;  %v5880_v45 = vld [vmem:[#allocation15_spill] sm:$0xff] }
 0x341   : > { %v2352_v9 = vmin.f32 %v2350_v58, %v2351_v44  ;;  %v2433_v47 = vadd.f32 %v2432_v19, %v2431_v15  ;;  %v2720_v25 = vsel %vm5873_vm8, %v1529_v6, %v2719_v5  ;;  %v2661_v46 = vrot.slane %v2660_v31, 4  ;;  %vm5878_vm8 = vmmov %vm5872_vm9  ;;  %v5884_v58 = vld [vmem:[#allocation11_spill] sm:$0xff] }
 0x342   : > { %v2550_v13 = vrot.slane %v2549_v59, 2  ;;  %v2721_v62 = vsel %vm5874_vm7, %v1538_v28, %v2720_v25  ;;  %v2610_v30 = vsel %vm2594_vm4, %v5884_v58, 0.0 }
 0x343   : > { %v2353_v27 = vrot.slane %v2352_v9, 2  ;;  %v2737_v26 = vsel %vm2699_vm6, %v2433_v47, %v5230_v51  ;;  %v2722_v55 = vsel %vm5875_vm11, %v1547_v0, %v2721_v62  ;;  %v2662_v50 = vadd.f32 %v2661_v46, %v2660_v31  ;;  %vm5881_vm11 = vmmov %vm5878_vm8 }
 0x344   : > { %v2551_v37 = vmin.f32 %v2549_v59, %v2550_v13  ;;  %v2738_v23 = vsel %vm5876_vm2, %v2442_v43, %v2737_v26  ;;  %2723 = vrot.lane.b32.xlu1 %v2722_v55, %s3078_s22  ;;  %vm5882_vm2 = vmmov %vm5878_vm8 }
 0x345   : > { %v2354_v42 = vmin.f32 %v2352_v9, %v2353_v27  ;;  %v2739_v35 = vsel %vm5877_vm3, %v2451_v36, %v2738_v23  ;;  %v2663_v16 = vrot.slane %v2662_v50, 2  ;;  %vm5888_vm4 = vmmov %vm5882_vm2 }
 0x346   : > { %v2552_v32 = vrot.slane %v2551_v37, 1 }
 0x347   : > { %v2355_v7 = vrot.slane %v2354_v42, 1  ;;  %v2664_v17 = vadd.f32 %v2663_v16, %v2662_v50 }
 0x348   : > { %v2553_v61 = vmin.f32 %v2551_v37, %v2552_v32 }
 0x349   : > { %v2356_v12 = vmin.f32 %v2354_v42, %v2355_v7  ;;  %v2665_v10 = vrot.slane %v2664_v17, 1 }
 0x34a   : > { %vm2589_vm10 = vcmp.eq.f32.partialorder %v3407_v14, %v2553_v61  ;;  %vm2590_vm5 = vcmp.eq.f32.partialorder %v3409_v20, %v2553_v61 }
 0x34b   : > { %v2605_v51 = vsel %vm2589_vm10, %v4805_v2, 0.0  ;;  %v2606_v8 = vsel %vm2590_vm5, %v5860_v24, 0.0  ;;  %vm2371_vm14 = vcmp.eq.f32.partialorder %v3407_v14, %v2356_v12  ;;  %vm2372_vm0 = vcmp.eq.f32.partialorder %v3409_v20, %v2356_v12  ;;  %v5883_v24 = vld [vmem:[#allocation12_spill] sm:$0xff] }
 0x34c   : > { %v2649_v3 = vsel %vm5872_vm9, %v2605_v51, 0.0  ;;  %v2650_v39 = vsel %vm5878_vm8, %v2606_v8, 0.0  ;;  %v2387_v48 = vsel %vm2371_vm14, %v5879_v4, 0.0  ;;  %v2388_v52 = vsel %vm2372_vm0, %v5880_v45, 0.0  ;;  %vm2475_vm7 = vmxor %vm2371_vm14, %vm5684_vm13 }
 0x34d   : > { %v2651_v57 = vadd.f32 %v2650_v39, %v2649_v3  ;;  %v2452_v21 = vsel %vm5881_vm11, %v2387_v48, 0.0  ;;  %v2453_v2 = vsel %vm5882_vm2, %v2388_v52, 0.0  ;;  %vm2476_vm3 = vmxor %vm2372_vm0, %vm5684_vm13  ;;  %v2609_v18 = vsel %vm2593_vm12, %v5883_v24, 0.0  ;;  %v3064_v24 = vld [vmem:[%s5478_s5] sm:$0xff]  }
 0x34e   : > { %v2454_v22 = vadd.f32 %v2453_v2, %v2452_v21  ;;  %vm2491_vm10 = vmand %vm5328_vm15, %vm2475_vm7  ;;  %v2666_v5 = vadd.f32 %v2665_v10, %v2664_v17  ;;  %vm5889_vm15 = vcmask 1045509   ;;  %vm5893_vm11 = vcmask 1046534  }
 0x34f   : > { %v2652_v54 = vrot.slane %v2651_v57, 4  ;;  %vm2492_vm5 = vmand %vm5363_vm1, %vm2476_vm3  ;;  %v2507_v63 = vsel %vm2491_vm10, %v3407_v14, 16.0  ;;  %vm5890_vm1 = vcmask 1047559   ;;  %vm2761_vm3 = vcmask 130048  }
 0x350   : > { %v2455_v29 = vrot.slane %v2454_v22, 4  ;;  %v2508_v60 = vsel %vm2492_vm5, %v3409_v20, 16.0  ;;  %vm5885_vm13 = vmmov %vm5882_vm2  ;;  %vm5895_vm10 = vcmask 64512   ;;  %vm2763_vm5 = vcmask 195584  }
 0x351   : > { %v2572_v44 = vsel %vm5885_vm13, %v2507_v63, inf  ;;  %vm5886_vm12 = vmmov %vm5882_vm2  ;;  %v2653_v59 = vadd.f32 %v2652_v54, %v2651_v57  ;;  %v2573_v33 = vsel %vm5888_vm4, %v2508_v60, inf  ;;  %vm5896_vm13 = vcmask 261120   ;;  %v2979_v60 = vld [vmem:[#allocation2] ss:$0 sm:$0xff] }
 0x352   : > { %v2667_v53 = vsel %vm5886_vm12, %v2609_v18, 0.0  ;;  %vm5887_vm14 = vmmov %vm5882_vm2  ;;  %v2456_v34 = vadd.f32 %v2455_v29, %v2454_v22  ;;  %v2574_v11 = vmin.f32 %v2572_v44, %v2573_v33  ;;  %vm2894_vm12 = vcmask 7168  }
 0x353   : > { %v2668_v15 = vsel %vm5887_vm14, %v2610_v30, 0.0  ;;  %v2654_v9 = vrot.slane %v2653_v59, 2  ;;  %vm5891_vm8 = vmmov %vm5882_vm2 }
 0x354   : > { %v2669_v1 = vadd.f32 %v2668_v15, %v2667_v53  ;;  %v2457_v49 = vrot.slane %v2456_v34, 2  ;;  %v2575_v31 = vrot.slane %v2574_v11, 4  ;;  %vm5892_vm7 = vmmov %vm5882_vm2 }
 0x355   : > { %v2655_v19 = vadd.f32 %v2654_v9, %v2653_v59  ;;  %vm5894_vm2 = vmmov %vm5890_vm1 }
 0x356   : > { %v2576_v13 = vmin.f32 %v2574_v11, %v2575_v31  ;;  %v2458_v38 = vadd.f32 %v2457_v49, %v2456_v34  ;;  %v2670_v6 = vrot.slane %v2669_v1, 4 }
 0x357   : > { %v2656_v27 = vrot.slane %v2655_v19, 1 }
 0x358   : > { %v2577_v28 = vrot.slane %v2576_v13, 2  ;;  %v2459_v47 = vrot.slane %v2458_v38, 1  ;;  %v2671_v43 = vadd.f32 %v2670_v6, %v2669_v1 }
 0x359   : > { %v2657_v37 = vadd.f32 %v2656_v27, %v2655_v19 }
 0x35a   : > { %v2578_v0 = vmin.f32 %v2576_v13, %v2577_v28  ;;  %v2460_v42 = vadd.f32 %v2459_v47, %v2458_v38  ;;  %v2672_v26 = vrot.slane %v2671_v43, 2 }
 0x35b   : > { %v2753_v25 = vsel %vm2699_vm6, %v2657_v37, %v5196_v40  ;;  %vm3079_vm6 = vmmov 0  }
 0x35c   : > { %v2579_v36 = vrot.slane %v2578_v0, 1  ;;  %v2754_v46 = vsel %vm5889_vm15, %v2666_v5, %v2753_v25  ;;  %v2740_v32 = vsel %vm5890_vm1, %v2460_v42, %v2739_v35  ;;  %v2673_v12 = vadd.f32 %v2672_v26, %v2671_v43  ;;  %3023 = vmatprep.mubr.msk.bf16.mxu1 %vm3079_vm6, %v3077_v41 }
 0x35e   : > { %v2580_v62 = vmin.f32 %v2578_v0, %v2579_v36 }
 0x360   : > { %vm2595_vm0 = vcmp.eq.f32.partialorder %v3407_v14, %v2580_v62  ;;  %vm2596_vm9 = vcmp.eq.f32.partialorder %v3409_v20, %v2580_v62  ;;  %v2674_v14 = vrot.slane %v2673_v12, 1 }
 0x361   : > { %v2611_v7 = vsel %vm2595_vm0, %v5879_v4, 0.0  ;;  %v2612_v55 = vsel %vm2596_vm9, %v5880_v45, 0.0 }
 0x362   : > { %v2676_v23 = vsel %vm5891_vm8, %v2611_v7, 0.0  ;;  %v2677_v40 = vsel %vm5892_vm7, %v2612_v55, 0.0  ;;  %v2675_v8 = vadd.f32 %v2674_v14, %v2673_v12 }
 0x363   : > { %v2678_v61 = vadd.f32 %v2677_v40, %v2676_v23 }
 0x364   : > { %v2755_v39 = vsel %vm5893_vm11, %v2675_v8, %v2754_v46 }
 0x365   : > { %v2679_v50 = vrot.slane %v2678_v61, 4 }
 0x367   : > { %v2680_v51 = vadd.f32 %v2679_v50, %v2678_v61 }
 0x369   : > { %v2681_v35 = vrot.slane %v2680_v51, 2 }
 0x36b   : > { %v2682_v20 = vadd.f32 %v2681_v35, %v2680_v51 }
 0x36d   : > { %v2683_v3 = vrot.slane %v2682_v20, 1 }
 0x36f   : > { %v2684_v4 = vadd.f32 %v2683_v3, %v2682_v20 }
 0x371   : > { %v2756_v48 = vsel %vm5894_vm2, %v2684_v4, %v2755_v39 }
 0x372   : > { %2757 = vrot.lane.b32.xlu0 %v2756_v48, %s3078_s22 }
 0x3b6   : > { %v2724_v45 = vpop.permute.xlu1 %2723 }
 0x3b7   : > { %v2760_v52 = vsel %vm5895_vm10, %v5314_v56, %v2724_v45  ;;  %v2975_v56 = vld [vmem:[%s5477_s4] ss:$0 sm:$0xff] }
 0x3b8   : > { %v2762_v57 = vsel %vm2761_vm3, %v2760_v52, %v2740_v32 }
 0x3e4   : > { %v2758_v21 = vpop.permute.xlu0 %2757 }
 0x3e5   : > { %v2764_v2 = vsel %vm2763_vm5, %v2762_v57, %v2758_v21 }
 0x3e6   : > { %v2765_v18 = vpack.c.bf16 %v2764_v2, %v2764_v2 }
 0x3e8   : > { %3024 = vmatmul.mubr.msk.bf16.vlgmr.msra.gmra.mrb[4].mxu1 %vm5896_vm13, %v2765_v18 }
 0x3e9   : > { %3028 = vmatpush3.bf16.msra.mxu1 %v3064_v24  ;;  %3029 = vmatprep.mubr.msk.bf16.mxu1 %vm3079_vm6, %v3077_v41 }
 0x4bb   : > { %v2826_v58 = vpop.f32.mrb[4].mxu1 }
 0x4bc   : > { %v2827_v30 = vadd.f32 %v2975_v56, %v2826_v58  ;;  %v3025_v16 = vpop.f32.mrb[5].mxu1 }
 0x4bd   : > { %v2829_v22 = vpop.f32.mrb[6].mxu1 }
 0x4be   : > { %v2832_v54 = vmax.f32 %v2827_v30, 0.0  ;;  %v3026_v63 = vpop.f32.mrb[7].mxu1 }
 0x4c0   : > { %v2833_v29 = vpack.c.bf16 %v2832_v54, %v2832_v54 }
 0x4c2   : > { %3030 = vmatmul.mubr.msk.bf16.vlgmr.msra.gmra.mrb[8].mxu1 %vm2761_vm3, %v2833_v29 }
 0x595   : > { %v2886_v44 = vpop.f32.mrb[8].mxu1 }
 0x596   : > { %v2887_v53 = vadd.f32 %v2979_v60, %v2886_v44  ;;  %v3031_v41 = vpop.f32.mrb[9].mxu1 }
 0x597   : > { %v2889_v15 = vpop.f32.mrb[10].mxu1 }
 0x598   : > { %v2892_v59 = vmax.f32 %v2887_v53, 0.0  ;;  %v3032_v33 = vpop.f32.mrb[11].mxu1 }
 0x59a   : > { %v2893_v34 = vmin.f32 %v2892_v59, 1.0 }
 0x59c   : > { %2895 = vst.msk [vmem:[%s280_s8] sm:$0xff] %vm2894_vm12, %v2893_v34 }
 0x59d PF: > { %s19_s26 = sadd.s32 1, %s3071_s26  }
 0x59e   : > { %p16_p5 = scmp.ge.s32.totalorder %s19_s26, 4  }
 0x5a0   :  { %18 = sbr.rel (!%p16_p5) target bundleno = 3 (0x3), region = 78 }

</bundles_post_ra>
